<compile_context>
chip_gen: v5e
topology: v5e:2x2
jax: 0.10.0
libtpu: 0.0.40
codegen_flags: <defaults>
</compile_context>

<pallas_src>
import math

import jax
import jax.numpy as jnp
from jax import lax
from jax.experimental import pallas as pl
from jax.experimental.pallas import tpu as pltpu


# ----------------------------------------------------------------------------
# Helpers (pure jnp — usable both inside the kernel and at top level)
# ----------------------------------------------------------------------------
def _layer_norm(x, g, b, eps=1e-5):
    # matches torch.nn.LayerNorm (biased variance, eps inside rsqrt)
    mu = jnp.mean(x, axis=-1, keepdims=True)
    var = jnp.mean((x - mu) ** 2, axis=-1, keepdims=True)
    return (x - mu) * lax.rsqrt(var + eps) * g + b


def _split_heads(x2d, n_heads):
    # [N, H*dk] -> [H, N, dk]  (the only relayouts in the kernel, done on bf16)
    n, d = x2d.shape
    dk = d // n_heads
    return jnp.transpose(x2d.reshape(n, n_heads, dk), (1, 0, 2))


# ----------------------------------------------------------------------------
# Fused EncoderLayer kernel: grid = (batch, query tile)
# ----------------------------------------------------------------------------
def make_encoder_layer_kernel(n_heads, pre_norm, return_attn):
    H = n_heads

    def kernel(x_ref, bias_ref,
               wq_ref, bq_ref, wkv_ref, bkv_ref, wo_ref, bo_ref,
               ln1g_ref, ln1b_ref, ln2g_ref, ln2b_ref,
               w1_ref, b1_ref, w2_ref, b2_ref,
               *rest):
        if return_attn:
            out_ref, attn_ref, k_sc, v_sc = rest
        else:
            (out_ref, k_sc, v_sc), attn_ref = rest, None

        qi = pl.program_id(1)
        _, T, D = x_ref.shape
        tq = out_ref.shape[1]

        ln1g, ln1b = ln1g_ref[...], ln1b_ref[...]
        ln2g, ln2b = ln2g_ref[...], ln2b_ref[...]

        # ---- K / V projection: once per batch element, into head-major bf16
        #      scratch that persists across the query-tile axis ("arbitrary").
        @pl.when(qi == 0)
        def _():
            x_full = x_ref[0].astype(jnp.float32)                         # [T, D]
            xin = _layer_norm(x_full, ln1g, ln1b) if pre_norm else x_full
            kv = jnp.dot(xin.astype(jnp.bfloat16), wkv_ref[...],
                         preferred_element_type=jnp.float32) + bkv_ref[...]
            kv = kv.astype(jnp.bfloat16)                                   # [T, 2D]
            k_sc[...] = _split_heads(kv[:, :D], H)                         # [H, T, dk]
            v_sc[...] = _split_heads(kv[:, D:], H)                         # [H, T, dk]

        # ---- this query tile -------------------------------------------------
        row0 = pl.multiple_of(qi * tq, tq)
        x_t = x_ref[0, pl.ds(row0, tq), :].astype(jnp.float32)             # [tq, D]
        residual = x_t
        xin_t = _layer_norm(x_t, ln1g, ln1b) if pre_norm else x_t

        # 1/sqrt(dk) is pre-folded into wq / bq (see init_encoder_params)
        q = jnp.dot(xin_t.astype(jnp.bfloat16), wq_ref[...],
                    preferred_element_type=jnp.float32) + bq_ref[...]      # [tq, D]
        qh = _split_heads(q.astype(jnp.bfloat16), H)                       # [H, tq, dk]

        bias = bias_ref[0].astype(jnp.float32)                             # [tq, T]

        # scores + softmax; f32 math, intermediates overwritten in place
        s = jnp.einsum('hqd,hkd->hqk', qh, k_sc[...],
                       preferred_element_type=jnp.float32)                 # [H, tq, T]
        s = s + bias[None]
        s = jnp.exp(s - jnp.max(s, axis=-1, keepdims=True))
        denom = jnp.sum(s, axis=-1, keepdims=True)
        p16 = (s * pl.reciprocal(denom, approx=True)).astype(jnp.bfloat16)
        if return_attn:
            attn_ref[0] = p16                                              # bf16 writeback

        ctx = jnp.einsum('hqk,hkd->hqd', p16, v_sc[...],
                         preferred_element_type=jnp.float32)               # [H, tq, dk]
        ctx = jnp.transpose(ctx.astype(jnp.bfloat16), (1, 0, 2)).reshape(tq, D)

        attn_out = jnp.dot(ctx, wo_ref[...],
                           preferred_element_type=jnp.float32) + bo_ref[...]

        x1 = residual + attn_out                  # dropout1 == identity (eval)
        if not pre_norm:
            x1 = _layer_norm(x1, ln1g, ln1b)

        # ---- position-wise feed forward --------------------------------------
        residual = x1
        xin2 = _layer_norm(x1, ln2g, ln2b) if pre_norm else x1
        h1 = jnp.dot(xin2.astype(jnp.bfloat16), w1_ref[...],
                     preferred_element_type=jnp.float32) + b1_ref[...]
        h1 = jnp.maximum(h1, 0.0)
        ff = jnp.dot(h1.astype(jnp.bfloat16), w2_ref[...],
                     preferred_element_type=jnp.float32) + b2_ref[...]
        x2 = residual + ff                        # dropout2 == identity (eval)
        if not pre_norm:
            x2 = _layer_norm(x2, ln2g, ln2b)

        out_ref[0] = x2.astype(out_ref.dtype)

    return kernel


# ----------------------------------------------------------------------------
# Pallas wrapper for one EncoderLayer
# ----------------------------------------------------------------------------
_W_ORDER = ('wq', 'bq', 'wkv', 'bkv', 'wo', 'bo',
            'ln1g', 'ln1b', 'ln2g', 'ln2b', 'w1', 'b1', 'w2', 'b2')

_SINGLE_BUFFER_OK = True   # flipped off if this JAX rejects pl.Buffered(1)


def _const_spec(shape, single_buffer):
    """Whole-array operand, same block every grid step (resident weights)."""
    index_map = lambda b, qi: (0,) * len(shape)
    if single_buffer:
        try:
            # constant index map -> single buffer is enough; halves weight VMEM
            return pl.BlockSpec(shape, index_map, pipeline_mode=pl.Buffered(1))
        except Exception:
            pass
    return pl.BlockSpec(shape, index_map)


def _default_vmem_limit_bytes():
    # ~3/4 of physical VMEM, capped at 100 MiB (v5e/v6e -> 96 MiB, v7x -> 48 MiB)
    try:
        cap = int(pltpu.get_tpu_info().vmem_capacity_bytes)
        return max(32 * 1024 * 1024, min((cap * 3) // 4, 100 * 1024 * 1024))
    except Exception:
        return 48 * 1024 * 1024


def _pick_q_tile(T, target=256):
    if T <= target:
        return T
    for cand in range(target - target % 8, 7, -8):   # largest /8 divisor <= target
        if T % cand == 0:
            return cand
    return T


def encoder_layer_forward(x, bias, params, n_heads, pre_norm=False,
                          return_attn=True, q_tile=None, vmem_limit_bytes=None):
    global _SINGLE_BUFFER_OK
    B, T, D = x.shape
    H = n_heads
    dk = D // H
    d_ff = params['w1'].shape[1]

    tq = _pick_q_tile(T) if q_tile is None else q_tile
    assert T % tq == 0 and (tq % 8 == 0 or tq == T), (T, tq)
    nq = T // tq
    if vmem_limit_bytes is None:
        vmem_limit_bytes = _default_vmem_limit_bytes()

    kernel = make_encoder_layer_kernel(H, pre_norm, return_attn)

    out_specs = [pl.BlockSpec((1, tq, D), lambda b, qi: (b, qi, 0))]
    out_shape = [jax.ShapeDtypeStruct((B, T, D), x.dtype)]
    if return_attn:
        # bf16 attention-prob writeback (halves the dominant O(B*H*T^2) traffic)
        out_specs.append(pl.BlockSpec((1, H, tq, T), lambda b, qi: (b, 0, qi, 0)))
        out_shape.append(jax.ShapeDtypeStruct((B, H, T, T), jnp.bfloat16))

    scratch_shapes = [pltpu.VMEM((H, T, dk), jnp.bfloat16),   # K (head-major)
                      pltpu.VMEM((H, T, dk), jnp.bfloat16)]   # V (head-major)

    # advisory cost estimate for the XLA scheduler
    def _nbytes(a):
        return int(a.size) * int(a.dtype.itemsize)
    flops = 2 * B * T * D * (4 * D + 2 * T + 2 * d_ff)
    bytes_accessed = _nbytes(x) + _nbytes(bias) + B * T * D * int(x.dtype.itemsize)
    bytes_accessed += sum(_nbytes(params[n]) for n in _W_ORDER)
    if return_attn:
        bytes_accessed += B * H * T * T * 2
    cost = pl.CostEstimate(flops=int(flops), transcendentals=int(B * H * T * T),
                           bytes_accessed=int(bytes_accessed))

    def build_and_call(single_buffer):
        in_specs = [
            pl.BlockSpec((1, T, D), lambda b, qi: (b, 0, 0)),    # x: full seq per batch
            pl.BlockSpec((1, tq, T), lambda b, qi: (b, qi, 0)),  # bf16 additive mask bias rows
        ]
        for name in _W_ORDER:
            in_specs.append(_const_spec(params[name].shape, single_buffer))
        return pl.pallas_call(
            kernel,
            grid=(B, nq),
            in_specs=in_specs,
            out_specs=tuple(out_specs),
            out_shape=tuple(out_shape),
            scratch_shapes=scratch_shapes,
            compiler_params=pltpu.CompilerParams(
                # batch axis megacore-parallel; query-tile axis sequential so the
                # per-batch K/V scratch written at qi==0 can be reused.
                dimension_semantics=("parallel", "arbitrary"),
                vmem_limit_bytes=int(vmem_limit_bytes)),
            cost_estimate=cost,
        )(x, bias, *[params[n] for n in _W_ORDER])

    if _SINGLE_BUFFER_OK:
        try:
            outs = build_and_call(True)
        except Exception:
            _SINGLE_BUFFER_OK = False
            outs = build_and_call(False)
    else:
        outs = build_and_call(False)

    if return_attn:
        y, attn = outs
        return y, attn
    y = outs[0] if isinstance(outs, (tuple, list)) else outs
    return y, None


# ----------------------------------------------------------------------------
# Plain-JAX glue: positional encoding, mask -> bias, layer stack, param init
# ----------------------------------------------------------------------------
def sinusoid_pos_encoding(T, D):
    pos = jnp.arange(T, dtype=jnp.float32)[:, None]
    i = jnp.arange(D, dtype=jnp.float32)[None, :]
    angle = pos / jnp.power(10000.0, (2.0 * jnp.floor(i / 2.0)) / D)
    pe = jnp.where((jnp.arange(D)[None, :] % 2) == 0, jnp.sin(angle), jnp.cos(angle))
    return pe[None]  # [1, T, D]


def mask_to_bias(mask):
    # [B,T,T] {0,1} mask -> bf16 additive bias (0 -> -1e9, 1 -> 0); computed once
    # outside the kernel so the kernel never sees the dense f32 mask.
    return jnp.where(mask == 0.0, jnp.float32(-1e9), jnp.float32(0.0)).astype(jnp.bfloat16)


def init_encoder_params(key, d_model, n_heads, d_ff, n_layers):
    dk = d_model // n_heads
    scale = 1.0 / math.sqrt(dk)

    def linear(k, din, dout):
        bound = 1.0 / math.sqrt(din)
        return jax.random.uniform(k, (din, dout), jnp.float32, -bound, bound)

    layers = []
    for l in range(n_layers):
        k = jax.random.fold_in(key, l)
        ks = jax.random.split(k, 6)
        wq = linear(ks[0], d_model, d_model) * scale   # 1/sqrt(dk) folded into Wq (+ bq)
        wk = linear(ks[1], d_model, d_model)
        wv = linear(ks[2], d_model, d_model)
        layers.append({
            # matmul weights stored bf16 [in, out]; biases / LayerNorm params stay f32
            'wq': wq.astype(jnp.bfloat16),
            'bq': jnp.zeros((1, d_model), jnp.float32),          # zero bias * scale == zero
            'wkv': jnp.concatenate([wk, wv], axis=1).astype(jnp.bfloat16),
            'bkv': jnp.zeros((1, 2 * d_model), jnp.float32),
            'wo': linear(ks[3], d_model, d_model).astype(jnp.bfloat16),
            'bo': jnp.zeros((1, d_model), jnp.float32),
            'ln1g': jnp.ones((1, d_model), jnp.float32),
            'ln1b': jnp.zeros((1, d_model), jnp.float32),
            'ln2g': jnp.ones((1, d_model), jnp.float32),
            'ln2b': jnp.zeros((1, d_model), jnp.float32),
            'w1': linear(ks[4], d_model, d_ff).astype(jnp.bfloat16),
            'b1': jnp.zeros((1, d_ff), jnp.float32),
            'w2': linear(ks[5], d_ff, d_model).astype(jnp.bfloat16),
            'b2': jnp.zeros((1, d_model), jnp.float32),
        })
    return {'layers': layers,
            'final_g': jnp.ones((1, d_model), jnp.float32),   # only used when pre_norm
            'final_b': jnp.zeros((1, d_model), jnp.float32)}


def transformer_encoder_forward(inputs, mask, params, n_heads, pre_norm=False,
                                return_attn=True, q_tile=None):
    B, T, D = inputs.shape
    pe = sinusoid_pos_encoding(T, D)            # PositionalEncoding: x + pe, returns pos too
    enc = inputs + pe
    pos = pe
    bias = mask_to_bias(mask)
    attns = []
    for layer_params in params['layers']:
        enc, attn = encoder_layer_forward(enc, bias, layer_params, n_heads,
                                          pre_norm=pre_norm, return_attn=return_attn,
                                          q_tile=q_tile)
        attns.append(attn)
    if pre_norm:
        enc = _layer_norm(enc, params['final_g'], params['final_b'])
    return enc, mask, {'attns': attns, 'pos': pos}


# ----------------------------------------------------------------------------
if __name__ == "__main__":
    # small shapes consistent with the module; T=16 with q_tile=8 exercises the
    # query-tiled path (2 tiles per sequence, K/V scratch reused across tiles).
    B, T, D, H, D_FF, N_LAYERS = 2, 16, 32, 4, 64, 2

    key = jax.random.PRNGKey(0)
    k_inp, k_par = jax.random.split(key)
    inputs = jax.random.normal(k_inp, (B, T, D), jnp.float32)

    # mask: [B, T, T], 1.0 = attend, 0.0 = masked; batch 1 masks the last 4 keys
    mask = jnp.ones((B, T, T), jnp.float32)
    mask = mask.at[1, :, T - 4:].set(0.0)

    params = init_encoder_params(k_par, D, H, D_FF, N_LAYERS)

    enc_out, mask_out, extra = transformer_encoder_forward(
        inputs, mask, params, n_heads=H, pre_norm=False, return_attn=True, q_tile=8)

    jax.block_until_ready(enc_out)
    jax.block_until_ready(extra['attns'])

    assert enc_out.shape == (B, T, D)
    assert all(a.shape == (B, H, T, T) for a in extra['attns'])
    assert bool(jnp.all(jnp.isfinite(enc_out)))
    # attention rows sum to ~1 (probs are stored bf16, math is f32)
    row_sums = jnp.sum(extra['attns'][0].astype(jnp.float32), axis=-1)
    assert bool(jnp.allclose(row_sums, 1.0, atol=2e-2))
    # masked key positions get ~zero probability
    assert bool(jnp.all(extra['attns'][0][1, :, :, T - 4:].astype(jnp.float32) < 1e-3))

    print("KERNEL_OK")
</pallas_src>

<mosaic_0001>
module attributes {stable_mosaic.version = 11 : i64} {
  func.func @kernel(%arg0: i32, %arg1: i32, %arg2: memref<1x16x32xf32, #tpu.memory_space<vmem>>, %arg3: memref<1x8x16xbf16, #tpu.memory_space<vmem>>, %arg4: memref<32x32xbf16, #tpu.memory_space<vmem>>, %arg5: memref<1x32xf32, #tpu.memory_space<vmem>>, %arg6: memref<32x64xbf16, #tpu.memory_space<vmem>>, %arg7: memref<1x64xf32, #tpu.memory_space<vmem>>, %arg8: memref<32x32xbf16, #tpu.memory_space<vmem>>, %arg9: memref<1x32xf32, #tpu.memory_space<vmem>>, %arg10: memref<1x32xf32, #tpu.memory_space<vmem>>, %arg11: memref<1x32xf32, #tpu.memory_space<vmem>>, %arg12: memref<1x32xf32, #tpu.memory_space<vmem>>, %arg13: memref<1x32xf32, #tpu.memory_space<vmem>>, %arg14: memref<32x64xbf16, #tpu.memory_space<vmem>>, %arg15: memref<1x64xf32, #tpu.memory_space<vmem>>, %arg16: memref<64x32xbf16, #tpu.memory_space<vmem>>, %arg17: memref<1x32xf32, #tpu.memory_space<vmem>>, %arg18: memref<1x8x32xf32, #tpu.memory_space<vmem>>, %arg19: memref<1x4x8x16xbf16, #tpu.memory_space<vmem>>, %arg20: memref<4x16x8xbf16, #tpu.memory_space<vmem>>, %arg21: memref<4x16x8xbf16, #tpu.memory_space<vmem>>) attributes {dimension_semantics = [#tpu.dimension_semantics<parallel>, #tpu.dimension_semantics<arbitrary>], iteration_bounds = array<i64: 2, 2>, scalar_prefetch = 0 : i64, scratch_operands = 2 : i64, tpu.core_type = #tpu.core_type<tc>, window_params = [{transform_indices = @transform_0, window_bounds = array<i64: 1, 16, 32>}, {transform_indices = @transform_1, window_bounds = array<i64: 1, 8, 16>}, {pipeline_mode = #tpu.pipeline_mode<synchronous>, transform_indices = @transform_2, window_bounds = array<i64: 32, 32>}, {pipeline_mode = #tpu.pipeline_mode<synchronous>, transform_indices = @transform_3, window_bounds = array<i64: 1, 32>}, {pipeline_mode = #tpu.pipeline_mode<synchronous>, transform_indices = @transform_4, window_bounds = array<i64: 32, 64>}, {pipeline_mode = #tpu.pipeline_mode<synchronous>, transform_indices = @transform_5, window_bounds = array<i64: 1, 64>}, {pipeline_mode = #tpu.pipeline_mode<synchronous>, transform_indices = @transform_6, window_bounds = array<i64: 32, 32>}, {pipeline_mode = #tpu.pipeline_mode<synchronous>, transform_indices = @transform_7, window_bounds = array<i64: 1, 32>}, {pipeline_mode = #tpu.pipeline_mode<synchronous>, transform_indices = @transform_8, window_bounds = array<i64: 1, 32>}, {pipeline_mode = #tpu.pipeline_mode<synchronous>, transform_indices = @transform_9, window_bounds = array<i64: 1, 32>}, {pipeline_mode = #tpu.pipeline_mode<synchronous>, transform_indices = @transform_10, window_bounds = array<i64: 1, 32>}, {pipeline_mode = #tpu.pipeline_mode<synchronous>, transform_indices = @transform_11, window_bounds = array<i64: 1, 32>}, {pipeline_mode = #tpu.pipeline_mode<synchronous>, transform_indices = @transform_12, window_bounds = array<i64: 32, 64>}, {pipeline_mode = #tpu.pipeline_mode<synchronous>, transform_indices = @transform_13, window_bounds = array<i64: 1, 64>}, {pipeline_mode = #tpu.pipeline_mode<synchronous>, transform_indices = @transform_14, window_bounds = array<i64: 64, 32>}, {pipeline_mode = #tpu.pipeline_mode<synchronous>, transform_indices = @transform_15, window_bounds = array<i64: 1, 32>}, {transform_indices = @transform_16, window_bounds = array<i64: 1, 8, 32>}, {transform_indices = @transform_17, window_bounds = array<i64: 1, 4, 8, 16>}]} {
    %c0 = arith.constant 0 : index
    %c0_0 = arith.constant 0 : index
    %0 = vector.load %arg10[%c0, %c0_0] : memref<1x32xf32, #tpu.memory_space<vmem>>, vector<1x32xf32>
    %c0_1 = arith.constant 0 : index
    %c0_2 = arith.constant 0 : index
    %1 = vector.load %arg11[%c0_1, %c0_2] : memref<1x32xf32, #tpu.memory_space<vmem>>, vector<1x32xf32>
    %c0_3 = arith.constant 0 : index
    %c0_4 = arith.constant 0 : index
    %2 = vector.load %arg12[%c0_3, %c0_4] : memref<1x32xf32, #tpu.memory_space<vmem>>, vector<1x32xf32>
    %c0_5 = arith.constant 0 : index
    %c0_6 = arith.constant 0 : index
    %3 = vector.load %arg13[%c0_5, %c0_6] : memref<1x32xf32, #tpu.memory_space<vmem>>, vector<1x32xf32>
    %c0_i32 = arith.constant 0 : i32
    %4 = arith.cmpi eq, %arg1, %c0_i32 : i32
    %5 = arith.extui %4 : i1 to i32
    %c0_i32_7 = arith.constant 0 : i32
    %6 = arith.cmpi ne, %5, %c0_i32_7 : i32
    scf.if %6 {
      %c0_60 = arith.constant 0 : index
      %c0_61 = arith.constant 0 : index
      %c0_62 = arith.constant 0 : index
      %116 = vector.load %arg2[%c0_60, %c0_61, %c0_62] : memref<1x16x32xf32, #tpu.memory_space<vmem>>, vector<1x16x32xf32>
      %117 = vector.shape_cast %116 : vector<1x16x32xf32> to vector<16x32xf32>
      %118 = arith.truncf %117 : vector<16x32xf32> to vector<16x32xbf16>
      %c0_63 = arith.constant 0 : index
      %c0_64 = arith.constant 0 : index
      %119 = vector.load %arg6[%c0_63, %c0_64] : memref<32x64xbf16, #tpu.memory_space<vmem>>, vector<32x64xbf16>
      %cst_65 = arith.constant dense<0.000000e+00> : vector<16x64xf32>
      %120 = tpu.matmul %118, %119, %cst_65 {dimension_numbers = #tpu.dot_dimension_numbers<[1], [0], [0], [1], [0, 0, 1, 1], [], []>} : vector<16x32xbf16>, vector<32x64xbf16>, vector<16x64xf32> -> vector<16x64xf32>
      %c0_66 = arith.constant 0 : index
      %c0_67 = arith.constant 0 : index
      %121 = vector.load %arg7[%c0_66, %c0_67] : memref<1x64xf32, #tpu.memory_space<vmem>>, vector<1x64xf32>
      %122 = vector.broadcast %121 : vector<1x64xf32> to vector<16x64xf32>
      %123 = arith.addf %120, %122 : vector<16x64xf32>
      %124 = arith.truncf %123 : vector<16x64xf32> to vector<16x64xbf16>
      %125 = vector.extract_strided_slice %124 {offsets = [0, 0], sizes = [16, 32], strides = [1, 1]} : vector<16x64xbf16> to vector<16x32xbf16>
      %126 = vector.shape_cast %125 : vector<16x32xbf16> to vector<16x4x8xbf16>
      %127 = tpu.transpose %126, [1, 0, 2] : vector<16x4x8xbf16> -> vector<4x16x8xbf16>
      %c0_68 = arith.constant 0 : index
      %c0_69 = arith.constant 0 : index
      %c0_70 = arith.constant 0 : index
      %128 = vector.load %arg20[%c0_68, %c0_69, %c0_70] : memref<4x16x8xbf16, #tpu.memory_space<vmem>>, vector<4x16x8xbf16>
      tpu.vector_store %arg20[%c0_68, %c0_69, %c0_70], %127 {strides = array<i32>} : memref<4x16x8xbf16, #tpu.memory_space<vmem>>, vector<4x16x8xbf16>,
      %129 = vector.extract_strided_slice %124 {offsets = [0, 32], sizes = [16, 32], strides = [1, 1]} : vector<16x64xbf16> to vector<16x32xbf16>
      %130 = vector.shape_cast %129 : vector<16x32xbf16> to vector<16x4x8xbf16>
      %131 = tpu.transpose %130, [1, 0, 2] : vector<16x4x8xbf16> -> vector<4x16x8xbf16>
      %c0_71 = arith.constant 0 : index
      %c0_72 = arith.constant 0 : index
      %c0_73 = arith.constant 0 : index
      %132 = vector.load %arg21[%c0_71, %c0_72, %c0_73] : memref<4x16x8xbf16, #tpu.memory_space<vmem>>, vector<4x16x8xbf16>
      tpu.vector_store %arg21[%c0_71, %c0_72, %c0_73], %131 {strides = array<i32>} : memref<4x16x8xbf16, #tpu.memory_space<vmem>>, vector<4x16x8xbf16>,
    } else {
    }
    %c8_i32 = arith.constant 8 : i32
    %7 = arith.muli %arg1, %c8_i32 : i32
    %8 = tpu.assume_multiple %7, 8 : i32
    %c0_8 = arith.constant 0 : index
    %9 = arith.index_cast %8 : i32 to index
    %c0_9 = arith.constant 0 : index
    %10 = vector.load %arg2[%c0_8, %9, %c0_9] : memref<1x16x32xf32, #tpu.memory_space<vmem>>, vector<1x8x32xf32>
    %11 = vector.shape_cast %10 : vector<1x8x32xf32> to vector<8x32xf32>
    %12 = arith.truncf %11 : vector<8x32xf32> to vector<8x32xbf16>
    %c0_10 = arith.constant 0 : index
    %c0_11 = arith.constant 0 : index
    %13 = vector.load %arg4[%c0_10, %c0_11] : memref<32x32xbf16, #tpu.memory_space<vmem>>, vector<32x32xbf16>
    %cst = arith.constant dense<0.000000e+00> : vector<8x32xf32>
    %14 = tpu.matmul %12, %13, %cst {dimension_numbers = #tpu.dot_dimension_numbers<[1], [0], [0], [1], [0, 0, 1, 1], [], []>} : vector<8x32xbf16>, vector<32x32xbf16>, vector<8x32xf32> -> vector<8x32xf32>
    %c0_12 = arith.constant 0 : index
    %c0_13 = arith.constant 0 : index
    %15 = vector.load %arg5[%c0_12, %c0_13] : memref<1x32xf32, #tpu.memory_space<vmem>>, vector<1x32xf32>
    %16 = vector.broadcast %15 : vector<1x32xf32> to vector<8x32xf32>
    %17 = arith.addf %14, %16 : vector<8x32xf32>
    %18 = arith.truncf %17 : vector<8x32xf32> to vector<8x32xbf16>
    %19 = vector.shape_cast %18 : vector<8x32xbf16> to vector<8x4x8xbf16>
    %20 = tpu.transpose %19, [1, 0, 2] : vector<8x4x8xbf16> -> vector<4x8x8xbf16>
    %c0_14 = arith.constant 0 : index
    %c0_15 = arith.constant 0 : index
    %c0_16 = arith.constant 0 : index
    %21 = vector.load %arg3[%c0_14, %c0_15, %c0_16] : memref<1x8x16xbf16, #tpu.memory_space<vmem>>, vector<1x8x16xbf16>
    %22 = vector.shape_cast %21 : vector<1x8x16xbf16> to vector<8x16xbf16>
    %23 = arith.extf %22 : vector<8x16xbf16> to vector<8x16xf32>
    %c0_17 = arith.constant 0 : index
    %c0_18 = arith.constant 0 : index
    %c0_19 = arith.constant 0 : index
    %24 = vector.load %arg20[%c0_17, %c0_18, %c0_19] : memref<4x16x8xbf16, #tpu.memory_space<vmem>>, vector<4x16x8xbf16>
    "tpu.trace_start"() <{level = 10 : i32, message = "hqd,hkd->hqk"}> : () -> ()
    %cst_20 = arith.constant dense<0.000000e+00> : vector<4x8x16xf32>
    %25 = tpu.matmul %20, %24, %cst_20 {dimension_numbers = #tpu.dot_dimension_numbers<[2], [2], [1], [1], [0, 0, 0, 1, 1, 1], [0], [0]>} : vector<4x8x8xbf16>, vector<4x16x8xbf16>, vector<4x8x16xf32> -> vector<4x8x16xf32>
    "tpu.trace_stop"() : () -> ()
    %26 = vector.shape_cast %23 : vector<8x16xf32> to vector<1x8x16xf32>
    %27 = vector.broadcast %26 : vector<1x8x16xf32> to vector<4x8x16xf32>
    %28 = arith.addf %25, %27 : vector<4x8x16xf32>
    %cst_21 = arith.constant dense<0xFF800000> : vector<4x8xf32>
    %29 = vector.multi_reduction <maximumf>, %28, %cst_21 [2] : vector<4x8x16xf32> to vector<4x8xf32>
    %30 = vector.shape_cast %29 : vector<4x8xf32> to vector<4x8x1xf32>
    %31 = vector.broadcast %30 : vector<4x8x1xf32> to vector<4x8x16xf32>
    %32 = arith.subf %28, %31 : vector<4x8x16xf32>
    %33 = math.exp %32 : vector<4x8x16xf32>
    %cst_22 = arith.constant dense<0.000000e+00> : vector<4x8xf32>
    %34 = vector.multi_reduction <add>, %33, %cst_22 [2] : vector<4x8x16xf32> to vector<4x8xf32>
    %35 = vector.shape_cast %34 : vector<4x8xf32> to vector<4x8x1xf32>
    %36 = tpu.reciprocal %35 {approx = true} : vector<4x8x1xf32> -> vector<4x8x1xf32>
    %37 = vector.broadcast %36 : vector<4x8x1xf32> to vector<4x8x16xf32>
    %38 = arith.mulf %33, %37 : vector<4x8x16xf32>
    %39 = arith.truncf %38 : vector<4x8x16xf32> to vector<4x8x16xbf16>
    %c0_23 = arith.constant 0 : index
    %c0_24 = arith.constant 0 : index
    %c0_25 = arith.constant 0 : index
    %c0_26 = arith.constant 0 : index
    %40 = vector.load %arg19[%c0_23, %c0_24, %c0_25, %c0_26] : memref<1x4x8x16xbf16, #tpu.memory_space<vmem>>, vector<1x4x8x16xbf16>
    %41 = vector.shape_cast %40 : vector<1x4x8x16xbf16> to vector<4x8x16xbf16>
    %42 = vector.shape_cast %39 : vector<4x8x16xbf16> to vector<1x4x8x16xbf16>
    tpu.vector_store %arg19[%c0_23, %c0_24, %c0_25, %c0_26], %42 {strides = array<i32>} : memref<1x4x8x16xbf16, #tpu.memory_space<vmem>>, vector<1x4x8x16xbf16>,
    %c0_27 = arith.constant 0 : index
    %c0_28 = arith.constant 0 : index
    %c0_29 = arith.constant 0 : index
    %43 = vector.load %arg21[%c0_27, %c0_28, %c0_29] : memref<4x16x8xbf16, #tpu.memory_space<vmem>>, vector<4x16x8xbf16>
    "tpu.trace_start"() <{level = 10 : i32, message = "hqk,hkd->hqd"}> : () -> ()
    %cst_30 = arith.constant dense<0.000000e+00> : vector<4x8x8xf32>
    %44 = tpu.matmul %39, %43, %cst_30 {dimension_numbers = #tpu.dot_dimension_numbers<[2], [1], [1], [2], [0, 0, 0, 1, 1, 2], [0], [0]>} : vector<4x8x16xbf16>, vector<4x16x8xbf16>, vector<4x8x8xf32> -> vector<4x8x8xf32>
    "tpu.trace_stop"() : () -> ()
    %45 = arith.truncf %44 : vector<4x8x8xf32> to vector<4x8x8xbf16>
    %46 = tpu.transpose %45, [1, 0, 2] : vector<4x8x8xbf16> -> vector<8x4x8xbf16>
    %47 = vector.shape_cast %46 : vector<8x4x8xbf16> to vector<8x32xbf16>
    %c0_31 = arith.constant 0 : index
    %c0_32 = arith.constant 0 : index
    %48 = vector.load %arg8[%c0_31, %c0_32] : memref<32x32xbf16, #tpu.memory_space<vmem>>, vector<32x32xbf16>
    %cst_33 = arith.constant dense<0.000000e+00> : vector<8x32xf32>
    %49 = tpu.matmul %47, %48, %cst_33 {dimension_numbers = #tpu.dot_dimension_numbers<[1], [0], [0], [1], [0, 0, 1, 1], [], []>} : vector<8x32xbf16>, vector<32x32xbf16>, vector<8x32xf32> -> vector<8x32xf32>
    %c0_34 = arith.constant 0 : index
    %c0_35 = arith.constant 0 : index
    %50 = vector.load %arg9[%c0_34, %c0_35] : memref<1x32xf32, #tpu.memory_space<vmem>>, vector<1x32xf32>
    %51 = vector.broadcast %50 : vector<1x32xf32> to vector<8x32xf32>
    %52 = arith.addf %49, %51 : vector<8x32xf32>
    %53 = arith.addf %11, %52 : vector<8x32xf32>
    %cst_36 = arith.constant dense<0.000000e+00> : vector<8xf32>
    %54 = vector.multi_reduction <add>, %53, %cst_36 [1] : vector<8x32xf32> to vector<8xf32>
    %55 = vector.shape_cast %54 : vector<8xf32> to vector<8x1xf32>
    %cst_37 = arith.constant 3.200000e+01 : f32
    %56 = vector.broadcast %cst_37 : f32 to vector<8x1xf32>
    %57 = arith.divf %55, %56 : vector<8x1xf32>
    %58 = vector.broadcast %57 : vector<8x1xf32> to vector<8x32xf32>
    %59 = arith.subf %53, %58 : vector<8x32xf32>
    %60 = arith.mulf %59, %59 : vector<8x32xf32>
    %cst_38 = arith.constant dense<0.000000e+00> : vector<8xf32>
    %61 = vector.multi_reduction <add>, %60, %cst_38 [1] : vector<8x32xf32> to vector<8xf32>
    %62 = vector.shape_cast %61 : vector<8xf32> to vector<8x1xf32>
    %cst_39 = arith.constant 3.200000e+01 : f32
    %63 = vector.broadcast %cst_39 : f32 to vector<8x1xf32>
    %64 = arith.divf %62, %63 : vector<8x1xf32>
    %65 = vector.broadcast %57 : vector<8x1xf32> to vector<8x32xf32>
    %66 = arith.subf %53, %65 : vector<8x32xf32>
    %cst_40 = arith.constant 9.99999974E-6 : f32
    %67 = vector.broadcast %cst_40 : f32 to vector<8x1xf32>
    %68 = arith.addf %64, %67 : vector<8x1xf32>
    %69 = math.rsqrt %68 : vector<8x1xf32>
    %70 = vector.broadcast %69 : vector<8x1xf32> to vector<8x32xf32>
    %71 = arith.mulf %66, %70 : vector<8x32xf32>
    %72 = vector.broadcast %0 : vector<1x32xf32> to vector<8x32xf32>
    %73 = arith.mulf %71, %72 : vector<8x32xf32>
    %74 = vector.broadcast %1 : vector<1x32xf32> to vector<8x32xf32>
    %75 = arith.addf %73, %74 : vector<8x32xf32>
    %76 = arith.truncf %75 : vector<8x32xf32> to vector<8x32xbf16>
    %c0_41 = arith.constant 0 : index
    %c0_42 = arith.constant 0 : index
    %77 = vector.load %arg14[%c0_41, %c0_42] : memref<32x64xbf16, #tpu.memory_space<vmem>>, vector<32x64xbf16>
    %cst_43 = arith.constant dense<0.000000e+00> : vector<8x64xf32>
    %78 = tpu.matmul %76, %77, %cst_43 {dimension_numbers = #tpu.dot_dimension_numbers<[1], [0], [0], [1], [0, 0, 1, 1], [], []>} : vector<8x32xbf16>, vector<32x64xbf16>, vector<8x64xf32> -> vector<8x64xf32>
    %c0_44 = arith.constant 0 : index
    %c0_45 = arith.constant 0 : index
    %79 = vector.load %arg15[%c0_44, %c0_45] : memref<1x64xf32, #tpu.memory_space<vmem>>, vector<1x64xf32>
    %80 = vector.broadcast %79 : vector<1x64xf32> to vector<8x64xf32>
    %81 = arith.addf %78, %80 : vector<8x64xf32>
    %cst_46 = arith.constant 0.000000e+00 : f32
    %82 = vector.broadcast %cst_46 : f32 to vector<8x64xf32>
    %83 = arith.maximumf %81, %82 : vector<8x64xf32>
    %84 = arith.truncf %83 : vector<8x64xf32> to vector<8x64xbf16>
    %c0_47 = arith.constant 0 : index
    %c0_48 = arith.constant 0 : index
    %85 = vector.load %arg16[%c0_47, %c0_48] : memref<64x32xbf16, #tpu.memory_space<vmem>>, vector<64x32xbf16>
    %cst_49 = arith.constant dense<0.000000e+00> : vector<8x32xf32>
    %86 = tpu.matmul %84, %85, %cst_49 {dimension_numbers = #tpu.dot_dimension_numbers<[1], [0], [0], [1], [0, 0, 1, 1], [], []>} : vector<8x64xbf16>, vector<64x32xbf16>, vector<8x32xf32> -> vector<8x32xf32>
    %c0_50 = arith.constant 0 : index
    %c0_51 = arith.constant 0 : index
    %87 = vector.load %arg17[%c0_50, %c0_51] : memref<1x32xf32, #tpu.memory_space<vmem>>, vector<1x32xf32>
    %88 = vector.broadcast %87 : vector<1x32xf32> to vector<8x32xf32>
    %89 = arith.addf %86, %88 : vector<8x32xf32>
    %90 = arith.addf %75, %89 : vector<8x32xf32>
    %cst_52 = arith.constant dense<0.000000e+00> : vector<8xf32>
    %91 = vector.multi_reduction <add>, %90, %cst_52 [1] : vector<8x32xf32> to vector<8xf32>
    %92 = vector.shape_cast %91 : vector<8xf32> to vector<8x1xf32>
    %cst_53 = arith.constant 3.200000e+01 : f32
    %93 = vector.broadcast %cst_53 : f32 to vector<8x1xf32>
    %94 = arith.divf %92, %93 : vector<8x1xf32>
    %95 = vector.broadcast %94 : vector<8x1xf32> to vector<8x32xf32>
    %96 = arith.subf %90, %95 : vector<8x32xf32>
    %97 = arith.mulf %96, %96 : vector<8x32xf32>
    %cst_54 = arith.constant dense<0.000000e+00> : vector<8xf32>
    %98 = vector.multi_reduction <add>, %97, %cst_54 [1] : vector<8x32xf32> to vector<8xf32>
    %99 = vector.shape_cast %98 : vector<8xf32> to vector<8x1xf32>
    %cst_55 = arith.constant 3.200000e+01 : f32
    %100 = vector.broadcast %cst_55 : f32 to vector<8x1xf32>
    %101 = arith.divf %99, %100 : vector<8x1xf32>
    %102 = vector.broadcast %94 : vector<8x1xf32> to vector<8x32xf32>
    %103 = arith.subf %90, %102 : vector<8x32xf32>
    %cst_56 = arith.constant 9.99999974E-6 : f32
    %104 = vector.broadcast %cst_56 : f32 to vector<8x1xf32>
    %105 = arith.addf %101, %104 : vector<8x1xf32>
    %106 = math.rsqrt %105 : vector<8x1xf32>
    %107 = vector.broadcast %106 : vector<8x1xf32> to vector<8x32xf32>
    %108 = arith.mulf %103, %107 : vector<8x32xf32>
    %109 = vector.broadcast %2 : vector<1x32xf32> to vector<8x32xf32>
    %110 = arith.mulf %108, %109 : vector<8x32xf32>
    %111 = vector.broadcast %3 : vector<1x32xf32> to vector<8x32xf32>
    %112 = arith.addf %110, %111 : vector<8x32xf32>
    %c0_57 = arith.constant 0 : index
    %c0_58 = arith.constant 0 : index
    %c0_59 = arith.constant 0 : index
    %113 = vector.load %arg18[%c0_57, %c0_58, %c0_59] : memref<1x8x32xf32, #tpu.memory_space<vmem>>, vector<1x8x32xf32>
    %114 = vector.shape_cast %113 : vector<1x8x32xf32> to vector<8x32xf32>
    %115 = vector.shape_cast %112 : vector<8x32xf32> to vector<1x8x32xf32>
    tpu.vector_store %arg18[%c0_57, %c0_58, %c0_59], %115 {strides = array<i32>} : memref<1x8x32xf32, #tpu.memory_space<vmem>>, vector<1x8x32xf32>,
    return
  }
  func.func @transform_0(%arg0: i32, %arg1: i32) -> (i32, i32, i32) {
    %c0_i32 = arith.constant 0 : i32
    %c0_i32_0 = arith.constant 0 : i32
    %c0_i32_1 = arith.constant 0 : i32
    return %arg0, %c0_i32, %c0_i32_0 : i32, i32, i32
  }
  func.func @transform_1(%arg0: i32, %arg1: i32) -> (i32, i32, i32) {
    %c0_i32 = arith.constant 0 : i32
    %c0_i32_0 = arith.constant 0 : i32
    return %arg0, %arg1, %c0_i32 : i32, i32, i32
  }
  func.func @transform_2(%arg0: i32, %arg1: i32) -> (i32, i32) {
    %c0_i32 = arith.constant 0 : i32
    %c0_i32_0 = arith.constant 0 : i32
    %c0_i32_1 = arith.constant 0 : i32
    return %c0_i32, %c0_i32_0 : i32, i32
  }
  func.func @transform_3(%arg0: i32, %arg1: i32) -> (i32, i32) {
    %c0_i32 = arith.constant 0 : i32
    %c0_i32_0 = arith.constant 0 : i32
    %c0_i32_1 = arith.constant 0 : i32
    return %c0_i32, %c0_i32_0 : i32, i32
  }
  func.func @transform_4(%arg0: i32, %arg1: i32) -> (i32, i32) {
    %c0_i32 = arith.constant 0 : i32
    %c0_i32_0 = arith.constant 0 : i32
    %c0_i32_1 = arith.constant 0 : i32
    return %c0_i32, %c0_i32_0 : i32, i32
  }
  func.func @transform_5(%arg0: i32, %arg1: i32) -> (i32, i32) {
    %c0_i32 = arith.constant 0 : i32
    %c0_i32_0 = arith.constant 0 : i32
    %c0_i32_1 = arith.constant 0 : i32
    return %c0_i32, %c0_i32_0 : i32, i32
  }
  func.func @transform_6(%arg0: i32, %arg1: i32) -> (i32, i32) {
    %c0_i32 = arith.constant 0 : i32
    %c0_i32_0 = arith.constant 0 : i32
    %c0_i32_1 = arith.constant 0 : i32
    return %c0_i32, %c0_i32_0 : i32, i32
  }
  func.func @transform_7(%arg0: i32, %arg1: i32) -> (i32, i32) {
    %c0_i32 = arith.constant 0 : i32
    %c0_i32_0 = arith.constant 0 : i32
    %c0_i32_1 = arith.constant 0 : i32
    return %c0_i32, %c0_i32_0 : i32, i32
  }
  func.func @transform_8(%arg0: i32, %arg1: i32) -> (i32, i32) {
    %c0_i32 = arith.constant 0 : i32
    %c0_i32_0 = arith.constant 0 : i32
    %c0_i32_1 = arith.constant 0 : i32
    return %c0_i32, %c0_i32_0 : i32, i32
  }
  func.func @transform_9(%arg0: i32, %arg1: i32) -> (i32, i32) {
    %c0_i32 = arith.constant 0 : i32
    %c0_i32_0 = arith.constant 0 : i32
    %c0_i32_1 = arith.constant 0 : i32
    return %c0_i32, %c0_i32_0 : i32, i32
  }
  func.func @transform_10(%arg0: i32, %arg1: i32) -> (i32, i32) {
    %c0_i32 = arith.constant 0 : i32
    %c0_i32_0 = arith.constant 0 : i32
    %c0_i32_1 = arith.constant 0 : i32
    return %c0_i32, %c0_i32_0 : i32, i32
  }
  func.func @transform_11(%arg0: i32, %arg1: i32) -> (i32, i32) {
    %c0_i32 = arith.constant 0 : i32
    %c0_i32_0 = arith.constant 0 : i32
    %c0_i32_1 = arith.constant 0 : i32
    return %c0_i32, %c0_i32_0 : i32, i32
  }
  func.func @transform_12(%arg0: i32, %arg1: i32) -> (i32, i32) {
    %c0_i32 = arith.constant 0 : i32
    %c0_i32_0 = arith.constant 0 : i32
    %c0_i32_1 = arith.constant 0 : i32
    return %c0_i32, %c0_i32_0 : i32, i32
  }
  func.func @transform_13(%arg0: i32, %arg1: i32) -> (i32, i32) {
    %c0_i32 = arith.constant 0 : i32
    %c0_i32_0 = arith.constant 0 : i32
    %c0_i32_1 = arith.constant 0 : i32
    return %c0_i32, %c0_i32_0 : i32, i32
  }
  func.func @transform_14(%arg0: i32, %arg1: i32) -> (i32, i32) {
    %c0_i32 = arith.constant 0 : i32
    %c0_i32_0 = arith.constant 0 : i32
    %c0_i32_1 = arith.constant 0 : i32
    return %c0_i32, %c0_i32_0 : i32, i32
  }
  func.func @transform_15(%arg0: i32, %arg1: i32) -> (i32, i32) {
    %c0_i32 = arith.constant 0 : i32
    %c0_i32_0 = arith.constant 0 : i32
    %c0_i32_1 = arith.constant 0 : i32
    return %c0_i32, %c0_i32_0 : i32, i32
  }
  func.func @transform_16(%arg0: i32, %arg1: i32) -> (i32, i32, i32) {
    %c0_i32 = arith.constant 0 : i32
    %c0_i32_0 = arith.constant 0 : i32
    return %arg0, %arg1, %c0_i32 : i32, i32, i32
  }
  func.func @transform_17(%arg0: i32, %arg1: i32) -> (i32, i32, i32, i32) {
    %c0_i32 = arith.constant 0 : i32
    %c0_i32_0 = arith.constant 0 : i32
    %c0_i32_1 = arith.constant 0 : i32
    return %arg0, %c0_i32, %arg1, %c0_i32_0 : i32, i32, i32, i32
  }
}

module attributes {stable_mosaic.version = 11 : i64} {
  func.func @kernel(%arg0: i32, %arg1: i32, %arg2: memref<1x16x32xf32, #tpu.memory_space<vmem>>, %arg3: memref<1x8x16xbf16, #tpu.memory_space<vmem>>, %arg4: memref<32x32xbf16, #tpu.memory_space<vmem>>, %arg5: memref<1x32xf32, #tpu.memory_space<vmem>>, %arg6: memref<32x64xbf16, #tpu.memory_space<vmem>>, %arg7: memref<1x64xf32, #tpu.memory_space<vmem>>, %arg8: memref<32x32xbf16, #tpu.memory_space<vmem>>, %arg9: memref<1x32xf32, #tpu.memory_space<vmem>>, %arg10: memref<1x32xf32, #tpu.memory_space<vmem>>, %arg11: memref<1x32xf32, #tpu.memory_space<vmem>>, %arg12: memref<1x32xf32, #tpu.memory_space<vmem>>, %arg13: memref<1x32xf32, #tpu.memory_space<vmem>>, %arg14: memref<32x64xbf16, #tpu.memory_space<vmem>>, %arg15: memref<1x64xf32, #tpu.memory_space<vmem>>, %arg16: memref<64x32xbf16, #tpu.memory_space<vmem>>, %arg17: memref<1x32xf32, #tpu.memory_space<vmem>>, %arg18: memref<1x8x32xf32, #tpu.memory_space<vmem>>, %arg19: memref<1x4x8x16xbf16, #tpu.memory_space<vmem>>, %arg20: memref<4x16x8xbf16, #tpu.memory_space<vmem>>, %arg21: memref<4x16x8xbf16, #tpu.memory_space<vmem>>) attributes {dimension_semantics = [#tpu.dimension_semantics<parallel>, #tpu.dimension_semantics<arbitrary>], iteration_bounds = array<i64: 2, 2>, scalar_prefetch = 0 : i64, scratch_operands = 2 : i64, tpu.core_type = #tpu.core_type<tc>, window_params = [{transform_indices = @transform_0, window_bounds = array<i64: 1, 16, 32>}, {transform_indices = @transform_1, window_bounds = array<i64: 1, 8, 16>}, {pipeline_mode = #tpu.pipeline_mode<synchronous>, transform_indices = @transform_2, window_bounds = array<i64: 32, 32>}, {pipeline_mode = #tpu.pipeline_mode<synchronous>, transform_indices = @transform_3, window_bounds = array<i64: 1, 32>}, {pipeline_mode = #tpu.pipeline_mode<synchronous>, transform_indices = @transform_4, window_bounds = array<i64: 32, 64>}, {pipeline_mode = #tpu.pipeline_mode<synchronous>, transform_indices = @transform_5, window_bounds = array<i64: 1, 64>}, {pipeline_mode = #tpu.pipeline_mode<synchronous>, transform_indices = @transform_6, window_bounds = array<i64: 32, 32>}, {pipeline_mode = #tpu.pipeline_mode<synchronous>, transform_indices = @transform_7, window_bounds = array<i64: 1, 32>}, {pipeline_mode = #tpu.pipeline_mode<synchronous>, transform_indices = @transform_8, window_bounds = array<i64: 1, 32>}, {pipeline_mode = #tpu.pipeline_mode<synchronous>, transform_indices = @transform_9, window_bounds = array<i64: 1, 32>}, {pipeline_mode = #tpu.pipeline_mode<synchronous>, transform_indices = @transform_10, window_bounds = array<i64: 1, 32>}, {pipeline_mode = #tpu.pipeline_mode<synchronous>, transform_indices = @transform_11, window_bounds = array<i64: 1, 32>}, {pipeline_mode = #tpu.pipeline_mode<synchronous>, transform_indices = @transform_12, window_bounds = array<i64: 32, 64>}, {pipeline_mode = #tpu.pipeline_mode<synchronous>, transform_indices = @transform_13, window_bounds = array<i64: 1, 64>}, {pipeline_mode = #tpu.pipeline_mode<synchronous>, transform_indices = @transform_14, window_bounds = array<i64: 64, 32>}, {pipeline_mode = #tpu.pipeline_mode<synchronous>, transform_indices = @transform_15, window_bounds = array<i64: 1, 32>}, {transform_indices = @transform_16, window_bounds = array<i64: 1, 8, 32>}, {transform_indices = @transform_17, window_bounds = array<i64: 1, 4, 8, 16>}]} {
    %c0 = arith.constant 0 : index
    %c0_0 = arith.constant 0 : index
    %0 = vector.load %arg10[%c0, %c0_0] : memref<1x32xf32, #tpu.memory_space<vmem>>, vector<1x32xf32>
    %c0_1 = arith.constant 0 : index
    %c0_2 = arith.constant 0 : index
    %1 = vector.load %arg11[%c0_1, %c0_2] : memref<1x32xf32, #tpu.memory_space<vmem>>, vector<1x32xf32>
    %c0_3 = arith.constant 0 : index
    %c0_4 = arith.constant 0 : index
    %2 = vector.load %arg12[%c0_3, %c0_4] : memref<1x32xf32, #tpu.memory_space<vmem>>, vector<1x32xf32>
    %c0_5 = arith.constant 0 : index
    %c0_6 = arith.constant 0 : index
    %3 = vector.load %arg13[%c0_5, %c0_6] : memref<1x32xf32, #tpu.memory_space<vmem>>, vector<1x32xf32>
    %c0_i32 = arith.constant 0 : i32
    %4 = arith.cmpi eq, %arg1, %c0_i32 : i32
    %5 = arith.extui %4 : i1 to i32
    %c0_i32_7 = arith.constant 0 : i32
    %6 = arith.cmpi ne, %5, %c0_i32_7 : i32
    scf.if %6 {
      %c0_60 = arith.constant 0 : index
      %c0_61 = arith.constant 0 : index
      %c0_62 = arith.constant 0 : index
      %116 = vector.load %arg2[%c0_60, %c0_61, %c0_62] : memref<1x16x32xf32, #tpu.memory_space<vmem>>, vector<1x16x32xf32>
      %117 = vector.shape_cast %116 : vector<1x16x32xf32> to vector<16x32xf32>
      %118 = arith.truncf %117 : vector<16x32xf32> to vector<16x32xbf16>
      %c0_63 = arith.constant 0 : index
      %c0_64 = arith.constant 0 : index
      %119 = vector.load %arg6[%c0_63, %c0_64] : memref<32x64xbf16, #tpu.memory_space<vmem>>, vector<32x64xbf16>
      %cst_65 = arith.constant dense<0.000000e+00> : vector<16x64xf32>
      %120 = tpu.matmul %118, %119, %cst_65 {dimension_numbers = #tpu.dot_dimension_numbers<[1], [0], [0], [1], [0, 0, 1, 1], [], []>} : vector<16x32xbf16>, vector<32x64xbf16>, vector<16x64xf32> -> vector<16x64xf32>
      %c0_66 = arith.constant 0 : index
      %c0_67 = arith.constant 0 : index
      %121 = vector.load %arg7[%c0_66, %c0_67] : memref<1x64xf32, #tpu.memory_space<vmem>>, vector<1x64xf32>
      %122 = vector.broadcast %121 : vector<1x64xf32> to vector<16x64xf32>
      %123 = arith.addf %120, %122 : vector<16x64xf32>
      %124 = arith.truncf %123 : vector<16x64xf32> to vector<16x64xbf16>
      %125 = vector.extract_strided_slice %124 {offsets = [0, 0], sizes = [16, 32], strides = [1, 1]} : vector<16x64xbf16> to vector<16x32xbf16>
      %126 = vector.shape_cast %125 : vector<16x32xbf16> to vector<16x4x8xbf16>
      %127 = tpu.transpose %126, [1, 0, 2] : vector<16x4x8xbf16> -> vector<4x16x8xbf16>
      %c0_68 = arith.constant 0 : index
      %c0_69 = arith.constant 0 : index
      %c0_70 = arith.constant 0 : index
      %128 = vector.load %arg20[%c0_68, %c0_69, %c0_70] : memref<4x16x8xbf16, #tpu.memory_space<vmem>>, vector<4x16x8xbf16>
      tpu.vector_store %arg20[%c0_68, %c0_69, %c0_70], %127 {strides = array<i32>} : memref<4x16x8xbf16, #tpu.memory_space<vmem>>, vector<4x16x8xbf16>,
      %129 = vector.extract_strided_slice %124 {offsets = [0, 32], sizes = [16, 32], strides = [1, 1]} : vector<16x64xbf16> to vector<16x32xbf16>
      %130 = vector.shape_cast %129 : vector<16x32xbf16> to vector<16x4x8xbf16>
      %131 = tpu.transpose %130, [1, 0, 2] : vector<16x4x8xbf16> -> vector<4x16x8xbf16>
      %c0_71 = arith.constant 0 : index
      %c0_72 = arith.constant 0 : index
      %c0_73 = arith.constant 0 : index
      %132 = vector.load %arg21[%c0_71, %c0_72, %c0_73] : memref<4x16x8xbf16, #tpu.memory_space<vmem>>, vector<4x16x8xbf16>
      tpu.vector_store %arg21[%c0_71, %c0_72, %c0_73], %131 {strides = array<i32>} : memref<4x16x8xbf16, #tpu.memory_space<vmem>>, vector<4x16x8xbf16>,
    } else {
    }
    %c8_i32 = arith.constant 8 : i32
    %7 = arith.muli %arg1, %c8_i32 : i32
    %8 = tpu.assume_multiple %7, 8 : i32
    %c0_8 = arith.constant 0 : index
    %9 = arith.index_cast %8 : i32 to index
    %c0_9 = arith.constant 0 : index
    %10 = vector.load %arg2[%c0_8, %9, %c0_9] : memref<1x16x32xf32, #tpu.memory_space<vmem>>, vector<1x8x32xf32>
    %11 = vector.shape_cast %10 : vector<1x8x32xf32> to vector<8x32xf32>
    %12 = arith.truncf %11 : vector<8x32xf32> to vector<8x32xbf16>
    %c0_10 = arith.constant 0 : index
    %c0_11 = arith.constant 0 : index
    %13 = vector.load %arg4[%c0_10, %c0_11] : memref<32x32xbf16, #tpu.memory_space<vmem>>, vector<32x32xbf16>
    %cst = arith.constant dense<0.000000e+00> : vector<8x32xf32>
    %14 = tpu.matmul %12, %13, %cst {dimension_numbers = #tpu.dot_dimension_numbers<[1], [0], [0], [1], [0, 0, 1, 1], [], []>} : vector<8x32xbf16>, vector<32x32xbf16>, vector<8x32xf32> -> vector<8x32xf32>
    %c0_12 = arith.constant 0 : index
    %c0_13 = arith.constant 0 : index
    %15 = vector.load %arg5[%c0_12, %c0_13] : memref<1x32xf32, #tpu.memory_space<vmem>>, vector<1x32xf32>
    %16 = vector.broadcast %15 : vector<1x32xf32> to vector<8x32xf32>
    %17 = arith.addf %14, %16 : vector<8x32xf32>
    %18 = arith.truncf %17 : vector<8x32xf32> to vector<8x32xbf16>
    %19 = vector.shape_cast %18 : vector<8x32xbf16> to vector<8x4x8xbf16>
    %20 = tpu.transpose %19, [1, 0, 2] : vector<8x4x8xbf16> -> vector<4x8x8xbf16>
    %c0_14 = arith.constant 0 : index
    %c0_15 = arith.constant 0 : index
    %c0_16 = arith.constant 0 : index
    %21 = vector.load %arg3[%c0_14, %c0_15, %c0_16] : memref<1x8x16xbf16, #tpu.memory_space<vmem>>, vector<1x8x16xbf16>
    %22 = vector.shape_cast %21 : vector<1x8x16xbf16> to vector<8x16xbf16>
    %23 = arith.extf %22 : vector<8x16xbf16> to vector<8x16xf32>
    %c0_17 = arith.constant 0 : index
    %c0_18 = arith.constant 0 : index
    %c0_19 = arith.constant 0 : index
    %24 = vector.load %arg20[%c0_17, %c0_18, %c0_19] : memref<4x16x8xbf16, #tpu.memory_space<vmem>>, vector<4x16x8xbf16>
    "tpu.trace_start"() <{level = 10 : i32, message = "hqd,hkd->hqk"}> : () -> ()
    %cst_20 = arith.constant dense<0.000000e+00> : vector<4x8x16xf32>
    %25 = tpu.matmul %20, %24, %cst_20 {dimension_numbers = #tpu.dot_dimension_numbers<[2], [2], [1], [1], [0, 0, 0, 1, 1, 1], [0], [0]>} : vector<4x8x8xbf16>, vector<4x16x8xbf16>, vector<4x8x16xf32> -> vector<4x8x16xf32>
    "tpu.trace_stop"() : () -> ()
    %26 = vector.shape_cast %23 : vector<8x16xf32> to vector<1x8x16xf32>
    %27 = vector.broadcast %26 : vector<1x8x16xf32> to vector<4x8x16xf32>
    %28 = arith.addf %25, %27 : vector<4x8x16xf32>
    %cst_21 = arith.constant dense<0xFF800000> : vector<4x8xf32>
    %29 = vector.multi_reduction <maximumf>, %28, %cst_21 [2] : vector<4x8x16xf32> to vector<4x8xf32>
    %30 = vector.shape_cast %29 : vector<4x8xf32> to vector<4x8x1xf32>
    %31 = vector.broadcast %30 : vector<4x8x1xf32> to vector<4x8x16xf32>
    %32 = arith.subf %28, %31 : vector<4x8x16xf32>
    %33 = math.exp %32 : vector<4x8x16xf32>
    %cst_22 = arith.constant dense<0.000000e+00> : vector<4x8xf32>
    %34 = vector.multi_reduction <add>, %33, %cst_22 [2] : vector<4x8x16xf32> to vector<4x8xf32>
    %35 = vector.shape_cast %34 : vector<4x8xf32> to vector<4x8x1xf32>
    %36 = tpu.reciprocal %35 {approx = true} : vector<4x8x1xf32> -> vector<4x8x1xf32>
    %37 = vector.broadcast %36 : vector<4x8x1xf32> to vector<4x8x16xf32>
    %38 = arith.mulf %33, %37 : vector<4x8x16xf32>
    %39 = arith.truncf %38 : vector<4x8x16xf32> to vector<4x8x16xbf16>
    %c0_23 = arith.constant 0 : index
    %c0_24 = arith.constant 0 : index
    %c0_25 = arith.constant 0 : index
    %c0_26 = arith.constant 0 : index
    %40 = vector.load %arg19[%c0_23, %c0_24, %c0_25, %c0_26] : memref<1x4x8x16xbf16, #tpu.memory_space<vmem>>, vector<1x4x8x16xbf16>
    %41 = vector.shape_cast %40 : vector<1x4x8x16xbf16> to vector<4x8x16xbf16>
    %42 = vector.shape_cast %39 : vector<4x8x16xbf16> to vector<1x4x8x16xbf16>
    tpu.vector_store %arg19[%c0_23, %c0_24, %c0_25, %c0_26], %42 {strides = array<i32>} : memref<1x4x8x16xbf16, #tpu.memory_space<vmem>>, vector<1x4x8x16xbf16>,
    %c0_27 = arith.constant 0 : index
    %c0_28 = arith.constant 0 : index
    %c0_29 = arith.constant 0 : index
    %43 = vector.load %arg21[%c0_27, %c0_28, %c0_29] : memref<4x16x8xbf16, #tpu.memory_space<vmem>>, vector<4x16x8xbf16>
    "tpu.trace_start"() <{level = 10 : i32, message = "hqk,hkd->hqd"}> : () -> ()
    %cst_30 = arith.constant dense<0.000000e+00> : vector<4x8x8xf32>
    %44 = tpu.matmul %39, %43, %cst_30 {dimension_numbers = #tpu.dot_dimension_numbers<[2], [1], [1], [2], [0, 0, 0, 1, 1, 2], [0], [0]>} : vector<4x8x16xbf16>, vector<4x16x8xbf16>, vector<4x8x8xf32> -> vector<4x8x8xf32>
    "tpu.trace_stop"() : () -> ()
    %45 = arith.truncf %44 : vector<4x8x8xf32> to vector<4x8x8xbf16>
    %46 = tpu.transpose %45, [1, 0, 2] : vector<4x8x8xbf16> -> vector<8x4x8xbf16>
    %47 = vector.shape_cast %46 : vector<8x4x8xbf16> to vector<8x32xbf16>
    %c0_31 = arith.constant 0 : index
    %c0_32 = arith.constant 0 : index
    %48 = vector.load %arg8[%c0_31, %c0_32] : memref<32x32xbf16, #tpu.memory_space<vmem>>, vector<32x32xbf16>
    %cst_33 = arith.constant dense<0.000000e+00> : vector<8x32xf32>
    %49 = tpu.matmul %47, %48, %cst_33 {dimension_numbers = #tpu.dot_dimension_numbers<[1], [0], [0], [1], [0, 0, 1, 1], [], []>} : vector<8x32xbf16>, vector<32x32xbf16>, vector<8x32xf32> -> vector<8x32xf32>
    %c0_34 = arith.constant 0 : index
    %c0_35 = arith.constant 0 : index
    %50 = vector.load %arg9[%c0_34, %c0_35] : memref<1x32xf32, #tpu.memory_space<vmem>>, vector<1x32xf32>
    %51 = vector.broadcast %50 : vector<1x32xf32> to vector<8x32xf32>
    %52 = arith.addf %49, %51 : vector<8x32xf32>
    %53 = arith.addf %11, %52 : vector<8x32xf32>
    %cst_36 = arith.constant dense<0.000000e+00> : vector<8xf32>
    %54 = vector.multi_reduction <add>, %53, %cst_36 [1] : vector<8x32xf32> to vector<8xf32>
    %55 = vector.shape_cast %54 : vector<8xf32> to vector<8x1xf32>
    %cst_37 = arith.constant 3.200000e+01 : f32
    %56 = vector.broadcast %cst_37 : f32 to vector<8x1xf32>
    %57 = arith.divf %55, %56 : vector<8x1xf32>
    %58 = vector.broadcast %57 : vector<8x1xf32> to vector<8x32xf32>
    %59 = arith.subf %53, %58 : vector<8x32xf32>
    %60 = arith.mulf %59, %59 : vector<8x32xf32>
    %cst_38 = arith.constant dense<0.000000e+00> : vector<8xf32>
    %61 = vector.multi_reduction <add>, %60, %cst_38 [1] : vector<8x32xf32> to vector<8xf32>
    %62 = vector.shape_cast %61 : vector<8xf32> to vector<8x1xf32>
    %cst_39 = arith.constant 3.200000e+01 : f32
    %63 = vector.broadcast %cst_39 : f32 to vector<8x1xf32>
    %64 = arith.divf %62, %63 : vector<8x1xf32>
    %65 = vector.broadcast %57 : vector<8x1xf32> to vector<8x32xf32>
    %66 = arith.subf %53, %65 : vector<8x32xf32>
    %cst_40 = arith.constant 9.99999974E-6 : f32
    %67 = vector.broadcast %cst_40 : f32 to vector<8x1xf32>
    %68 = arith.addf %64, %67 : vector<8x1xf32>
    %69 = math.rsqrt %68 : vector<8x1xf32>
    %70 = vector.broadcast %69 : vector<8x1xf32> to vector<8x32xf32>
    %71 = arith.mulf %66, %70 : vector<8x32xf32>
    %72 = vector.broadcast %0 : vector<1x32xf32> to vector<8x32xf32>
    %73 = arith.mulf %71, %72 : vector<8x32xf32>
    %74 = vector.broadcast %1 : vector<1x32xf32> to vector<8x32xf32>
    %75 = arith.addf %73, %74 : vector<8x32xf32>
    %76 = arith.truncf %75 : vector<8x32xf32> to vector<8x32xbf16>
    %c0_41 = arith.constant 0 : index
    %c0_42 = arith.constant 0 : index
    %77 = vector.load %arg14[%c0_41, %c0_42] : memref<32x64xbf16, #tpu.memory_space<vmem>>, vector<32x64xbf16>
    %cst_43 = arith.constant dense<0.000000e+00> : vector<8x64xf32>
    %78 = tpu.matmul %76, %77, %cst_43 {dimension_numbers = #tpu.dot_dimension_numbers<[1], [0], [0], [1], [0, 0, 1, 1], [], []>} : vector<8x32xbf16>, vector<32x64xbf16>, vector<8x64xf32> -> vector<8x64xf32>
    %c0_44 = arith.constant 0 : index
    %c0_45 = arith.constant 0 : index
    %79 = vector.load %arg15[%c0_44, %c0_45] : memref<1x64xf32, #tpu.memory_space<vmem>>, vector<1x64xf32>
    %80 = vector.broadcast %79 : vector<1x64xf32> to vector<8x64xf32>
    %81 = arith.addf %78, %80 : vector<8x64xf32>
    %cst_46 = arith.constant 0.000000e+00 : f32
    %82 = vector.broadcast %cst_46 : f32 to vector<8x64xf32>
    %83 = arith.maximumf %81, %82 : vector<8x64xf32>
    %84 = arith.truncf %83 : vector<8x64xf32> to vector<8x64xbf16>
    %c0_47 = arith.constant 0 : index
    %c0_48 = arith.constant 0 : index
    %85 = vector.load %arg16[%c0_47, %c0_48] : memref<64x32xbf16, #tpu.memory_space<vmem>>, vector<64x32xbf16>
    %cst_49 = arith.constant dense<0.000000e+00> : vector<8x32xf32>
    %86 = tpu.matmul %84, %85, %cst_49 {dimension_numbers = #tpu.dot_dimension_numbers<[1], [0], [0], [1], [0, 0, 1, 1], [], []>} : vector<8x64xbf16>, vector<64x32xbf16>, vector<8x32xf32> -> vector<8x32xf32>
    %c0_50 = arith.constant 0 : index
    %c0_51 = arith.constant 0 : index
    %87 = vector.load %arg17[%c0_50, %c0_51] : memref<1x32xf32, #tpu.memory_space<vmem>>, vector<1x32xf32>
    %88 = vector.broadcast %87 : vector<1x32xf32> to vector<8x32xf32>
    %89 = arith.addf %86, %88 : vector<8x32xf32>
    %90 = arith.addf %75, %89 : vector<8x32xf32>
    %cst_52 = arith.constant dense<0.000000e+00> : vector<8xf32>
    %91 = vector.multi_reduction <add>, %90, %cst_52 [1] : vector<8x32xf32> to vector<8xf32>
    %92 = vector.shape_cast %91 : vector<8xf32> to vector<8x1xf32>
    %cst_53 = arith.constant 3.200000e+01 : f32
    %93 = vector.broadcast %cst_53 : f32 to vector<8x1xf32>
    %94 = arith.divf %92, %93 : vector<8x1xf32>
    %95 = vector.broadcast %94 : vector<8x1xf32> to vector<8x32xf32>
    %96 = arith.subf %90, %95 : vector<8x32xf32>
    %97 = arith.mulf %96, %96 : vector<8x32xf32>
    %cst_54 = arith.constant dense<0.000000e+00> : vector<8xf32>
    %98 = vector.multi_reduction <add>, %97, %cst_54 [1] : vector<8x32xf32> to vector<8xf32>
    %99 = vector.shape_cast %98 : vector<8xf32> to vector<8x1xf32>
    %cst_55 = arith.constant 3.200000e+01 : f32
    %100 = vector.broadcast %cst_55 : f32 to vector<8x1xf32>
    %101 = arith.divf %99, %100 : vector<8x1xf32>
    %102 = vector.broadcast %94 : vector<8x1xf32> to vector<8x32xf32>
    %103 = arith.subf %90, %102 : vector<8x32xf32>
    %cst_56 = arith.constant 9.99999974E-6 : f32
    %104 = vector.broadcast %cst_56 : f32 to vector<8x1xf32>
    %105 = arith.addf %101, %104 : vector<8x1xf32>
    %106 = math.rsqrt %105 : vector<8x1xf32>
    %107 = vector.broadcast %106 : vector<8x1xf32> to vector<8x32xf32>
    %108 = arith.mulf %103, %107 : vector<8x32xf32>
    %109 = vector.broadcast %2 : vector<1x32xf32> to vector<8x32xf32>
    %110 = arith.mulf %108, %109 : vector<8x32xf32>
    %111 = vector.broadcast %3 : vector<1x32xf32> to vector<8x32xf32>
    %112 = arith.addf %110, %111 : vector<8x32xf32>
    %c0_57 = arith.constant 0 : index
    %c0_58 = arith.constant 0 : index
    %c0_59 = arith.constant 0 : index
    %113 = vector.load %arg18[%c0_57, %c0_58, %c0_59] : memref<1x8x32xf32, #tpu.memory_space<vmem>>, vector<1x8x32xf32>
    %114 = vector.shape_cast %113 : vector<1x8x32xf32> to vector<8x32xf32>
    %115 = vector.shape_cast %112 : vector<8x32xf32> to vector<1x8x32xf32>
    tpu.vector_store %arg18[%c0_57, %c0_58, %c0_59], %115 {strides = array<i32>} : memref<1x8x32xf32, #tpu.memory_space<vmem>>, vector<1x8x32xf32>,
    return
  }
  func.func @transform_0(%arg0: i32, %arg1: i32) -> (i32, i32, i32) {
    %c0_i32 = arith.constant 0 : i32
    %c0_i32_0 = arith.constant 0 : i32
    %c0_i32_1 = arith.constant 0 : i32
    return %arg0, %c0_i32, %c0_i32_0 : i32, i32, i32
  }
  func.func @transform_1(%arg0: i32, %arg1: i32) -> (i32, i32, i32) {
    %c0_i32 = arith.constant 0 : i32
    %c0_i32_0 = arith.constant 0 : i32
    return %arg0, %arg1, %c0_i32 : i32, i32, i32
  }
  func.func @transform_2(%arg0: i32, %arg1: i32) -> (i32, i32) {
    %c0_i32 = arith.constant 0 : i32
    %c0_i32_0 = arith.constant 0 : i32
    %c0_i32_1 = arith.constant 0 : i32
    return %c0_i32, %c0_i32_0 : i32, i32
  }
  func.func @transform_3(%arg0: i32, %arg1: i32) -> (i32, i32) {
    %c0_i32 = arith.constant 0 : i32
    %c0_i32_0 = arith.constant 0 : i32
    %c0_i32_1 = arith.constant 0 : i32
    return %c0_i32, %c0_i32_0 : i32, i32
  }
  func.func @transform_4(%arg0: i32, %arg1: i32) -> (i32, i32) {
    %c0_i32 = arith.constant 0 : i32
    %c0_i32_0 = arith.constant 0 : i32
    %c0_i32_1 = arith.constant 0 : i32
    return %c0_i32, %c0_i32_0 : i32, i32
  }
  func.func @transform_5(%arg0: i32, %arg1: i32) -> (i32, i32) {
    %c0_i32 = arith.constant 0 : i32
    %c0_i32_0 = arith.constant 0 : i32
    %c0_i32_1 = arith.constant 0 : i32
    return %c0_i32, %c0_i32_0 : i32, i32
  }
  func.func @transform_6(%arg0: i32, %arg1: i32) -> (i32, i32) {
    %c0_i32 = arith.constant 0 : i32
    %c0_i32_0 = arith.constant 0 : i32
    %c0_i32_1 = arith.constant 0 : i32
    return %c0_i32, %c0_i32_0 : i32, i32
  }
  func.func @transform_7(%arg0: i32, %arg1: i32) -> (i32, i32) {
    %c0_i32 = arith.constant 0 : i32
    %c0_i32_0 = arith.constant 0 : i32
    %c0_i32_1 = arith.constant 0 : i32
    return %c0_i32, %c0_i32_0 : i32, i32
  }
  func.func @transform_8(%arg0: i32, %arg1: i32) -> (i32, i32) {
    %c0_i32 = arith.constant 0 : i32
    %c0_i32_0 = arith.constant 0 : i32
    %c0_i32_1 = arith.constant 0 : i32
    return %c0_i32, %c0_i32_0 : i32, i32
  }
  func.func @transform_9(%arg0: i32, %arg1: i32) -> (i32, i32) {
    %c0_i32 = arith.constant 0 : i32
    %c0_i32_0 = arith.constant 0 : i32
    %c0_i32_1 = arith.constant 0 : i32
    return %c0_i32, %c0_i32_0 : i32, i32
  }
  func.func @transform_10(%arg0: i32, %arg1: i32) -> (i32, i32) {
    %c0_i32 = arith.constant 0 : i32
    %c0_i32_0 = arith.constant 0 : i32
    %c0_i32_1 = arith.constant 0 : i32
    return %c0_i32, %c0_i32_0 : i32, i32
  }
  func.func @transform_11(%arg0: i32, %arg1: i32) -> (i32, i32) {
    %c0_i32 = arith.constant 0 : i32
    %c0_i32_0 = arith.constant 0 : i32
    %c0_i32_1 = arith.constant 0 : i32
    return %c0_i32, %c0_i32_0 : i32, i32
  }
  func.func @transform_12(%arg0: i32, %arg1: i32) -> (i32, i32) {
    %c0_i32 = arith.constant 0 : i32
    %c0_i32_0 = arith.constant 0 : i32
    %c0_i32_1 = arith.constant 0 : i32
    return %c0_i32, %c0_i32_0 : i32, i32
  }
  func.func @transform_13(%arg0: i32, %arg1: i32) -> (i32, i32) {
    %c0_i32 = arith.constant 0 : i32
    %c0_i32_0 = arith.constant 0 : i32
    %c0_i32_1 = arith.constant 0 : i32
    return %c0_i32, %c0_i32_0 : i32, i32
  }
  func.func @transform_14(%arg0: i32, %arg1: i32) -> (i32, i32) {
    %c0_i32 = arith.constant 0 : i32
    %c0_i32_0 = arith.constant 0 : i32
    %c0_i32_1 = arith.constant 0 : i32
    return %c0_i32, %c0_i32_0 : i32, i32
  }
  func.func @transform_15(%arg0: i32, %arg1: i32) -> (i32, i32) {
    %c0_i32 = arith.constant 0 : i32
    %c0_i32_0 = arith.constant 0 : i32
    %c0_i32_1 = arith.constant 0 : i32
    return %c0_i32, %c0_i32_0 : i32, i32
  }
  func.func @transform_16(%arg0: i32, %arg1: i32) -> (i32, i32, i32) {
    %c0_i32 = arith.constant 0 : i32
    %c0_i32_0 = arith.constant 0 : i32
    return %arg0, %arg1, %c0_i32 : i32, i32, i32
  }
  func.func @transform_17(%arg0: i32, %arg1: i32) -> (i32, i32, i32, i32) {
    %c0_i32 = arith.constant 0 : i32
    %c0_i32_0 = arith.constant 0 : i32
    %c0_i32_1 = arith.constant 0 : i32
    return %arg0, %c0_i32, %arg1, %c0_i32_0 : i32, i32, i32, i32
  }
}

</mosaic_0001>

<bundles_post_ra>
// kernel: tpu_custom_call.1
= control target key start
LH: loop header
LB: loop body
LE: loop exit
PB: predicated region body
PF: predicated region fallthrough
CT: control target
= control target key end

     0   :  { %s3428_s0 = inlined_call_operand.vmem [shape: f32[2,16,32], index: 0, kind: input, shape index: {}]   ;;  %s3429_s1 = inlined_call_operand.vmem [shape: bf16[2,16,16], index: 1, kind: input, shape index: {}]   ;;  %s3430_s2 = inlined_call_operand.hbm [shape: bf16[32,32], index: 2, kind: input, shape index: {}]   ;;  %s3431_s3 = inlined_call_operand.vmem [shape: f32[1,32], index: 3, kind: input, shape index: {}]   ;;  %s3432_s4 = inlined_call_operand.hbm [shape: bf16[32,64], index: 4, kind: input, shape index: {}]   ;;  %s3433_s5 = inlined_call_operand.vmem [shape: f32[1,64], index: 5, kind: input, shape index: {}]   ;;  %s3434_s6 = inlined_call_operand.hbm [shape: bf16[32,32], index: 6, kind: input, shape index: {}]   ;;  %s3435_s7 = inlined_call_operand.vmem [shape: f32[1,32], index: 7, kind: input, shape index: {}]   ;;  %s3436_s8 = inlined_call_operand.vmem [shape: f32[1,32], index: 8, kind: input, shape index: {}]   ;;  %s3437_s9 = inlined_call_operand.vmem [shape: f32[1,32], index: 9, kind: input, shape index: {}]   ;;  %s3438_s10 = inlined_call_operand.vmem [shape: f32[1,32], index: 10, kind: input, shape index: {}]   ;;  %s3439_s11 = inlined_call_operand.vmem [shape: f32[1,32], index: 11, kind: input, shape index: {}]   ;;  %s3440_s12 = inlined_call_operand.hbm [shape: bf16[32,64], index: 12, kind: input, shape index: {}]   ;;  %s3441_s13 = inlined_call_operand.vmem [shape: f32[1,64], index: 13, kind: input, shape index: {}]   ;;  %s3442_s14 = inlined_call_operand.vmem [shape: bf16[64,32], index: 14, kind: input, shape index: {}]   ;;  %s3443_s15 = inlined_call_operand.vmem [shape: f32[1,32], index: 15, kind: input, shape index: {}]   ;;  %s3444_s16 = inlined_call_operand.hbm [shape: f32[2,16,32], index: 16, kind: output, shape index: {0}]   ;;  %s3445_s17 = inlined_call_operand.hbm [shape: bf16[2,4,16,16], index: 17, kind: output, shape index: {1}]  }
   0x1   :  { %3460 = sst [smem:[#allocation30_spill]] %s3428_s0 }
   0x2   :  { %3461 = sst [smem:[#allocation31_spill]] %s3429_s1 }
   0x3   :  { %3462 = sst [smem:[#allocation32_spill]] %s3430_s2 }
   0x4   :  { %3463 = sst [smem:[#allocation33_spill]] %s3431_s3 }
   0x5   :  { %3464 = sst [smem:[#allocation34_spill]] %s3432_s4 }
   0x6   :  { %3465 = sst [smem:[#allocation35_spill]] %s3433_s5 }
   0x7   :  { %3466 = sst [smem:[#allocation36_spill]] %s3441_s13 }
   0x8   :  { %3467 = sst [smem:[#allocation37_spill]] %s3442_s14 }
   0x9   :  { %3468 = sst [smem:[#allocation38_spill]] %s3443_s15 }
   0xa   :  { %3469 = sst [smem:[#allocation39_spill]] %s3444_s16 }
   0xb   :  { %3470 = sst [smem:[#allocation40_spill]] %s3445_s17 }
   0xc   :  { %23 = vsyncpa [#allocation5], 0 }
   0xd   :  { %24 = vsyncpa [#allocation8], 0 }
   0xe   :  { %25 = vsyncpa [#allocation11], 0 }
   0xf   :  { %26 = vsyncpa [#allocation6], 0 }
  0x10   :  { %28 = vsyncpa [#allocation6 + $0x1], 0 }
  0x11   :  { %29 = vsyncpa [#allocation14], 0 }
  0x12   :  { %31 = vsyncpa [#allocation14 + $0x1], 0  ;;  %s2890_s24 = smov 0   ;;  %s2892_s25 = smov 0  }
  0x13   :  { %s2894_s26 = smov 0   ;;  %s2896_s27 = smov 0  }
  0x14   :  { %s2898_s28 = smov 0   ;;  %s2900_s29 = smov 0  }
  0x15   :  { %s2902_s0 = smov 0   ;;  %s2904_s30 = smov 0  }
  0x16 LB: > { %3471 = sst [smem:[#allocation20_spill]] %s2746_s24  ;;  %s2209_s18 = sadd.s32 4294967295, %s2774_s30   ;;  %s2774_s30 = sphi %s2904_s30, %s37_s30   ;;  %s2770_s0 = sphi %s2902_s0, %s3508_s0   ;;  %s2766_s29 = sphi %s2900_s29, %s3507_s29   ;;  %s2762_s28 = sphi %s2898_s28, %s3506_s28   ;;  %s2758_s27 = sphi %s2896_s27, %s3505_s27   ;;  %s2754_s26 = sphi %s2894_s26, %s3504_s26   ;;  %s2750_s25 = sphi %s2892_s25, %s3510_s25   ;;  %s2746_s24 = sphi %s2890_s24, %s3509_s24  }
  0x17   : > { %3472 = sst [smem:[#allocation21_spill]] %s2754_s26  ;;  %s2210_s19 = sadd.s32 4294967294, %s2774_s30  }
  0x18   : > { %3473 = sst [smem:[#allocation22_spill]] %s2766_s29  ;;  %s46_s1 = sadd.s32 1, %s2766_s29 }
  0x19   : > { %3474 = sst [smem:[#allocation23_spill]] %s2770_s0  ;;  %s49_s20 = sadd.s32 1, %s2770_s0 }
  0x1a   : > { %3475 = sst [smem:[#allocation24_spill]] %s2774_s30  ;;  %p47_p0 = scmp.ge.s32.totalorder %s46_s1, 2 }
  0x1b   : > { %s406_s21 = sadd.s32 1, %s2754_s26  ;;  %p416_p1 = scmp.ne.s32.totalorder %s2754_s26, %s2750_s25 }
  0x1c   : > { %p417_p2 = scmp.eq.s32.totalorder %s2209_s18, 3  ;;  %s3512_s1 = smov (%p47_p0, %s46_s1), 0 }
  0x1d   : > { %3476 = sst [smem:[#allocation25_spill]] %s3512_s1  ;;  %s3514_s20 = smov (!%p47_p0, %s49_s20), %s2770_s0 }
  0x1e   : > { %s402_s22 = ssub.s32 %s2766_s29, %s3512_s1  ;;  %p2942_p3 = por %p417_p2, %p416_p1 }
  0x1f   : > { %p51_p4 = scmp.ge.s32.totalorder %s3514_s20, 2  ;;  %p422_p5 = scmp.ne.s32.totalorder %s2750_s25, %s2746_s24 }
  0x20   : > { %s3477_s23 = scalar_select %p2942_p3, 1, 0 }
  0x21   : > { %p423_p6 = scmp.eq.s32.totalorder %s2210_s19, 3  ;;  %p2211_p7 = scmp.ge.s32.totalorder %s2774_s30, 1 }
  0x22   : > { %3478 = sst [smem:[#allocation26_spill]] %s3477_s23  ;;  %s3516_s20 = smov (%p51_p4, %s3514_s20), 0 }
  0x23   : > { %3479 = sst [smem:[#allocation27_spill]] %s3516_s20  ;;  %p2951_p8 = por %p423_p6, %p422_p5 }
  0x24   : > { %p458_p9 = scmp.lt.s32.totalorder %s2774_s30, 5  ;;  %s401_s17 = ssub.s32 %s2770_s0, %s3516_s20 }
  0x25   : > { %s3480_s16 = scalar_select %p2951_p8, 1, 0 }
  0x26   : > { %s403_s15 = sor.u32 %s402_s22, %s401_s17  ;;  %p2958_p10 = pnand %p2211_p7, %p458_p9 }
  0x27   : > { %3481 = sst [smem:[#allocation28_spill]] %s3480_s16  ;;  %p404_p11 = scmp.eq.s32.totalorder %s403_s15, 0 }
  0x28   : > { %p2962_p12 = scmp.eq.s32.totalorder %s2209_s18, 0  ;;  %p2372_p13 = pneg %p2958_p10 }
  0x29   : > { %s2969_s19 = scalar_select %p404_p11, %s2754_s26, %s406_s21  }
  0x2a   : > { %p2973_p0 = pnand %p2962_p12, %p2372_p13  ;;  %s3486_s4 = sld [smem:[#allocation34_spill]] }
  0x2b   : > { %3484 = sst [smem:[#allocation29_spill]] %s2969_s19  ;;  %s2776_s18 = smov [#allocation7]  }
  0x2c   : > { %s488_s20 = sshll.u32 %s2776_s18, 4  ;;  %s2777_s0 = smov 64   ;;  %s489_s20 = int_to_ptr.vmem [resolvable:$true] %s488_s20 }
  0x2d   : > { %s2778_s24 = smov 4   ;;  %s3487_s2 = sld [smem:[#allocation32_spill]] }
  0x2e   : > { %s2779_s30 = smov [#allocation4]   ;;  %s503_s23 = sshll.u32 %s3434_s6, 4  ;;  %s504_s23 = int_to_ptr.hbm [resolvable:$true] %s503_s23 }
  0x2f   : > { %s471_s17 = sshll.u32 %s2779_s30, 4  ;;  %s2780_s18 = smov [#allocation9]   ;;  %s472_s17 = int_to_ptr.vmem [resolvable:$true] %s471_s17 }
  0x30   : > { %s486_s15 = sshll.u32 %s3486_s4, 4  ;;  %s505_s13 = sshll.u32 %s2780_s18, 4  ;;  %s487_s15 = int_to_ptr.hbm [resolvable:$true] %s486_s15  ;;  %s506_s13 = int_to_ptr.vmem [resolvable:$true] %s505_s13 }
  0x31   : > { %2378 = dma.hbm_to_vmem [thread:$0]  (!%p2973_p0), %s487_s15, 256, %s489_s20, [#allocation8], %s2777_s0, %s2777_s0, %s2778_s24  }
  0x32   : > { %s532_s15 = sshll.u32 %s3440_s12, 4  ;;  %s2781_s19 = smov [#allocation10]   ;;  %s533_s15 = int_to_ptr.hbm [resolvable:$true] %s532_s15 }
  0x33   : > { %s469_s26 = sshll.u32 %s3487_s2, 4  ;;  %s534_s30 = sshll.u32 %s2781_s19, 4  ;;  %s470_s26 = int_to_ptr.hbm [resolvable:$true] %s469_s26  ;;  %s535_s30 = int_to_ptr.vmem [resolvable:$true] %s534_s30 }
  0x34   : > { %2375 = dma.hbm_to_vmem [thread:$0]  (!%p2973_p0), %s470_s26, 256, %s472_s17, [#allocation5], %s2777_s0, %s2777_s0, %s2778_s24  }
  0x35   : > { %2381 = dma.hbm_to_vmem [thread:$0]  (!%p2973_p0), %s504_s23, 256, %s506_s13, [#allocation8], %s2777_s0, %s2777_s0, %s2778_s24  }
  0x36   : > { %2384 = dma.hbm_to_vmem [thread:$0]  (!%p2973_p0), %s533_s15, 256, %s535_s30, [#allocation11], %s2777_s0, %s2777_s0, %s2778_s24  }
  0x37   : > { %578 = sbr.rel (%p2958_p10) target bundleno = 2429 (0x97d), region = 84 }
  0x3c   : > { %2725 = dma.done.wait (%p2962_p12), [#allocation5], 256  }
  0x3d   : > { %2727 = vsyncadd (%p2962_p12), [#allocation5], 4294967040 }
  0x3e   : > { %2729 = dma.done.wait (%p2962_p12), [#allocation8], 512  }
  0x3f   : > { %2731 = vsyncadd (%p2962_p12), [#allocation8], 4294966784 }
  0x40   : > { %2733 = dma.done.wait (%p2962_p12), [#allocation11], 256  }
  0x41   : > { %2735 = vsyncadd (%p2962_p12), [#allocation11], 4294967040  ;;  %s3012_s4 = sand.u32 1, %s2750_s25   ;;  %p659_p1 = scmp.lt.s32.totalorder %s2762_s28, 1  ;;  %v3027_v0 = vld [vmem:[%s3436_s8] sm:$0x1] }
  0x42   : > { %s2222_s13 = sshll.u32 %s3012_s4, 3  ;;  %s2223_s14 = sshll.u32 %s3012_s4, 4  ;;  %v3032_v1 = vld [vmem:[%s3437_s9] sm:$0x1] }
  0x43   : > { %s660_s16 = scalar_select %p659_p1, %s2762_s28, 1  ;;  %v3037_v2 = vld [vmem:[%s3438_s10] sm:$0x1] }
  0x44   : > { %p666_p2 = scmp.lt.s32.totalorder %s2758_s27, 1  ;;  %s3488_s1 = sld [smem:[#allocation30_spill]]  ;;  %v3042_v3 = vld [vmem:[%s3439_s11] sm:$0x1] }
  0x45   : > { %s2331_s24 = sshll.u32 %s660_s16, 4  ;;  %s2226_s23 = sshll.u32 %s660_s16, 1 }
  0x46   : > { %s667_s16 = scalar_select %p666_p2, %s2758_s27, 1 }
  0x47   : > { %s3489_s21 = sld [smem:[#allocation31_spill]]  ;;  %s3050_s22 = scalar_lea.vmem [#allocation12], %s2222_s13 }
  0x48   : > { %s3052_s18 = scalar_lea.vmem [#allocation13], %s2223_s14  ;;  %p2228_p4 = scmp.ne.s32.totalorder %s2758_s27, 0 }
  0x49   : > { %s3490_s5 = sld [smem:[#allocation35_spill]] (!%p2228_p4)  ;;  %s2782_s13 = smov (!%p2228_p4), 104  }
  0x4a   : > { %s3022_s29 = scalar_lea.vmem %s3488_s1, %s2331_s24  ;;  %s669_s24 = sadd.s32 %s2226_s23, %s667_s16 }
  0x4b   : > { %s2227_s26 = sshll.u32 %s669_s24, 2  ;;  %680 = sbr.rel (%p2228_p4) target bundleno = 497 (0x1f1), region = 104 }
  0x4c   : > { %s2783_s14 = smov (!%p2228_p4), 112   ;;  %s2784_s15 = smov (!%p2228_p4), 120  }
  0x4d   : > { %s3048_s17 = scalar_lea.vmem %s3489_s21, %s2227_s26  ;;  %s2785_s19 = smov (!%p2228_p4), 96  }
  0x50   : > { %v2333_v4 = vld [vmem:[#allocation7 + $0x8] sm:$0xff]  ;;  %v2332_v5 = vld [vmem:[#allocation7] sm:$0xff]  ;;  %v681_v6 = vld [vmem:[%s3022_s29] sm:$0xff]  ;;  %vm704_vm0 = vcmask 261120   ;;  %v2786_v17 = vmov 1983009808  }
  0x51   : > { %714 = vmatpush.bf16.msra.mxu0 %v2333_v4  ;;  %v682_v7 = vld [vmem:[%s3022_s29 + $0x8] sm:$0xff]  ;;  %v2489_v9 = vld [vmem:[%s3490_s5] ss:$0 sm:$0xff]  ;;  %v764_v18 = vunpack.c.l.s4 %v2786_v17  ;;  %v2787_v21 = vmov 1934713408   ;;  %vm773_vm1 = vcmask 1047556  }
  0x52   : > { %v683_v8 = vpack.c.bf16 %v682_v7, %v681_v6  ;;  %v778_v22 = vunpack.c.l.s4 %v2787_v21  ;;  %vm975_vm2 = vcmask 60416  }
  0x53   : > { %v3070_v19 = vunpack.c.0.s8 %v764_v18 }
  0x54   : > { %v3077_v32 = vunpack.c.0.s8 %v778_v22 }
  0x55   : > { %715 = vmatpush.bf16.msra.mxu0 %v2332_v5 }
  0x58   : > { %2237 = vmatmul.msk.bf16.vlgmr.msra.gmra.mxu0 %vm704_vm0, %v683_v8 }
  0xd5   : > { %v717_v10 = vpop.f32.mrf.mxu0 }
  0xd6   : > { %v718_v11 = vadd.f32 %v2489_v9, %v717_v10 }
  0xd8   : > { %v722_v12 = vpack.c.bf16 %v718_v11, %v718_v11 }
  0xda   : > { %734 = vrot.lane.b32.xlu2 %v722_v12, %s2782_s13  ;;  %730 = vrot.lane.b32.xlu1 %v722_v12, %s2783_s14  ;;  %v741_v28 = vshrl.u32 %v722_v12, 16 }
  0xdb   : > { %726 = vrot.lane.b32.xlu0 %v722_v12, %s2784_s15 }
  0xdd   : > { %v719_v13 = vpop.f32.mrf.mxu0 }
  0xde   : > { %v720_v14 = vadd.f32 %v2489_v9, %v719_v13 }
  0xe0   : > { %v3060_v15 = vpack.c.bf16 %v720_v14, %v720_v14 }
  0xe2   : > { %736 = vrot.lane.b32.xlu2 %v3060_v15, %s2782_s13  ;;  %732 = vrot.lane.b32.xlu1 %v3060_v15, %s2783_s14  ;;  %v753_v61 = vshrl.u32 %v3060_v15, 16 }
  0xe3   : > { %728 = vrot.lane.b32.xlu0 %v3060_v15, %s2784_s15 }
  0xea   : > { %986 = vrot.lane.b32.xlu1 %v3060_v15, %s2785_s19 }
  0xeb   : > { %984 = vrot.lane.b32.xlu0 %v722_v12, %s2785_s19 }
 0x134   : > { %v3068_v16 = vpop.permute.xlu2 %734 }
 0x135   : > { %v748_v23 = vshrl.u32 %v3068_v16, 16 }
 0x13c   : > { %v737_v35 = vpop.permute.xlu2 %736 }
 0x13d   : > { %v760_v42 = vshrl.u32 %v737_v35, 16 }
 0x14c   : > { %v731_v20 = vpop.permute.xlu1 %730 }
 0x14d   : > { %v746_v24 = vpack.i.b16 %v3068_v16, %v731_v20  ;;  %v747_v25 = vshrl.u32 %v731_v20, 16  ;;  %v727_v26 = vpop.permute.xlu0 %726  ;;  %992 = vrot.lane.b32.xlu1 %v731_v20, %s2785_s19 }
 0x14e   : > { %v740_v27 = vpack.i.b16 %v727_v26, %v722_v12  ;;  %v742_v29 = vshrl.u32 %v727_v26, 16  ;;  %988 = vrot.lane.b32.xlu2 %v727_v26, %s2785_s19 }
 0x14f   : > { %v749_v30 = vpack.i.b16 %v748_v23, %v747_v25  ;;  %v771_v31 = vperm.slane %v746_v24, %v3070_v19 }
 0x150   : > { %v743_v33 = vpack.i.b16 %v742_v29, %v741_v28  ;;  %v766_v34 = vperm.slane %v740_v27, %v3070_v19 }
 0x151   : > { %v772_v36 = vrot.slane %v771_v31, 4  ;;  %v798_v37 = vperm.slane %v749_v30, %v3070_v19 }
 0x152   : > { %v775_v38 = vrot.slane %v766_v34, 4  ;;  %v793_v39 = vperm.slane %v743_v33, %v3070_v19 }
 0x153   : > { %v799_v40 = vrot.slane %v798_v37, 4  ;;  %v774_v41 = vsel %vm773_vm1, %v772_v36, %v766_v34 }
 0x154   : > { %v776_v43 = vsel %vm773_vm1, %v771_v31, %v775_v38  ;;  %v780_v44 = vperm.slane %v774_v41, %v3077_v32  ;;  %v801_v45 = vrot.slane %v793_v39, 4  ;;  %v733_v46 = vpop.permute.xlu1 %732 }
 0x155   : > { %v784_v47 = vperm.slane %v776_v43, %v3077_v32  ;;  %v800_v48 = vsel %vm773_vm1, %v799_v40, %v793_v39  ;;  %v758_v49 = vpack.i.b16 %v737_v35, %v733_v46  ;;  %v759_v50 = vshrl.u32 %v733_v46, 16  ;;  %v729_v51 = vpop.permute.xlu0 %728  ;;  %998 = vrot.lane.b32.xlu1 %v737_v35, %s2785_s19 }
 0x156   : > { %v785_v52 = vrot.slane %v780_v44, 4  ;;  %v802_v53 = vsel %vm773_vm1, %v798_v37, %v801_v45  ;;  %v806_v54 = vperm.slane %v800_v48, %v3077_v32  ;;  %v752_v55 = vpack.i.b16 %v729_v51, %v3060_v15  ;;  %994 = vrot.lane.b32.xlu2 %v733_v46, %s2785_s19  ;;  %990 = vrot.lane.b32.xlu0 %v729_v51, %s2785_s19 }
 0x157   : > { %v787_v56 = vrot.slane %v784_v47, 4  ;;  %v810_v57 = vperm.slane %v802_v53, %v3077_v32  ;;  %v761_v58 = vpack.i.b16 %v760_v42, %v759_v50  ;;  %v824_v59 = vperm.slane %v758_v49, %v3070_v19 }
 0x158   : > { %v811_v60 = vrot.slane %v806_v54, 4  ;;  %v754_v62 = vshrl.u32 %v729_v51, 16  ;;  %v819_v6 = vperm.slane %v752_v55, %v3070_v19  ;;  %v786_v7 = vsel %vm773_vm1, 0, %v785_v52 }
 0x159   : > { %v788_v63 = vsel %vm773_vm1, 0, %v787_v56  ;;  %v813_v4 = vrot.slane %v810_v57, 4  ;;  %v825_v5 = vrot.slane %v824_v59, 4  ;;  %v850_v9 = vperm.slane %v761_v58, %v3070_v19 }
 0x15a   : > { %v872_v8 = vrot.slane %v788_v63, 4  ;;  %v867_v11 = vsel %vm773_vm1, %v787_v56, %v780_v44  ;;  %v755_v12 = vpack.i.b16 %v754_v62, %v753_v61  ;;  %v812_v14 = vsel %vm773_vm1, 0, %v811_v60 }
 0x15b   : > { %v814_v10 = vsel %vm773_vm1, 0, %v813_v4  ;;  %v826_v13 = vsel %vm773_vm1, %v825_v5, %v819_v6  ;;  %v851_v18 = vrot.slane %v850_v9, 4  ;;  %v827_v21 = vrot.slane %v819_v6, 4 }
 0x15c   : > { %v873_v15 = vsel %vm773_vm1, %v872_v8, %v786_v7  ;;  %v891_v17 = vrot.slane %v814_v10, 4  ;;  %v832_v22 = vperm.slane %v826_v13, %v3077_v32  ;;  %v845_v23 = vperm.slane %v755_v12, %v3070_v19 }
 0x15d   : > { %v877_v20 = vperm.slane %v873_v15, %v3070_v19  ;;  %v886_v24 = vsel %vm773_vm1, %v813_v4, %v806_v54  ;;  %v871_v26 = vperm.slane %v867_v11, %v3070_v19  ;;  %v828_v29 = vsel %vm773_vm1, %v824_v59, %v827_v21 }
 0x15e   : > { %v892_v25 = vsel %vm773_vm1, %v891_v17, %v812_v14  ;;  %996 = vrot.lane.b32.xlu0 %v3068_v16, %s2785_s19  ;;  %v836_v30 = vperm.slane %v828_v29, %v3077_v32  ;;  %v837_v31 = vrot.slane %v832_v22, 4  ;;  %v852_v33 = vsel %vm773_vm1, %v851_v18, %v845_v23 }
 0x15f   : > { %v878_v27 = vrot.slane %v877_v20, 4  ;;  %v896_v28 = vperm.slane %v892_v25, %v3070_v19  ;;  %v853_v34 = vrot.slane %v845_v23, 4  ;;  %v890_v36 = vperm.slane %v886_v24, %v3070_v19 }
 0x160   : > { %v858_v16 = vperm.slane %v852_v33, %v3077_v32  ;;  %v839_v39 = vrot.slane %v836_v30, 4  ;;  %v838_v45 = vsel %vm773_vm1, 0, %v837_v31  ;;  %v987_v33 = vpop.permute.xlu1 %986 }
 0x161   : > { %v879_v35 = vsel %vm773_vm1, %v878_v27, %v871_v26  ;;  %v897_v37 = vrot.slane %v896_v28, 4  ;;  %v854_v40 = vsel %vm773_vm1, %v850_v9, %v853_v34 }
 0x162   : > { %v883_v38 = vperm.slane %v879_v35, %v3077_v32  ;;  %v862_v42 = vperm.slane %v854_v40, %v3077_v32  ;;  %v840_v46 = vsel %vm773_vm1, 0, %v839_v39  ;;  %v863_v48 = vrot.slane %v858_v16, 4 }
 0x163   : > { %v898_v41 = vsel %vm773_vm1, %v897_v37, %v890_v36  ;;  %v910_v50 = vrot.slane %v840_v46, 4  ;;  %v905_v56 = vsel %vm773_vm1, %v839_v39, %v832_v22  ;;  %v985_v36 = vpop.permute.xlu0 %984 }
 0x164   : > { %v884_v43 = vrot.slane %v883_v38, 4  ;;  %v902_v44 = vperm.slane %v898_v41, %v3077_v32  ;;  %v947_v47 = vshrl.u32 %v883_v38, 16  ;;  %v865_v49 = vrot.slane %v862_v42, 4 }
 0x165   : > { %v911_v57 = vsel %vm773_vm1, %v910_v50, %v838_v45  ;;  %v864_v5 = vsel %vm773_vm1, 0, %v863_v48  ;;  %v909_v6 = vperm.slane %v905_v56, %v3070_v19  ;;  %v1003_v46 = vshrl.u32 %v985_v36, 16 }
 0x166   : > { %v885_v51 = vsel %vm773_vm1, 0, %v884_v43  ;;  %v903_v52 = vrot.slane %v902_v44, 4  ;;  %v945_v53 = vpack.i.b16 %v902_v44, %v883_v38  ;;  %v948_v54 = vshrl.u32 %v902_v44, 16 }
 0x167   : > { %v866_v55 = vsel %vm773_vm1, 0, %v865_v49  ;;  %v915_v60 = vperm.slane %v911_v57, %v3070_v19  ;;  %v955_v62 = vshrl.u32 %v885_v51, 16  ;;  %v924_v9 = vsel %vm773_vm1, %v865_v49, %v858_v16 }
 0x168   : > { %v904_v58 = vsel %vm773_vm1, 0, %v903_v52  ;;  %v949_v59 = vpack.i.b16 %v948_v54, %v947_v47  ;;  %976 = vst.msk [vmem:[#allocation2] sm:$0xf] %vm975_vm2, %v945_v53  ;;  %v929_v4 = vrot.slane %v866_v55, 4  ;;  %v928_v14 = vperm.slane %v924_v9, %v3070_v19 }
 0x169   : > { %v953_v61 = vpack.i.b16 %v904_v58, %v885_v51  ;;  %v956_v63 = vshrl.u32 %v904_v58, 16  ;;  %v916_v7 = vrot.slane %v915_v60, 4  ;;  %v1015_v43 = vshrl.u32 %v987_v33, 16 }
 0x16a   : > { %978 = vst.msk [vmem:[#allocation2 + $0x8] sm:$0xf] %vm975_vm2, %v949_v59  ;;  %v930_v10 = vsel %vm773_vm1, %v929_v4, %v864_v5 }
 0x16b   : > { %v957_v8 = vpack.i.b16 %v956_v63, %v955_v62  ;;  %980 = vst.msk [vmem:[#allocation2 + $0x10] sm:$0xf] %vm975_vm2, %v953_v61  ;;  %v917_v11 = vsel %vm773_vm1, %v916_v7, %v909_v6  ;;  %v934_v12 = vperm.slane %v930_v10, %v3070_v19 }
 0x16c   : > { %v921_v13 = vperm.slane %v917_v11, %v3077_v32 }
 0x16d   : > { %982 = vst.msk [vmem:[#allocation2 + $0x18] sm:$0xf] %vm975_vm2, %v957_v8  ;;  %v935_v15 = vrot.slane %v934_v12, 4 }
 0x16e   : > { %v922_v17 = vrot.slane %v921_v13, 4  ;;  %v963_v21 = vshrl.u32 %v921_v13, 16 }
 0x16f   : > { %v936_v18 = vsel %vm773_vm1, %v935_v15, %v928_v14 }
 0x170   : > { %v940_v20 = vperm.slane %v936_v18, %v3077_v32  ;;  %v923_v22 = vsel %vm773_vm1, 0, %v922_v17 }
 0x171   : > { %v971_v29 = vshrl.u32 %v923_v22, 16 }
 0x172   : > { %v941_v23 = vrot.slane %v940_v20, 4  ;;  %v961_v24 = vpack.i.b16 %v940_v20, %v921_v13  ;;  %v964_v25 = vshrl.u32 %v940_v20, 16 }
 0x174   : > { %v942_v26 = vsel %vm773_vm1, 0, %v941_v23  ;;  %v965_v27 = vpack.i.b16 %v964_v25, %v963_v21  ;;  %977 = vst.msk [vmem:[#allocation2 + $0x4] sm:$0xf] %vm975_vm2, %v961_v24 }
 0x175   : > { %v969_v28 = vpack.i.b16 %v942_v26, %v923_v22  ;;  %v972_v30 = vshrl.u32 %v942_v26, 16 }
 0x176   : > { %979 = vst.msk [vmem:[#allocation2 + $0xc] sm:$0xf] %vm975_vm2, %v965_v27 }
 0x177   : > { %v973_v31 = vpack.i.b16 %v972_v30, %v971_v29  ;;  %981 = vst.msk [vmem:[#allocation2 + $0x14] sm:$0xf] %vm975_vm2, %v969_v28 }
 0x179   : > { %983 = vst.msk [vmem:[#allocation2 + $0x1c] sm:$0xf] %vm975_vm2, %v973_v31 }
 0x1a8   : > { %v989_v34 = vpop.permute.xlu2 %988 }
 0x1a9   : > { %v1004_v38 = vshrl.u32 %v989_v34, 16  ;;  %v1002_v51 = vpack.i.b16 %v989_v34, %v985_v36 }
 0x1ab   : > { %v1005_v52 = vpack.i.b16 %v1004_v38, %v1003_v46  ;;  %v1028_v62 = vperm.slane %v1002_v51, %v3070_v19 }
 0x1ad   : > { %v1054_v63 = vperm.slane %v1005_v52, %v3070_v19  ;;  %v1036_v18 = vrot.slane %v1028_v62, 4 }
 0x1af   : > { %v1062_v23 = vrot.slane %v1054_v63, 4 }
 0x1b0   : > { %v995_v37 = vpop.permute.xlu2 %994 }
 0x1b1   : > { %v1021_v39 = vshrl.u32 %v995_v37, 16 }
 0x1bf   : > { %v993_v35 = vpop.permute.xlu1 %992 }
 0x1c0   : > { %v1009_v11 = vshrl.u32 %v993_v35, 16 }
 0x1c7   : > { %v999_v16 = vpop.permute.xlu1 %998 }
 0x1c8   : > { %v1020_v40 = vpack.i.b16 %v999_v16, %v995_v37  ;;  %v1022_v41 = vshrl.u32 %v999_v16, 16  ;;  %v991_v42 = vpop.permute.xlu0 %990 }
 0x1c9   : > { %v1014_v44 = vpack.i.b16 %v991_v42, %v987_v33  ;;  %v1016_v45 = vshrl.u32 %v991_v42, 16 }
 0x1ca   : > { %v1023_v47 = vpack.i.b16 %v1022_v41, %v1021_v39  ;;  %v1085_v48 = vperm.slane %v1020_v40, %v3070_v19 }
 0x1cb   : > { %v1017_v49 = vpack.i.b16 %v1016_v45, %v1015_v43  ;;  %v1080_v50 = vperm.slane %v1014_v44, %v3070_v19 }
 0x1cc   : > { %v1086_v53 = vrot.slane %v1085_v48, 4  ;;  %v1111_v54 = vperm.slane %v1023_v47, %v3070_v19 }
 0x1cd   : > { %v1088_v55 = vrot.slane %v1080_v50, 4  ;;  %v1106_v56 = vperm.slane %v1017_v49, %v3070_v19 }
 0x1ce   : > { %v1112_v57 = vrot.slane %v1111_v54, 4  ;;  %v1087_v58 = vsel %vm773_vm1, %v1086_v53, %v1080_v50 }
 0x1cf   : > { %v1089_v59 = vsel %vm773_vm1, %v1085_v48, %v1088_v55  ;;  %v1093_v60 = vperm.slane %v1087_v58, %v3077_v32  ;;  %v1114_v61 = vrot.slane %v1106_v56, 4 }
 0x1d0   : > { %v1097_v4 = vperm.slane %v1089_v59, %v3077_v32  ;;  %v1113_v5 = vsel %vm773_vm1, %v1112_v57, %v1106_v56  ;;  %v997_v6 = vpop.permute.xlu0 %996 }
 0x1d1   : > { %v1098_v7 = vrot.slane %v1093_v60, 4  ;;  %v1115_v8 = vsel %vm773_vm1, %v1111_v54, %v1114_v61  ;;  %v1119_v9 = vperm.slane %v1113_v5, %v3077_v32  ;;  %v1008_v10 = vpack.i.b16 %v997_v6, %v993_v35 }
 0x1d2   : > { %v1100_v12 = vrot.slane %v1097_v4, 4  ;;  %v1123_v13 = vperm.slane %v1115_v8, %v3077_v32  ;;  %v1010_v14 = vshrl.u32 %v997_v6, 16 }
 0x1d3   : > { %v1124_v15 = vrot.slane %v1119_v9, 4  ;;  %v1033_v17 = vperm.slane %v1008_v10, %v3070_v19  ;;  %v1099_v24 = vsel %vm773_vm1, 0, %v1098_v7 }
 0x1d4   : > { %v1101_v20 = vsel %vm773_vm1, 0, %v1100_v12  ;;  %v1126_v21 = vrot.slane %v1123_v13, 4  ;;  %v1011_v22 = vpack.i.b16 %v1010_v14, %v1009_v11  ;;  %v1166_v28 = vsel %vm773_vm1, %v1100_v12, %v1093_v60 }
 0x1d5   : > { %v1171_v25 = vrot.slane %v1101_v20, 4  ;;  %v1034_v26 = vrot.slane %v1033_v17, 4  ;;  %v1037_v29 = vsel %vm773_vm1, %v1033_v17, %v1036_v18  ;;  %v1125_v31 = vsel %vm773_vm1, 0, %v1124_v15 }
 0x1d6   : > { %v1127_v27 = vsel %vm773_vm1, 0, %v1126_v21  ;;  %v1059_v30 = vperm.slane %v1011_v22, %v3070_v19  ;;  %v1045_v16 = vperm.slane %v1037_v29, %v3077_v32  ;;  %v1170_v39 = vperm.slane %v1166_v28, %v3070_v19 }
 0x1d7   : > { %v1172_v33 = vsel %vm773_vm1, %v1171_v25, %v1099_v24  ;;  %v1190_v34 = vrot.slane %v1127_v27, 4  ;;  %v1035_v35 = vsel %vm773_vm1, %v1034_v26, %v1028_v62  ;;  %v1185_v40 = vsel %vm773_vm1, %v1126_v21, %v1119_v9 }
 0x1d8   : > { %v1176_v36 = vperm.slane %v1172_v33, %v3070_v19  ;;  %v1041_v37 = vperm.slane %v1035_v35, %v3077_v32  ;;  %v1060_v38 = vrot.slane %v1059_v30, 4  ;;  %v1063_v42 = vsel %vm773_vm1, %v1059_v30, %v1062_v23 }
 0x1d9   : > { %v1191_v41 = vsel %vm773_vm1, %v1190_v34, %v1125_v31  ;;  %v1048_v46 = vrot.slane %v1045_v16, 4  ;;  %v1071_v48 = vperm.slane %v1063_v42, %v3077_v32  ;;  %v1189_v50 = vperm.slane %v1185_v40, %v3070_v19 }
 0x1da   : > { %v1177_v43 = vrot.slane %v1176_v36, 4  ;;  %v1195_v44 = vperm.slane %v1191_v41, %v3070_v19  ;;  %v1046_v45 = vrot.slane %v1041_v37, 4  ;;  %v1061_v47 = vsel %vm773_vm1, %v1060_v38, %v1054_v63 }
 0x1db   : > { %v1049_v52 = vsel %vm773_vm1, 0, %v1048_v46  ;;  %v1067_v55 = vperm.slane %v1061_v47, %v3077_v32  ;;  %v1074_v56 = vrot.slane %v1071_v48, 4  ;;  %v1128_v4 = vsel %vm773_vm1, %v1048_v46, %v1041_v37 }
 0x1dc   : > { %v1178_v49 = vsel %vm773_vm1, %v1177_v43, %v1170_v39  ;;  %v1196_v51 = vrot.slane %v1195_v44, 4  ;;  %v1047_v54 = vsel %vm773_vm1, 0, %v1046_v45  ;;  %v1133_v58 = vrot.slane %v1049_v52, 4 }
 0x1dd   : > { %v1182_v53 = vperm.slane %v1178_v49, %v3077_v32  ;;  %v1072_v61 = vrot.slane %v1067_v55, 4  ;;  %v1075_v63 = vsel %vm773_vm1, 0, %v1074_v56  ;;  %v1132_v14 = vperm.slane %v1128_v4, %v3070_v19 }
 0x1de   : > { %v1197_v57 = vsel %vm773_vm1, %v1196_v51, %v1189_v50  ;;  %v1134_v5 = vsel %vm773_vm1, %v1133_v58, %v1047_v54  ;;  %v1152_v15 = vrot.slane %v1075_v63, 4  ;;  %v1147_v22 = vsel %vm773_vm1, %v1074_v56, %v1067_v55 }
 0x1df   : > { %v1183_v59 = vrot.slane %v1182_v53, 4  ;;  %v1201_v60 = vperm.slane %v1197_v57, %v3077_v32  ;;  %v1224_v62 = vshrl.u32 %v1182_v53, 16  ;;  %v1073_v10 = vsel %vm773_vm1, 0, %v1072_v61 }
 0x1e0   : > { %v1138_v11 = vperm.slane %v1134_v5, %v3070_v19  ;;  %v1153_v23 = vsel %vm773_vm1, %v1152_v15, %v1073_v10  ;;  %v1151_v28 = vperm.slane %v1147_v22, %v3070_v19 }
 0x1e1   : > { %v1184_v6 = vsel %vm773_vm1, 0, %v1183_v59  ;;  %v1202_v7 = vrot.slane %v1201_v60, 4  ;;  %v1222_v8 = vpack.i.b16 %v1201_v60, %v1182_v53  ;;  %v1225_v9 = vshrl.u32 %v1201_v60, 16 }
 0x1e2   : > { %v1232_v18 = vshrl.u32 %v1184_v6, 16  ;;  %v1139_v21 = vrot.slane %v1138_v11, 4  ;;  %v1157_v26 = vperm.slane %v1153_v23, %v3070_v19 }
 0x1e3   : > { %v1203_v12 = vsel %vm773_vm1, 0, %v1202_v7  ;;  %v1226_v13 = vpack.i.b16 %v1225_v9, %v1224_v62  ;;  %1237 = vst.msk [vmem:[#allocation3 + $0x4] sm:$0xf] %vm975_vm2, %v1222_v8 }
 0x1e4   : > { %v1230_v17 = vpack.i.b16 %v1203_v12, %v1184_v6  ;;  %v1233_v20 = vshrl.u32 %v1203_v12, 16  ;;  %v1140_v25 = vsel %vm773_vm1, %v1139_v21, %v1132_v14  ;;  %v1158_v29 = vrot.slane %v1157_v26, 4 }
 0x1e5   : > { %1239 = vst.msk [vmem:[#allocation3 + $0xc] sm:$0xf] %vm975_vm2, %v1226_v13  ;;  %v1144_v27 = vperm.slane %v1140_v25, %v3077_v32 }
 0x1e6   : > { %v1234_v24 = vpack.i.b16 %v1233_v20, %v1232_v18  ;;  %1241 = vst.msk [vmem:[#allocation3 + $0x14] sm:$0xf] %vm975_vm2, %v1230_v17  ;;  %v1159_v31 = vsel %vm773_vm1, %v1158_v29, %v1151_v28 }
 0x1e7   : > { %v1145_v30 = vrot.slane %v1144_v27, 4  ;;  %v1163_v33 = vperm.slane %v1159_v31, %v3077_v32  ;;  %v1208_v34 = vshrl.u32 %v1144_v27, 16 }
 0x1e8   : > { %1243 = vst.msk [vmem:[#allocation3 + $0x1c] sm:$0xf] %vm975_vm2, %v1234_v24 }
 0x1e9   : > { %v1146_v35 = vsel %vm773_vm1, 0, %v1145_v30  ;;  %v1164_v36 = vrot.slane %v1163_v33, 4  ;;  %v1206_v37 = vpack.i.b16 %v1163_v33, %v1144_v27  ;;  %v1209_v16 = vshrl.u32 %v1163_v33, 16 }
 0x1ea   : > { %v1216_v41 = vshrl.u32 %v1146_v35, 16 }
 0x1eb   : > { %v1165_v38 = vsel %vm773_vm1, 0, %v1164_v36  ;;  %v1210_v39 = vpack.i.b16 %v1209_v16, %v1208_v34  ;;  %1236 = vst.msk [vmem:[#allocation3] sm:$0xf] %vm975_vm2, %v1206_v37 }
 0x1ec   : > { %v1214_v40 = vpack.i.b16 %v1165_v38, %v1146_v35  ;;  %v1217_v19 = vshrl.u32 %v1165_v38, 16 }
 0x1ed   : > { %1238 = vst.msk [vmem:[#allocation3 + $0x8] sm:$0xf] %vm975_vm2, %v1210_v39 }
 0x1ee   : > { %v1218_v42 = vpack.i.b16 %v1217_v19, %v1216_v41  ;;  %1240 = vst.msk [vmem:[#allocation3 + $0x10] sm:$0xf] %vm975_vm2, %v1214_v40 }
 0x1f0   : > { %1242 = vst.msk [vmem:[#allocation3 + $0x18] sm:$0xf] %vm975_vm2, %v1218_v42 }
 0x1f1 PF: > { %v2335_v32 = vld [vmem:[#allocation4 + $0x8] sm:$0xff]  ;;  %s2238_s30 = sshll.u32 %s2758_s27, 3  ;;  %v2334_v43 = vld [vmem:[#allocation4] sm:$0xff]  ;;  %vm1268_vm3 = vcmask 261120   ;;  %s3491_s3 = sld [smem:[#allocation33_spill]]  ;;  %vm1423_vm4 = vcmask 64512  }
 0x1f2   : > { %s1245_s16 = scalar_lea.vmem %s3022_s29, %s2238_s30  ;;  %1278 = vmatpush.bf16.msra.mxu0 %v2335_v32  ;;  %s2788_s0 = smov 104   ;;  %v2336_v51 = vld [vmem:[#allocation2] sm:$0xff]  ;;  %v2337_v52 = vld [vmem:[#allocation2 + $0x8] sm:$0xff]  ;;  %v2338_v53 = vld [vmem:[#allocation2 + $0x10] sm:$0xff]  ;;  %v2791_v59 = vmov 1983009808  }
 0x1f3   : > { %v3223_v44 = vld [vmem:[%s1245_s16] sm:$0xff]  ;;  %s2789_s29 = smov 120   ;;  %s2790_s1 = smov 112   ;;  %v2339_v54 = vld [vmem:[#allocation2 + $0x18] sm:$0xff]  ;;  %v1428_v55 = vsel %vm1423_vm4, %v2336_v51, 0  ;;  %v1452_v56 = vsel %vm1423_vm4, %v2337_v52, 0  ;;  %v1307_v60 = vunpack.c.l.s4 %v2791_v59 }
 0x1f4   : > { %v1247_v45 = vpack.c.bf16 %v3223_v44, %v3223_v44  ;;  %v1476_v57 = vsel %vm1423_vm4, %v2338_v53, 0  ;;  %1437 = vmatpush.bf16.xpose.msra.mxu1 %v1428_v55  ;;  %1461 = vmatpush.bf16.xpose.msra.mxu2 %v1452_v56  ;;  %v1500_v58 = vsel %vm1423_vm4, %v2339_v54, 0  ;;  %v2792_v8 = vmov 1934713408   ;;  %s2793_s21 = smov 8   ;;  %s2795_s23 = smov 24  }
 0x1f5   : > { %1485 = vmatpush.bf16.xpose.msra.mxu3 %v1476_v57  ;;  %v3235_v63 = vunpack.c.0.s8 %v1307_v60  ;;  %v1321_v9 = vunpack.c.l.s4 %v2792_v8  ;;  %vm1316_vm5 = vcmask 1047556   ;;  %vm1515_vm6 = vcmask 130048   ;;  %s3492_s19 = sld [smem:[#allocation37_spill]]  ;;  %s2327_s15 = sshll.u32 %s2762_s28, 3 }
 0x1f6   : > { %1279 = vmatpush.bf16.msra.mxu0 %v2334_v43  ;;  %vm1564_vm7 = vcmask 125952   ;;  %vm1800_vm8 = vcmask 195584   ;;  %vm1951_vm13 = vcmask 523264   ;;  %s3494_s13 = sld [smem:[#allocation38_spill]]  ;;  %s2032_s30 = sadd.s32 %s2758_s27, %s2327_s15 }
 0x1f7   : > { %v2490_v46 = vld [vmem:[%s3491_s3] ss:$0 sm:$0xff]  ;;  %v3239_v17 = vunpack.c.0.s8 %v1321_v9  ;;  %s2328_s16 = sshll.u32 %s2032_s30, 2 }
 0x1f9   : > { %2247 = vmatmul.msk.bf16.vlgmr.msra.gmra.mxu0 %vm1268_vm3, %v1247_v45 }
 0x1fa   : > { %1509 = vmatpush.bf16.xpose.msrb.mxu0 %v1500_v58 }
 0x276   : > { %v1281_v47 = vpop.f32.mrf.mxu0 }
 0x277   : > { %v1282_v48 = vadd.f32 %v2490_v46, %v1281_v47 }
 0x279   : > { %v1285_v49 = vpack.c.bf16 %v1282_v48, %v1282_v48 }
 0x27b   : > { %1291 = vrot.lane.b32.xlu1 %v1285_v49, %s2788_s0  ;;  %1287 = vrot.lane.b32.xlu0 %v1285_v49, %s2789_s29  ;;  %v1296_v5 = vshrl.u32 %v1285_v49, 16  ;;  %s3496_s0 = sld [smem:[#allocation40_spill]] }
 0x27e   : > { %v1283_v50 = vpop.f32.mrf.mxu0 }
 0x281   : > { %s2034_s29 = scalar_lea.hbm %s3496_s0, %s2328_s16 }
 0x283   : > { %1289 = vrot.lane.b32.xlu0 %v1285_v49, %s2790_s1  ;;  %s3497_s1 = smov %s3496_s0 }
 0x284   : > { %s2656_s15 = scalar_lea.hbm %s3497_s1, 64 }
 0x2ed   : > { %v1288_v61 = vpop.permute.xlu0 %1287  ;;  %v1292_v7 = vpop.permute.xlu1 %1291 }
 0x2ee   : > { %v1297_v62 = vshrl.u32 %v1288_v61, 16  ;;  %v1295_v4 = vpack.i.b16 %v1288_v61, %v1285_v49  ;;  %v1303_v12 = vshrl.u32 %v1292_v7, 16 }
 0x2f0   : > { %v1298_v6 = vpack.i.b16 %v1297_v62, %v1296_v5  ;;  %v1309_v10 = vperm.slane %v1295_v4, %v3235_v63 }
 0x2f2   : > { %v1336_v13 = vperm.slane %v1298_v6, %v3235_v63  ;;  %v1318_v18 = vrot.slane %v1309_v10, 4 }
 0x2f4   : > { %v1344_v22 = vrot.slane %v1336_v13, 4 }
 0x2f5   : > { %v1290_v11 = vpop.permute.xlu0 %1289 }
 0x2f6   : > { %v1301_v14 = vpack.i.b16 %v1292_v7, %v1290_v11  ;;  %v1302_v15 = vshrl.u32 %v1290_v11, 16  ;;  %v1408_v11 = vld [vmem:[%s3048_s17] sm:$0xf]  ;;  %s2794_s17 = smov 16  }
 0x2f8   : > { %v1304_v20 = vpack.i.b16 %v1303_v12, %v1302_v15  ;;  %v1314_v21 = vperm.slane %v1301_v14, %v3235_v63  ;;  %v1409_v12 = vunpack.c.l.bf16 %v1408_v11 }
 0x2fa   : > { %v1315_v23 = vrot.slane %v1314_v21, 4  ;;  %v1319_v24 = vsel %vm1316_vm5, %v1314_v21, %v1318_v18  ;;  %v1341_v25 = vperm.slane %v1304_v20, %v3235_v63 }
 0x2fb   : > { %v1327_v26 = vperm.slane %v1319_v24, %v3239_v17 }
 0x2fc   : > { %v1317_v27 = vsel %vm1316_vm5, %v1315_v23, %v1309_v10  ;;  %v1342_v28 = vrot.slane %v1341_v25, 4  ;;  %v1345_v29 = vsel %vm1316_vm5, %v1341_v25, %v1344_v22 }
 0x2fd   : > { %v1323_v30 = vperm.slane %v1317_v27, %v3239_v17  ;;  %v1330_v31 = vrot.slane %v1327_v26, 4  ;;  %v1353_v33 = vperm.slane %v1345_v29, %v3239_v17 }
 0x2fe   : > { %v1343_v34 = vsel %vm1316_vm5, %v1342_v28, %v1336_v13 }
 0x2ff   : > { %v1328_v35 = vrot.slane %v1323_v30, 4  ;;  %v1331_v36 = vsel %vm1316_vm5, 0, %v1330_v31  ;;  %v1349_v37 = vperm.slane %v1343_v34, %v3239_v17  ;;  %v1356_v16 = vrot.slane %v1353_v33, 4 }
 0x300   : > { %v1363_v38 = vrot.slane %v1331_v36, 4  ;;  %v1358_v19 = vsel %vm1316_vm5, %v1330_v31, %v1323_v30 }
 0x301   : > { %v1329_v39 = vsel %vm1316_vm5, 0, %v1328_v35  ;;  %v1354_v40 = vrot.slane %v1349_v37, 4  ;;  %v1357_v41 = vsel %vm1316_vm5, 0, %v1356_v16  ;;  %v1377_v46 = vsel %vm1316_vm5, %v1356_v16, %v1349_v37 }
 0x302   : > { %v1382_v42 = vrot.slane %v1357_v41, 4  ;;  %v1364_v32 = vsel %vm1316_vm5, %v1363_v38, %v1329_v39  ;;  %v1362_v48 = vperm.slane %v1358_v19, %v3235_v63  ;;  %v1381_v52 = vperm.slane %v1377_v46, %v3235_v63 }
 0x303   : > { %v1355_v43 = vsel %vm1316_vm5, 0, %v1354_v40  ;;  %v1368_v45 = vperm.slane %v1364_v32, %v3235_v63 }
 0x304   : > { %v1383_v47 = vsel %vm1316_vm5, %v1382_v42, %v1355_v43 }
 0x305   : > { %v1369_v49 = vrot.slane %v1368_v45, 4  ;;  %v1387_v50 = vperm.slane %v1383_v47, %v3235_v63 }
 0x307   : > { %v1370_v51 = vsel %vm1316_vm5, %v1369_v49, %v1362_v48  ;;  %v1388_v53 = vrot.slane %v1387_v50, 4  ;;  %v2340_v50 = vld [vmem:[#allocation3] sm:$0xff] }
 0x308   : > { %v1374_v54 = vperm.slane %v1370_v51, %v3239_v17  ;;  %1593 = vmatpush.bf16.msrb.mxu1 %v2340_v50  ;;  %v2341_v51 = vld [vmem:[#allocation3 + $0x8] sm:$0xff] }
 0x309   : > { %v1389_v55 = vsel %vm1316_vm5, %v1388_v53, %v1381_v52  ;;  %v2342_v52 = vld [vmem:[#allocation3 + $0x10] sm:$0xff]  ;;  %1615 = vmatpush.bf16.msrb.mxu2 %v2341_v51  ;;  %v2343_v53 = vld [vmem:[#allocation3 + $0x18] sm:$0xff] }
 0x30a   : > { %v1393_v56 = vperm.slane %v1389_v55, %v3239_v17  ;;  %v1375_v57 = vrot.slane %v1374_v54, 4  ;;  %v1399_v58 = vshrl.u32 %v1374_v54, 16  ;;  %1637 = vmatpush.bf16.msrb.mxu3 %v2342_v52  ;;  %1659 = vmatpush.bf16.msra.mxu0 %v2343_v53 }
 0x30c   : > { %v1398_v59 = vpack.i.b16 %v1393_v56, %v1374_v54  ;;  %v1400_v60 = vshrl.u32 %v1393_v56, 16  ;;  %v1376_v61 = vsel %vm1316_vm5, 0, %v1375_v57  ;;  %v1394_v62 = vrot.slane %v1393_v56, 4 }
 0x30d   : > { %v1405_v7 = vshrl.u32 %v1376_v61, 16 }
 0x30e   : > { %2252 = vmatmul.msk.bf16.vlgmr.msra.gmra.mxu1 %vm1423_vm4, %v1398_v59  ;;  %v1401_v4 = vpack.i.b16 %v1400_v60, %v1399_v58  ;;  %v1395_v5 = vsel %vm1316_vm5, 0, %v1394_v62 }
 0x30f   : > { %v1404_v6 = vpack.i.b16 %v1395_v5, %v1376_v61  ;;  %v1406_v8 = vshrl.u32 %v1395_v5, 16 }
 0x310   : > { %2257 = vmatmul.msk.bf16.vlgmr.msra.gmra.mxu2 %vm1423_vm4, %v1401_v4 }
 0x311   : > { %2262 = vmatmul.msk.bf16.vlgmr.msra.gmra.mxu3 %vm1423_vm4, %v1404_v6  ;;  %v1407_v9 = vpack.i.b16 %v1406_v8, %v1405_v7 }
 0x313   : > { %2267 = vmatmul.msk.bf16.vlgmr.msrb.gmra.mxu0 %vm1423_vm4, %v1407_v9 }
 0x38b   : > { %v1439_v10 = vpop.f32.mrf.mxu1 }
 0x38c   : > { %v1440_v27 = vadd.f32 %v1439_v10, %v1409_v12 }
 0x38e   : > { %v1516_v30 = vsel %vm1515_vm6, %v1440_v27, -inf }
 0x390   : > { %v1511_v13 = vpop.f32.mrf.mxu0 }
 0x391   : > { %v1512_v14 = vadd.f32 %v1511_v13, %v1409_v12 }
 0x393   : > { %v1441_v15 = vpop.f32.mrf.mxu1  ;;  %v1463_v18 = vpop.f32.mrf.mxu2  ;;  %v1525_v20 = vsel %vm1515_vm6, %v1512_v14, -inf }
 0x394   : > { %v1464_v21 = vadd.f32 %v1463_v18, %v1409_v12  ;;  %1526 = vmax.xlane.f32.xlu0 %v1525_v20  ;;  %v1487_v22 = vpop.f32.mrf.mxu3 }
 0x395   : > { %v1488_v23 = vadd.f32 %v1487_v22, %v1409_v12 }
 0x396   : > { %v1519_v24 = vsel %vm1515_vm6, %v1464_v21, -inf }
 0x397   : > { %1520 = vmax.xlane.f32.xlu1 %v1519_v24  ;;  %v1522_v25 = vsel %vm1515_vm6, %v1488_v23, -inf }
 0x398   : > { %v1513_v26 = vpop.f32.mrf.mxu0  ;;  %1523 = vmax.xlane.f32.xlu2 %v1522_v25 }
 0x39b   : > { %v1465_v28 = vpop.f32.mrf.mxu2 }
 0x39c   : > { %v1489_v29 = vpop.f32.mrf.mxu3 }
 0x3a0   : > { %1517 = vmax.xlane.f32.xlu2 %v1516_v30 }
 0x407   : > { %v1527_v19 = vpop.xlane.xlu0 %1526 }
 0x408   : > { %v1531_v32 = vsub.f32 %v1512_v14, %v1527_v19 }
 0x40a   : > { %v1521_v33 = vpop.xlane.xlu1 %1520  ;;  %v1538_v45 = vmul.f32 1.442695, %v1531_v32 }
 0x40b   : > { %v1524_v31 = vpop.xlane.xlu2 %1523  ;;  %v1529_v36 = vsub.f32 %v1464_v21, %v1521_v33 }
 0x40c   : > { %v1530_v39 = vsub.f32 %v1488_v23, %v1524_v31 }
 0x40d   : > { %v1534_v16 = vmul.f32 1.442695, %v1529_v36 }
 0x40e   : > { %v1536_v41 = vmul.f32 1.442695, %v1530_v39 }
 0x413   : > { %v1518_v34 = vpop.xlane.xlu2 %1517 }
 0x414   : > { %v1528_v35 = vsub.f32 %v1440_v27, %v1518_v34 }
 0x416   : > { %v1532_v37 = vmul.f32 1.442695, %v1528_v35 }
 0x418   : > { %2494 = vpow2.f32 %v1532_v37 }
 0x419   : > { %2496 = vpow2.f32 %v1534_v16 }
 0x41a   : > { %2498 = vpow2.f32 %v1536_v41 }
 0x41b   : > { %2500 = vpow2.f32 %v1538_v45 }
 0x41e   : > { %v2495_v38 = vpop.eup %2494 }
 0x41f   : > { %v1540_v40 = vsel %vm1515_vm6, %v2495_v38, 0.0  ;;  %v2497_v42 = vpop.eup %2496 }
 0x420   : > { %1541 = vadd.xlane.f32.xlu2 %v1540_v40  ;;  %v1543_v43 = vsel %vm1515_vm6, %v2497_v42, 0.0  ;;  %v2499_v46 = vpop.eup %2498 }
 0x421   : > { %v1546_v47 = vsel %vm1515_vm6, %v2499_v46, 0.0  ;;  %v2501_v48 = vpop.eup %2500 }
 0x422   : > { %v1549_v49 = vsel %vm1515_vm6, %v2501_v48, 0.0 }
 0x428   : > { %1544 = vadd.xlane.f32.xlu2 %v1543_v43 }
 0x430   : > { %1547 = vadd.xlane.f32.xlu2 %v1546_v47 }
 0x438   : > { %1550 = vadd.xlane.f32.xlu2 %v1549_v49 }
 0x493   : > { %v1542_v54 = vpop.xlane.xlu2 %1541 }
 0x494   : > { %2502 = vrcp.f32 %v1542_v54 }
 0x49a   : > { %v2503_v55 = vpop.eup %2502 }
 0x49b   : > { %v1556_v56 = vmul.f32 %v2503_v55, %v2495_v38  ;;  %v1545_v57 = vpop.xlane.xlu2 %1544 }
 0x49c   : > { %2504 = vrcp.f32 %v1545_v57 }
 0x49d   : > { %v1560_v58 = vpack.c.bf16 %v1556_v56, %v1556_v56 }
 0x49f   : > { %1565 = vst.msk [vmem:[%s3052_s18] sm:$0xf] %vm1564_vm7, %v1560_v58  ;;  %2272 = vmatmul.msk.bf16.vlgmr.msrb.gmra.mxu1 %vm1515_vm6, %v1560_v58 }
 0x4a2   : > { %v2505_v59 = vpop.eup %2504 }
 0x4a3   : > { %v1557_v60 = vmul.f32 %v2505_v59, %v2497_v42  ;;  %v1548_v61 = vpop.xlane.xlu2 %1547 }
 0x4a4   : > { %2506 = vrcp.f32 %v1548_v61 }
 0x4a5   : > { %v1561_v62 = vpack.c.bf16 %v1557_v60, %v1557_v60 }
 0x4a7   : > { %1566 = vst.msk [vmem:[%s3052_s18 + $0x4] sm:$0xf] %vm1564_vm7, %v1561_v62  ;;  %2277 = vmatmul.msk.bf16.vlgmr.msrb.gmra.mxu2 %vm1515_vm6, %v1561_v62 }
 0x4aa   : > { %v2507_v4 = vpop.eup %2506 }
 0x4ab   : > { %v1558_v5 = vmul.f32 %v2507_v4, %v2499_v46  ;;  %v1551_v6 = vpop.xlane.xlu2 %1550 }
 0x4ac   : > { %2508 = vrcp.f32 %v1551_v6 }
 0x4ad   : > { %v1562_v7 = vpack.c.bf16 %v1558_v5, %v1558_v5 }
 0x4af   : > { %1567 = vst.msk [vmem:[%s3052_s18 + $0x8] sm:$0xf] %vm1564_vm7, %v1562_v7  ;;  %2282 = vmatmul.msk.bf16.vlgmr.msrb.gmra.mxu3 %vm1515_vm6, %v1562_v7 }
 0x4b2   : > { %v2509_v8 = vpop.eup %2508 }
 0x4b3   : > { %v1559_v9 = vmul.f32 %v2509_v8, %v2501_v48 }
 0x4b5   : > { %v1563_v10 = vpack.c.bf16 %v1559_v9, %v1559_v9 }
 0x4b7   : > { %1568 = vst.msk [vmem:[%s3052_s18 + $0xc] sm:$0xf] %vm1564_vm7, %v1563_v10  ;;  %2287 = vmatmul.msk.bf16.vlgmr.msra.gmra.mxu0 %vm1515_vm6, %v1563_v10 }
 0x51c   : > { %v1595_v11 = vpop.f32.mrf.mxu1 }
 0x51d   : > { %v1665_v15 = vpack.c.bf16 %v1595_v11, %v1595_v11 }
 0x51f   : > { %v1672_v20 = vshrl.u32 %v1665_v15, 16 }
 0x524   : > { %v1597_v12 = vpop.f32.mrf.mxu1 }
 0x52a   : > { %v1617_v13 = vpop.f32.mrf.mxu2 }
 0x52b   : > { %v1666_v14 = vpack.c.bf16 %v1617_v13, %v1617_v13 }
 0x52d   : > { %v1673_v18 = vshrl.u32 %v1666_v14, 16  ;;  %v1671_v21 = vpack.i.b16 %v1666_v14, %v1665_v15 }
 0x52f   : > { %v1674_v24 = vpack.i.b16 %v1673_v18, %v1672_v20  ;;  %v1685_v27 = vperm.slane %v1671_v21, %v3235_v63 }
 0x531   : > { %v1711_v29 = vperm.slane %v1674_v24, %v3235_v63  ;;  %v1693_v34 = vrot.slane %v1685_v27, 4 }
 0x532   : > { %v1619_v22 = vpop.f32.mrf.mxu2  ;;  %v1639_v23 = vpop.f32.mrf.mxu3 }
 0x533   : > { %v1667_v25 = vpack.c.bf16 %v1639_v23, %v1639_v23  ;;  %v1719_v16 = vrot.slane %v1711_v29, 4 }
 0x534   : > { %v1661_v26 = vpop.f32.mrf.mxu0 }
 0x535   : > { %v1668_v28 = vpack.c.bf16 %v1661_v26, %v1661_v26  ;;  %v1678_v30 = vshrl.u32 %v1667_v25, 16 }
 0x537   : > { %v1677_v31 = vpack.i.b16 %v1668_v28, %v1667_v25  ;;  %v1679_v33 = vshrl.u32 %v1668_v28, 16 }
 0x539   : > { %v1680_v35 = vpack.i.b16 %v1679_v33, %v1678_v30  ;;  %v1690_v36 = vperm.slane %v1677_v31, %v3235_v63 }
 0x53a   : > { %v1641_v37 = vpop.f32.mrf.mxu3 }
 0x53b   : > { %v1691_v38 = vrot.slane %v1690_v36, 4  ;;  %v1694_v39 = vsel %vm1316_vm5, %v1690_v36, %v1693_v34  ;;  %v1716_v40 = vperm.slane %v1680_v35, %v3235_v63  ;;  %v2345_v34 = vld [vmem:[#allocation9 + $0x8] sm:$0xff]  ;;  %v2344_v35 = vld [vmem:[#allocation9] sm:$0xff] }
 0x53c   : > { %v1702_v41 = vperm.slane %v1694_v39, %v3239_v17  ;;  %v1663_v19 = vpop.f32.mrf.mxu0  ;;  %1831 = vmatpush.bf16.msra.mxu1 %v2345_v34 }
 0x53d   : > { %v1692_v42 = vsel %vm1316_vm5, %v1691_v38, %v1685_v27  ;;  %v1717_v32 = vrot.slane %v1716_v40, 4  ;;  %v1720_v43 = vsel %vm1316_vm5, %v1716_v40, %v1719_v16 }
 0x53e   : > { %v1698_v45 = vperm.slane %v1692_v42, %v3239_v17  ;;  %v1705_v46 = vrot.slane %v1702_v41, 4  ;;  %v1728_v47 = vperm.slane %v1720_v43, %v3239_v17  ;;  %v2491_v41 = vld [vmem:[%s3435_s7] ss:$0 sm:$0xff] }
 0x53f   : > { %v1718_v48 = vsel %vm1316_vm5, %v1717_v32, %v1711_v29 }
 0x540   : > { %v1703_v49 = vrot.slane %v1698_v45, 4  ;;  %v1706_v50 = vsel %vm1316_vm5, 0, %v1705_v46  ;;  %v1724_v51 = vperm.slane %v1718_v48, %v3239_v17  ;;  %v1731_v52 = vrot.slane %v1728_v47, 4  ;;  %1832 = vmatpush.bf16.msra.mxu1 %v2344_v35 }
 0x541   : > { %v1738_v53 = vrot.slane %v1706_v50, 4  ;;  %v1733_v57 = vsel %vm1316_vm5, %v1705_v46, %v1698_v45  ;;  %v2796_v46 = vmov 32.0  }
 0x542   : > { %v1704_v54 = vsel %vm1316_vm5, 0, %v1703_v49  ;;  %v1729_v55 = vrot.slane %v1724_v51, 4  ;;  %v1732_v56 = vsel %vm1316_vm5, 0, %v1731_v52  ;;  %v1752_v62 = vsel %vm1316_vm5, %v1731_v52, %v1724_v51 }
 0x543   : > { %v1739_v58 = vsel %vm1316_vm5, %v1738_v53, %v1704_v54  ;;  %v1757_v59 = vrot.slane %v1732_v56, 4  ;;  %v1737_v5 = vperm.slane %v1733_v57, %v3235_v63  ;;  %v1756_v9 = vperm.slane %v1752_v62, %v3235_v63  ;;  %v2347_v57 = vld [vmem:[#allocation10 + $0x8] sm:$0xff]  ;;  %v2350_v62 = vld [vmem:[%s3492_s19 + $0x10] sm:$0xff] }
 0x544   : > { %v1730_v60 = vsel %vm1316_vm5, 0, %v1729_v55  ;;  %v1743_v61 = vperm.slane %v1739_v58, %v3235_v63  ;;  %2510 = vrcp.f32 %v2796_v46  ;;  %1906 = vmatpush.bf16.msra.mxu2 %v2347_v57  ;;  %v2346_v58 = vld [vmem:[#allocation10] sm:$0xff] }
 0x545   : > { %v1758_v4 = vsel %vm1316_vm5, %v1757_v59, %v1730_v60  ;;  %v2351_v59 = vld [vmem:[%s3492_s19 + $0x18] sm:$0xff] }
 0x546   : > { %v1744_v6 = vrot.slane %v1743_v61, 4  ;;  %v1762_v7 = vperm.slane %v1758_v4, %v3235_v63  ;;  %1959 = vmatpush.bf16.msra.mxu3 %v2351_v59 }
 0x548   : > { %v1745_v8 = vsel %vm1316_vm5, %v1744_v6, %v1737_v5  ;;  %v1763_v10 = vrot.slane %v1762_v7, 4  ;;  %1907 = vmatpush.bf16.msra.mxu2 %v2346_v58  ;;  %v2349_v5 = vld [vmem:[%s3492_s19 + $0x8] sm:$0xff] }
 0x549   : > { %v1749_v11 = vperm.slane %v1745_v8, %v3239_v17 }
 0x54a   : > { %v1764_v12 = vsel %vm1316_vm5, %v1763_v10, %v1756_v9  ;;  %v2511_v47 = vpop.eup %2510  ;;  %1960 = vmatpush.bf16.msra.mxu3 %v2350_v62 }
 0x54b   : > { %v1768_v13 = vperm.slane %v1764_v12, %v3239_v17  ;;  %v1750_v14 = vrot.slane %v1749_v11, 4  ;;  %v1774_v15 = vshrl.u32 %v1749_v11, 16  ;;  %v1843_v48 = vmul.f32 32.0, %v2511_v47 }
 0x54c   : > { %vm1847_vm9 = vweird.f32 %v2511_v47  ;;  %v1869_v12 = vperm.slane %v3027_v0, 0 }
 0x54d   : > { %v1775_v18 = vshrl.u32 %v1768_v13, 16  ;;  %v1751_v20 = vsel %vm1316_vm5, 0, %v1750_v14  ;;  %v1769_v21 = vrot.slane %v1768_v13, 4  ;;  %v1773_v22 = vpack.i.b16 %v1768_v13, %v1749_v11 }
 0x54e   : > { %v1780_v26 = vshrl.u32 %v1751_v20, 16  ;;  %v1844_v49 = vsub.f32 1.0, %v1843_v48  ;;  %1961 = vmatpush.bf16.msra.mxu3 %v2349_v5  ;;  %v1873_v14 = vperm.slane %v3032_v1, 0 }
 0x54f   : > { %v1776_v23 = vpack.i.b16 %v1775_v18, %v1774_v15  ;;  %v1770_v24 = vsel %vm1316_vm5, 0, %v1769_v21 }
 0x550   : > { %v1779_v25 = vpack.i.b16 %v1770_v24, %v1751_v20  ;;  %v1781_v63 = vshrl.u32 %v1770_v24, 16  ;;  %v1845_v50 = vmul.f32 %v2511_v47, %v1844_v49 }
 0x551   : > { %v1783_v27 = vunpack.c.l.b16 %v1776_v23 }
 0x552   : > { %v1787_v28 = vunpack.c.l.b16 %v1779_v25  ;;  %v1782_v29 = vpack.i.b16 %v1781_v63, %v1780_v26  ;;  %v1846_v51 = vadd.f32 %v2511_v47, %v1845_v50  ;;  %v2493_v63 = vld [vmem:[%s3494_s13] ss:$0 sm:$0xff] }
 0x553   : > { %v1784_v30 = vpack.c.b16 %v1783_v27, %v1783_v27 }
 0x554   : > { %v1788_v31 = vpack.c.b16 %v1787_v28, %v1787_v28  ;;  %v1791_v33 = vunpack.c.l.b16 %v1782_v29  ;;  %v3332_v52 = vsel %vm1847_vm9, %v2511_v47, %v1846_v51 }
 0x555   : > { %1785 = vrot.lane.b32.xlu2 %v1784_v30, %s2793_s21  ;;  %s2035_s21 = sshll.u32 %s3052_s18, 4  ;;  %s2036_s21 = int_to_ptr.vmem [resolvable:$true] %s2035_s21 }
 0x556   : > { %1789 = vrot.lane.b32.xlu1 %v1788_v31, %s2794_s17  ;;  %v1792_v17 = vpack.c.b16 %v1791_v33, %v1791_v33  ;;  %s3493_s17 = sld [smem:[#allocation36_spill]] }
 0x558   : > { %1793 = vrot.lane.b32.xlu0 %v1792_v17, %s2795_s23  ;;  %s2006_s23 = scalar_lea.sflag [#allocation14], %s3012_s4 }
 0x55c   : > { %v2492_v23 = vld [vmem:[%s3493_s17] ss:$0 sm:$0xff]  ;;  %s2037_s17 = sshll.u32 %s2034_s29, 4  ;;  %s2038_s17 = int_to_ptr.hbm [resolvable:$true] %s2037_s17 }
 0x55d   : > { %s2650_s20 = sshra.s32 %s2038_s17, 4  ;;  %s2651_s20 = int_to_ptr.hbm [resolvable:$true] %s2650_s20 }
 0x55e   : > { %s2652_s13 = scalar_lea.hbm %s2651_s20, 16  ;;  %p2657_p9 = scmp.lt.s32.totalorder %s2651_s20, %s3497_s1 }
 0x55f   : > { %p2653_p5 = scmp.ne.s32.totalorder %s2651_s20, %s2652_s13  ;;  %p2658_p10 = scmp.lt.s32.totalorder %s2656_s15, %s2652_s13 }
 0x561   : > { %p2654_p6 = pnand %p2653_p5, %p2942_p3  ;;  %p2659_p11 = por %p2658_p10, %p2657_p9 }
 0x563   : > { %p2655_p7 = pneg %p2654_p6 }
 0x565   : > { %p2660_p12 = pnand %p2659_p11, %p2655_p7 }
 0x5af   : > { %v1786_v36 = vpop.permute.xlu2 %1785 }
 0x5b0   : > { %v1797_v37 = vsel %vm1423_vm4, %v1773_v22, %v1786_v36  ;;  %v2348_v22 = vld [vmem:[%s3492_s19] sm:$0xff] }
 0x5b1   : > { %1962 = vmatpush.bf16.msra.mxu3 %v2348_v22 }
 0x5c8   : > { %v1790_v16 = vpop.permute.xlu1 %1789 }
 0x5c9   : > { %v1799_v38 = vsel %vm1515_vm6, %v1797_v37, %v1790_v16 }
 0x5ca   : > { %v1794_v39 = vpop.permute.xlu0 %1793 }
 0x5cb   : > { %v1802_v40 = vsel %vm1800_vm8, %v1799_v38, %v1794_v39 }
 0x5cc   : > { %2296 = vmatmul.msk.bf16.vlgmr.msra.gmra.mxu1 %vm1268_vm3, %v1802_v40 }
 0x649   : > { %v1834_v19 = vpop.f32.mrf.mxu1 }
 0x64a   : > { %v1835_v42 = vadd.f32 %v2491_v41, %v1834_v19 }
 0x64c   : > { %v1838_v32 = vadd.f32 %v1835_v42, %v3223_v44 }
 0x64e   : > { %v1839_v43 = vsel %vm1268_vm3, %v1838_v32, 0.0 }
 0x64f   : > { %1840 = vadd.xlane.f32.xlu2 %v1839_v43 }
 0x651   : > { %v1836_v45 = vpop.f32.mrf.mxu1 }
 0x6c2   : > { %v1841_v53 = vpop.xlane.xlu2 %1840 }
 0x6c3   : > { %v1849_v54 = vmul.f32 %v3332_v52, %v1841_v53 }
 0x6c5   : > { %v1850_v55 = vsub.f32 %v1838_v32, %v1849_v54 }
 0x6c7   : > { %v1851_v56 = vmul.f32 %v1850_v55, %v1850_v55 }
 0x6c9   : > { %v1852_v44 = vsel %vm1268_vm3, %v1851_v56, 0.0 }
 0x6ca   : > { %1853 = vadd.xlane.f32.xlu1 %v1852_v44 }
 0x73d   : > { %v1854_v60 = vpop.xlane.xlu1 %1853 }
 0x73e   : > { %v1855_v61 = vmul.f32 %v1854_v60, %v3332_v52 }
 0x740   : > { %v1856_v4 = vadd.f32 1e-05, %v1855_v61 }
 0x742   : > { %2512 = vrsqrt.f32 %v1856_v4  ;;  %vm1863_vm11 = vweird.f32 %v1856_v4 }
 0x748   : > { %v2513_v6 = vpop.eup %2512 }
 0x749   : > { %v1858_v7 = vmul.f32 %v2513_v6, %v1856_v4  ;;  %vm1864_vm10 = vweird.f32 %v2513_v6 }
 0x74a   : > { %vm1865_vm12 = vmor %vm1863_vm11, %vm1864_vm10 }
 0x74b   : > { %v1859_v8 = vmul.f32 %v2513_v6, %v1858_v7 }
 0x74d   : > { %v1860_v9 = vmul.f32 0.5, %v1859_v8 }
 0x74f   : > { %v1861_v10 = vsub.f32 1.5, %v1860_v9 }
 0x751   : > { %v1862_v11 = vmul.f32 %v2513_v6, %v1861_v10 }
 0x753   : > { %v1866_v13 = vsel %vm1865_vm12, %v2513_v6, %v1862_v11 }
 0x754   : > { %v1867_v15 = vmul.f32 %v1866_v13, %v1850_v55 }
 0x756   : > { %v1871_v18 = vmul.f32 %v1869_v12, %v1867_v15 }
 0x758   : > { %v1875_v20 = vadd.f32 %v1873_v14, %v1871_v18 }
 0x75a   : > { %v1876_v21 = vpack.c.bf16 %v1875_v20, %v1875_v20 }
 0x75c   : > { %2305 = vmatmul.msk.bf16.vlgmr.msra.gmra.mxu2 %vm1268_vm3, %v1876_v21 }
 0x7df   : > { %v1909_v0 = vpop.f32.mrf.mxu2 }
 0x7e0   : > { %v1910_v24 = vadd.f32 %v2492_v23, %v1909_v0 }
 0x7e2   : > { %v1913_v25 = vmax.f32 %v1910_v24, 0.0 }
 0x7e4   : > { %v1914_v1 = vpack.c.bf16 %v1913_v25, %v1913_v25 }
 0x7e6   : > { %2322 = vmatmul.msk.bf16.vlgmr.msra.gmra.mxu3 %vm1951_vm13, %v1914_v1 }
 0x7e7   : > { %v1911_v26 = vpop.f32.mrf.mxu2 }
 0x869   : > { %v1964_v27 = vpop.f32.mrf.mxu3 }
 0x86a   : > { %v1965_v28 = vadd.f32 %v2493_v63, %v1964_v27 }
 0x86c   : > { %v1968_v29 = vadd.f32 %v1965_v28, %v1875_v20 }
 0x86e   : > { %v1969_v30 = vsel %vm1268_vm3, %v1968_v29, 0.0 }
 0x86f   : > { %1970 = vadd.xlane.f32.xlu0 %v1969_v30 }
 0x871   : > { %v1966_v31 = vpop.f32.mrf.mxu3 }
 0x8e2   : > { %v1971_v33 = vpop.xlane.xlu0 %1970 }
 0x8e3   : > { %v1972_v17 = vmul.f32 %v1971_v33, %v3332_v52 }
 0x8e5   : > { %v1973_v34 = vsub.f32 %v1968_v29, %v1972_v17 }
 0x8e7   : > { %v1974_v35 = vmul.f32 %v1973_v34, %v1973_v34 }
 0x8e9   : > { %v1975_v36 = vsel %vm1268_vm3, %v1974_v35, 0.0 }
 0x8ea   : > { %1976 = vadd.xlane.f32.xlu2 %v1975_v36 }
 0x8eb   : > { %2663 = shalt.err (!%p2660_p12)
}
 0x8ec   : > { %s2797_s18 = smov 64   ;;  %s2798_s16 = smov 128   ;;  %v1992_v43 = vperm.slane %v3037_v2, 0  ;;  %v1996_v47 = vperm.slane %v3042_v3, 0 }
 0x8ed   : > { %s2799_s24 = smov 4   ;;  %s2325_s2 = sshll.u32 %s2762_s28, 1 }
 0x8ee   : > { %2369 = dma.vmem_to_hbm [thread:$0]  (%p2942_p3), %s2036_s21, 256, %s2038_s17, %s2006_s23, %s2797_s18, %s2798_s16, %s2799_s24  }
 0x8ef   : > { %s2016_s3 = sadd.s32 %s2758_s27, %s2325_s2  ;;  %s3498_s29 = sld [smem:[#allocation39_spill]] }
 0x8f0   : > { %s2326_s5 = sshll.u32 %s2016_s3, 3  ;;  %s2020_s27 = sshll.u32 %s3050_s22, 4  ;;  %s2021_s27 = int_to_ptr.vmem [resolvable:$true] %s2020_s27 }
 0x8f1   : > { %s2001_s23 = scalar_lea.sflag [#allocation6], %s3012_s4 }
 0x8f5   : > { %s3499_s21 = smov %s3498_s29  ;;  %s2018_s17 = scalar_lea.hbm %s3498_s29, %s2326_s5 }
 0x8f6   : > { %s2022_s28 = sshll.u32 %s2018_s17, 4  ;;  %s2684_s18 = scalar_lea.hbm %s3499_s21, 32  ;;  %s2023_s28 = int_to_ptr.hbm [resolvable:$true] %s2022_s28 }
 0x8f7   : > { %s2678_s20 = sshra.s32 %s2023_s28, 4  ;;  %s2679_s20 = int_to_ptr.hbm [resolvable:$true] %s2678_s20 }
 0x8f8   : > { %s2680_s13 = scalar_lea.hbm %s2679_s20, 8  ;;  %p2685_p2 = scmp.lt.s32.totalorder %s2679_s20, %s3499_s21 }
 0x8f9   : > { %p2681_p13 = scmp.ne.s32.totalorder %s2679_s20, %s2680_s13  ;;  %p2686_p4 = scmp.lt.s32.totalorder %s2684_s18, %s2680_s13 }
 0x8fb   : > { %p2682_p0 = pnand %p2681_p13, %p2942_p3  ;;  %p2687_p5 = por %p2686_p4, %p2685_p2 }
 0x8fd   : > { %p2683_p1 = pneg %p2682_p0 }
 0x8ff   : > { %p2688_p6 = pnand %p2687_p5, %p2683_p1 }
 0x95d   : > { %v1977_v37 = vpop.xlane.xlu2 %1976 }
 0x95e   : > { %v1978_v16 = vmul.f32 %v1977_v37, %v3332_v52 }
 0x960   : > { %v1979_v38 = vadd.f32 1e-05, %v1978_v16 }
 0x962   : > { %2514 = vrsqrt.f32 %v1979_v38  ;;  %vm1986_vm15 = vweird.f32 %v1979_v38 }
 0x968   : > { %v2515_v39 = vpop.eup %2514 }
 0x969   : > { %v1981_v40 = vmul.f32 %v2515_v39, %v1979_v38  ;;  %vm1987_vm14 = vweird.f32 %v2515_v39 }
 0x96a   : > { %vm1988_vm0 = vmor %vm1986_vm15, %vm1987_vm14 }
 0x96b   : > { %v1982_v41 = vmul.f32 %v2515_v39, %v1981_v40 }
 0x96d   : > { %v1983_v19 = vmul.f32 0.5, %v1982_v41 }
 0x96f   : > { %v1984_v42 = vsub.f32 1.5, %v1983_v19 }
 0x971   : > { %v1985_v32 = vmul.f32 %v2515_v39, %v1984_v42 }
 0x973   : > { %v1989_v45 = vsel %vm1988_vm0, %v2515_v39, %v1985_v32 }
 0x974   : > { %v1990_v46 = vmul.f32 %v1989_v45, %v1973_v34 }
 0x976   : > { %v1994_v48 = vmul.f32 %v1992_v43, %v1990_v46 }
 0x978   : > { %v1998_v49 = vadd.f32 %v1996_v47, %v1994_v48 }
 0x97a   : > { %1999 = vst.msk [vmem:[%s3050_s22] sm:$0xff] %vm1268_vm3, %v1998_v49 }
 0x97b   : > { %2691 = shalt.err (!%p2688_p6)
}
 0x97c   : > { %2368 = dma.vmem_to_hbm [thread:$0]  (%p2942_p3), %s2021_s27, 128, %s2023_s28, %s2001_s23  }
 0x97d PF: > { %s3500_s4 = sld [smem:[#allocation24_spill]] }
 0x97e   : > { %s3501_s22 = sld [smem:[#allocation20_spill]] }
 0x983   : > { %p2400_p7 = scmp.ge.s32.totalorder %s3500_s4, 2 }
 0x984   : > { %s2052_s3 = sand.u32 1, %s3501_s22  }
 0x985   : > { %p2386_p9 = pnand %p2400_p7, %p2951_p8  ;;  %s2053_s5 = scalar_lea.sflag [#allocation6], %s2052_s3 }
 0x987   : > { %p2387_p10 = pneg %p2386_p9 }
 0x989   : > { %2737 = dma.done.wait (%p2387_p10), %s2053_s5, 128  }
 0x98a   : > { %2739 = vsyncadd (%p2387_p10), %s2053_s5, 4294967168  ;;  %s2063_s26 = scalar_lea.sflag [#allocation14], %s2052_s3 }
 0x98b   : > { %2741 = dma.done.wait (%p2387_p10), %s2063_s26, 256  }
 0x98c   : > { %2743 = vsyncadd (%p2387_p10), %s2063_s26, 4294967040  ;;  %s37_s30 = sadd.s32 1, %s3500_s4   ;;  %s3503_s14 = sld [smem:[#allocation21_spill]] }
 0x98d   : > { %p34_p11 = scmp.ge.s32.totalorder %s37_s30, 6   ;;  %s3504_s26 = sld [smem:[#allocation29_spill]] }
 0x98e   : > { %s3505_s27 = sld [smem:[#allocation22_spill]]  ;;  %s3509_s24 = smov %s2750_s25 }
 0x98f   : > { %s3506_s28 = sld [smem:[#allocation23_spill]]  ;;  %36 = sbr.rel (!%p34_p11) target bundleno = 22 (0x16), region = 161 }
 0x990   : > { %s3507_s29 = sld [smem:[#allocation25_spill]] }
 0x991   : > { %s3508_s0 = sld [smem:[#allocation27_spill]] }
 0x992   : > { %s3510_s25 = smov %s3503_s14 }
 0x994   :  { %2069 = vsyncpa [#allocation5], 1 }
 0x995   :  { %2071 = vsyncpa [#allocation5 + $0x1], 1 }
 0x996   :  { %2072 = vsyncpa [#allocation8], 1 }
 0x997   :  { %2073 = vsyncpa [#allocation11], 1 }
 0x998   :  { %2074 = vsyncpa [#allocation6], 1 }
 0x999   :  { %2076 = vsyncpa [#allocation6 + $0x1], 1 }
 0x99a   :  { %2077 = vsyncpa [#allocation14], 1 }
 0x99b   :  { %2079 = vsyncpa [#allocation14 + $0x1], 1 }

// kernel: tpu_custom_call.1
= control target key start
LH: loop header
LB: loop body
LE: loop exit
PB: predicated region body
PF: predicated region fallthrough
CT: control target
= control target key end

     0   :  { %s3428_s0 = inlined_call_operand.vmem [shape: f32[2,16,32], index: 0, kind: input, shape index: {}]   ;;  %s3429_s1 = inlined_call_operand.vmem [shape: bf16[2,16,16], index: 1, kind: input, shape index: {}]   ;;  %s3430_s2 = inlined_call_operand.hbm [shape: bf16[32,32], index: 2, kind: input, shape index: {}]   ;;  %s3431_s3 = inlined_call_operand.vmem [shape: f32[1,32], index: 3, kind: input, shape index: {}]   ;;  %s3432_s4 = inlined_call_operand.hbm [shape: bf16[32,64], index: 4, kind: input, shape index: {}]   ;;  %s3433_s5 = inlined_call_operand.vmem [shape: f32[1,64], index: 5, kind: input, shape index: {}]   ;;  %s3434_s6 = inlined_call_operand.hbm [shape: bf16[32,32], index: 6, kind: input, shape index: {}]   ;;  %s3435_s7 = inlined_call_operand.vmem [shape: f32[1,32], index: 7, kind: input, shape index: {}]   ;;  %s3436_s8 = inlined_call_operand.vmem [shape: f32[1,32], index: 8, kind: input, shape index: {}]   ;;  %s3437_s9 = inlined_call_operand.vmem [shape: f32[1,32], index: 9, kind: input, shape index: {}]   ;;  %s3438_s10 = inlined_call_operand.vmem [shape: f32[1,32], index: 10, kind: input, shape index: {}]   ;;  %s3439_s11 = inlined_call_operand.vmem [shape: f32[1,32], index: 11, kind: input, shape index: {}]   ;;  %s3440_s12 = inlined_call_operand.hbm [shape: bf16[32,64], index: 12, kind: input, shape index: {}]   ;;  %s3441_s13 = inlined_call_operand.vmem [shape: f32[1,64], index: 13, kind: input, shape index: {}]   ;;  %s3442_s14 = inlined_call_operand.vmem [shape: bf16[64,32], index: 14, kind: input, shape index: {}]   ;;  %s3443_s15 = inlined_call_operand.vmem [shape: f32[1,32], index: 15, kind: input, shape index: {}]   ;;  %s3444_s16 = inlined_call_operand.hbm [shape: f32[2,16,32], index: 16, kind: output, shape index: {0}]   ;;  %s3445_s17 = inlined_call_operand.hbm [shape: bf16[2,4,16,16], index: 17, kind: output, shape index: {1}]  }
   0x1   :  { %3460 = sst [smem:[#allocation30_spill]] %s3428_s0 }
   0x2   :  { %3461 = sst [smem:[#allocation31_spill]] %s3429_s1 }
   0x3   :  { %3462 = sst [smem:[#allocation32_spill]] %s3430_s2 }
   0x4   :  { %3463 = sst [smem:[#allocation33_spill]] %s3431_s3 }
   0x5   :  { %3464 = sst [smem:[#allocation34_spill]] %s3432_s4 }
   0x6   :  { %3465 = sst [smem:[#allocation35_spill]] %s3433_s5 }
   0x7   :  { %3466 = sst [smem:[#allocation36_spill]] %s3441_s13 }
   0x8   :  { %3467 = sst [smem:[#allocation37_spill]] %s3442_s14 }
   0x9   :  { %3468 = sst [smem:[#allocation38_spill]] %s3443_s15 }
   0xa   :  { %3469 = sst [smem:[#allocation39_spill]] %s3444_s16 }
   0xb   :  { %3470 = sst [smem:[#allocation40_spill]] %s3445_s17 }
   0xc   :  { %23 = vsyncpa [#allocation5], 0 }
   0xd   :  { %24 = vsyncpa [#allocation8], 0 }
   0xe   :  { %25 = vsyncpa [#allocation11], 0 }
   0xf   :  { %26 = vsyncpa [#allocation6], 0 }
  0x10   :  { %28 = vsyncpa [#allocation6 + $0x1], 0 }
  0x11   :  { %29 = vsyncpa [#allocation14], 0 }
  0x12   :  { %31 = vsyncpa [#allocation14 + $0x1], 0  ;;  %s2890_s24 = smov 0   ;;  %s2892_s25 = smov 0  }
  0x13   :  { %s2894_s26 = smov 0   ;;  %s2896_s27 = smov 0  }
  0x14   :  { %s2898_s28 = smov 0   ;;  %s2900_s29 = smov 0  }
  0x15   :  { %s2902_s0 = smov 0   ;;  %s2904_s30 = smov 0  }
  0x16 LB: > { %3471 = sst [smem:[#allocation20_spill]] %s2746_s24  ;;  %s2209_s18 = sadd.s32 4294967295, %s2774_s30   ;;  %s2774_s30 = sphi %s2904_s30, %s37_s30   ;;  %s2770_s0 = sphi %s2902_s0, %s3508_s0   ;;  %s2766_s29 = sphi %s2900_s29, %s3507_s29   ;;  %s2762_s28 = sphi %s2898_s28, %s3506_s28   ;;  %s2758_s27 = sphi %s2896_s27, %s3505_s27   ;;  %s2754_s26 = sphi %s2894_s26, %s3504_s26   ;;  %s2750_s25 = sphi %s2892_s25, %s3510_s25   ;;  %s2746_s24 = sphi %s2890_s24, %s3509_s24  }
  0x17   : > { %3472 = sst [smem:[#allocation21_spill]] %s2754_s26  ;;  %s2210_s19 = sadd.s32 4294967294, %s2774_s30  }
  0x18   : > { %3473 = sst [smem:[#allocation22_spill]] %s2766_s29  ;;  %s46_s1 = sadd.s32 1, %s2766_s29 }
  0x19   : > { %3474 = sst [smem:[#allocation23_spill]] %s2770_s0  ;;  %s49_s20 = sadd.s32 1, %s2770_s0 }
  0x1a   : > { %3475 = sst [smem:[#allocation24_spill]] %s2774_s30  ;;  %p47_p0 = scmp.ge.s32.totalorder %s46_s1, 2 }
  0x1b   : > { %s406_s21 = sadd.s32 1, %s2754_s26  ;;  %p416_p1 = scmp.ne.s32.totalorder %s2754_s26, %s2750_s25 }
  0x1c   : > { %p417_p2 = scmp.eq.s32.totalorder %s2209_s18, 3  ;;  %s3512_s1 = smov (%p47_p0, %s46_s1), 0 }
  0x1d   : > { %3476 = sst [smem:[#allocation25_spill]] %s3512_s1  ;;  %s3514_s20 = smov (!%p47_p0, %s49_s20), %s2770_s0 }
  0x1e   : > { %s402_s22 = ssub.s32 %s2766_s29, %s3512_s1  ;;  %p2942_p3 = por %p417_p2, %p416_p1 }
  0x1f   : > { %p51_p4 = scmp.ge.s32.totalorder %s3514_s20, 2  ;;  %p422_p5 = scmp.ne.s32.totalorder %s2750_s25, %s2746_s24 }
  0x20   : > { %s3477_s23 = scalar_select %p2942_p3, 1, 0 }
  0x21   : > { %p423_p6 = scmp.eq.s32.totalorder %s2210_s19, 3  ;;  %p2211_p7 = scmp.ge.s32.totalorder %s2774_s30, 1 }
  0x22   : > { %3478 = sst [smem:[#allocation26_spill]] %s3477_s23  ;;  %s3516_s20 = smov (%p51_p4, %s3514_s20), 0 }
  0x23   : > { %3479 = sst [smem:[#allocation27_spill]] %s3516_s20  ;;  %p2951_p8 = por %p423_p6, %p422_p5 }
  0x24   : > { %p458_p9 = scmp.lt.s32.totalorder %s2774_s30, 5  ;;  %s401_s17 = ssub.s32 %s2770_s0, %s3516_s20 }
  0x25   : > { %s3480_s16 = scalar_select %p2951_p8, 1, 0 }
  0x26   : > { %s403_s15 = sor.u32 %s402_s22, %s401_s17  ;;  %p2958_p10 = pnand %p2211_p7, %p458_p9 }
  0x27   : > { %3481 = sst [smem:[#allocation28_spill]] %s3480_s16  ;;  %p404_p11 = scmp.eq.s32.totalorder %s403_s15, 0 }
  0x28   : > { %p2962_p12 = scmp.eq.s32.totalorder %s2209_s18, 0  ;;  %p2372_p13 = pneg %p2958_p10 }
  0x29   : > { %s2969_s19 = scalar_select %p404_p11, %s2754_s26, %s406_s21  }
  0x2a   : > { %p2973_p0 = pnand %p2962_p12, %p2372_p13  ;;  %s3486_s4 = sld [smem:[#allocation34_spill]] }
  0x2b   : > { %3484 = sst [smem:[#allocation29_spill]] %s2969_s19  ;;  %s2776_s18 = smov [#allocation7]  }
  0x2c   : > { %s488_s20 = sshll.u32 %s2776_s18, 4  ;;  %s2777_s0 = smov 64   ;;  %s489_s20 = int_to_ptr.vmem [resolvable:$true] %s488_s20 }
  0x2d   : > { %s2778_s24 = smov 4   ;;  %s3487_s2 = sld [smem:[#allocation32_spill]] }
  0x2e   : > { %s2779_s30 = smov [#allocation4]   ;;  %s503_s23 = sshll.u32 %s3434_s6, 4  ;;  %s504_s23 = int_to_ptr.hbm [resolvable:$true] %s503_s23 }
  0x2f   : > { %s471_s17 = sshll.u32 %s2779_s30, 4  ;;  %s2780_s18 = smov [#allocation9]   ;;  %s472_s17 = int_to_ptr.vmem [resolvable:$true] %s471_s17 }
  0x30   : > { %s486_s15 = sshll.u32 %s3486_s4, 4  ;;  %s505_s13 = sshll.u32 %s2780_s18, 4  ;;  %s487_s15 = int_to_ptr.hbm [resolvable:$true] %s486_s15  ;;  %s506_s13 = int_to_ptr.vmem [resolvable:$true] %s505_s13 }
  0x31   : > { %2378 = dma.hbm_to_vmem [thread:$0]  (!%p2973_p0), %s487_s15, 256, %s489_s20, [#allocation8], %s2777_s0, %s2777_s0, %s2778_s24  }
  0x32   : > { %s532_s15 = sshll.u32 %s3440_s12, 4  ;;  %s2781_s19 = smov [#allocation10]   ;;  %s533_s15 = int_to_ptr.hbm [resolvable:$true] %s532_s15 }
  0x33   : > { %s469_s26 = sshll.u32 %s3487_s2, 4  ;;  %s534_s30 = sshll.u32 %s2781_s19, 4  ;;  %s470_s26 = int_to_ptr.hbm [resolvable:$true] %s469_s26  ;;  %s535_s30 = int_to_ptr.vmem [resolvable:$true] %s534_s30 }
  0x34   : > { %2375 = dma.hbm_to_vmem [thread:$0]  (!%p2973_p0), %s470_s26, 256, %s472_s17, [#allocation5], %s2777_s0, %s2777_s0, %s2778_s24  }
  0x35   : > { %2381 = dma.hbm_to_vmem [thread:$0]  (!%p2973_p0), %s504_s23, 256, %s506_s13, [#allocation8], %s2777_s0, %s2777_s0, %s2778_s24  }
  0x36   : > { %2384 = dma.hbm_to_vmem [thread:$0]  (!%p2973_p0), %s533_s15, 256, %s535_s30, [#allocation11], %s2777_s0, %s2777_s0, %s2778_s24  }
  0x37   : > { %578 = sbr.rel (%p2958_p10) target bundleno = 2429 (0x97d), region = 84 }
  0x3c   : > { %2725 = dma.done.wait (%p2962_p12), [#allocation5], 256  }
  0x3d   : > { %2727 = vsyncadd (%p2962_p12), [#allocation5], 4294967040 }
  0x3e   : > { %2729 = dma.done.wait (%p2962_p12), [#allocation8], 512  }
  0x3f   : > { %2731 = vsyncadd (%p2962_p12), [#allocation8], 4294966784 }
  0x40   : > { %2733 = dma.done.wait (%p2962_p12), [#allocation11], 256  }
  0x41   : > { %2735 = vsyncadd (%p2962_p12), [#allocation11], 4294967040  ;;  %s3012_s4 = sand.u32 1, %s2750_s25   ;;  %p659_p1 = scmp.lt.s32.totalorder %s2762_s28, 1  ;;  %v3027_v0 = vld [vmem:[%s3436_s8] sm:$0x1] }
  0x42   : > { %s2222_s13 = sshll.u32 %s3012_s4, 3  ;;  %s2223_s14 = sshll.u32 %s3012_s4, 4  ;;  %v3032_v1 = vld [vmem:[%s3437_s9] sm:$0x1] }
  0x43   : > { %s660_s16 = scalar_select %p659_p1, %s2762_s28, 1  ;;  %v3037_v2 = vld [vmem:[%s3438_s10] sm:$0x1] }
  0x44   : > { %p666_p2 = scmp.lt.s32.totalorder %s2758_s27, 1  ;;  %s3488_s1 = sld [smem:[#allocation30_spill]]  ;;  %v3042_v3 = vld [vmem:[%s3439_s11] sm:$0x1] }
  0x45   : > { %s2331_s24 = sshll.u32 %s660_s16, 4  ;;  %s2226_s23 = sshll.u32 %s660_s16, 1 }
  0x46   : > { %s667_s16 = scalar_select %p666_p2, %s2758_s27, 1 }
  0x47   : > { %s3489_s21 = sld [smem:[#allocation31_spill]]  ;;  %s3050_s22 = scalar_lea.vmem [#allocation12], %s2222_s13 }
  0x48   : > { %s3052_s18 = scalar_lea.vmem [#allocation13], %s2223_s14  ;;  %p2228_p4 = scmp.ne.s32.totalorder %s2758_s27, 0 }
  0x49   : > { %s3490_s5 = sld [smem:[#allocation35_spill]] (!%p2228_p4)  ;;  %s2782_s13 = smov (!%p2228_p4), 104  }
  0x4a   : > { %s3022_s29 = scalar_lea.vmem %s3488_s1, %s2331_s24  ;;  %s669_s24 = sadd.s32 %s2226_s23, %s667_s16 }
  0x4b   : > { %s2227_s26 = sshll.u32 %s669_s24, 2  ;;  %680 = sbr.rel (%p2228_p4) target bundleno = 497 (0x1f1), region = 104 }
  0x4c   : > { %s2783_s14 = smov (!%p2228_p4), 112   ;;  %s2784_s15 = smov (!%p2228_p4), 120  }
  0x4d   : > { %s3048_s17 = scalar_lea.vmem %s3489_s21, %s2227_s26  ;;  %s2785_s19 = smov (!%p2228_p4), 96  }
  0x50   : > { %v2333_v4 = vld [vmem:[#allocation7 + $0x8] sm:$0xff]  ;;  %v2332_v5 = vld [vmem:[#allocation7] sm:$0xff]  ;;  %v681_v6 = vld [vmem:[%s3022_s29] sm:$0xff]  ;;  %vm704_vm0 = vcmask 261120   ;;  %v2786_v17 = vmov 1983009808  }
  0x51   : > { %714 = vmatpush.bf16.msra.mxu0 %v2333_v4  ;;  %v682_v7 = vld [vmem:[%s3022_s29 + $0x8] sm:$0xff]  ;;  %v2489_v9 = vld [vmem:[%s3490_s5] ss:$0 sm:$0xff]  ;;  %v764_v18 = vunpack.c.l.s4 %v2786_v17  ;;  %v2787_v21 = vmov 1934713408   ;;  %vm773_vm1 = vcmask 1047556  }
  0x52   : > { %v683_v8 = vpack.c.bf16 %v682_v7, %v681_v6  ;;  %v778_v22 = vunpack.c.l.s4 %v2787_v21  ;;  %vm975_vm2 = vcmask 60416  }
  0x53   : > { %v3070_v19 = vunpack.c.0.s8 %v764_v18 }
  0x54   : > { %v3077_v32 = vunpack.c.0.s8 %v778_v22 }
  0x55   : > { %715 = vmatpush.bf16.msra.mxu0 %v2332_v5 }
  0x58   : > { %2237 = vmatmul.msk.bf16.vlgmr.msra.gmra.mxu0 %vm704_vm0, %v683_v8 }
  0xd5   : > { %v717_v10 = vpop.f32.mrf.mxu0 }
  0xd6   : > { %v718_v11 = vadd.f32 %v2489_v9, %v717_v10 }
  0xd8   : > { %v722_v12 = vpack.c.bf16 %v718_v11, %v718_v11 }
  0xda   : > { %734 = vrot.lane.b32.xlu2 %v722_v12, %s2782_s13  ;;  %730 = vrot.lane.b32.xlu1 %v722_v12, %s2783_s14  ;;  %v741_v28 = vshrl.u32 %v722_v12, 16 }
  0xdb   : > { %726 = vrot.lane.b32.xlu0 %v722_v12, %s2784_s15 }
  0xdd   : > { %v719_v13 = vpop.f32.mrf.mxu0 }
  0xde   : > { %v720_v14 = vadd.f32 %v2489_v9, %v719_v13 }
  0xe0   : > { %v3060_v15 = vpack.c.bf16 %v720_v14, %v720_v14 }
  0xe2   : > { %736 = vrot.lane.b32.xlu2 %v3060_v15, %s2782_s13  ;;  %732 = vrot.lane.b32.xlu1 %v3060_v15, %s2783_s14  ;;  %v753_v61 = vshrl.u32 %v3060_v15, 16 }
  0xe3   : > { %728 = vrot.lane.b32.xlu0 %v3060_v15, %s2784_s15 }
  0xea   : > { %986 = vrot.lane.b32.xlu1 %v3060_v15, %s2785_s19 }
  0xeb   : > { %984 = vrot.lane.b32.xlu0 %v722_v12, %s2785_s19 }
 0x134   : > { %v3068_v16 = vpop.permute.xlu2 %734 }
 0x135   : > { %v748_v23 = vshrl.u32 %v3068_v16, 16 }
 0x13c   : > { %v737_v35 = vpop.permute.xlu2 %736 }
 0x13d   : > { %v760_v42 = vshrl.u32 %v737_v35, 16 }
 0x14c   : > { %v731_v20 = vpop.permute.xlu1 %730 }
 0x14d   : > { %v746_v24 = vpack.i.b16 %v3068_v16, %v731_v20  ;;  %v747_v25 = vshrl.u32 %v731_v20, 16  ;;  %v727_v26 = vpop.permute.xlu0 %726  ;;  %992 = vrot.lane.b32.xlu1 %v731_v20, %s2785_s19 }
 0x14e   : > { %v740_v27 = vpack.i.b16 %v727_v26, %v722_v12  ;;  %v742_v29 = vshrl.u32 %v727_v26, 16  ;;  %988 = vrot.lane.b32.xlu2 %v727_v26, %s2785_s19 }
 0x14f   : > { %v749_v30 = vpack.i.b16 %v748_v23, %v747_v25  ;;  %v771_v31 = vperm.slane %v746_v24, %v3070_v19 }
 0x150   : > { %v743_v33 = vpack.i.b16 %v742_v29, %v741_v28  ;;  %v766_v34 = vperm.slane %v740_v27, %v3070_v19 }
 0x151   : > { %v772_v36 = vrot.slane %v771_v31, 4  ;;  %v798_v37 = vperm.slane %v749_v30, %v3070_v19 }
 0x152   : > { %v775_v38 = vrot.slane %v766_v34, 4  ;;  %v793_v39 = vperm.slane %v743_v33, %v3070_v19 }
 0x153   : > { %v799_v40 = vrot.slane %v798_v37, 4  ;;  %v774_v41 = vsel %vm773_vm1, %v772_v36, %v766_v34 }
 0x154   : > { %v776_v43 = vsel %vm773_vm1, %v771_v31, %v775_v38  ;;  %v780_v44 = vperm.slane %v774_v41, %v3077_v32  ;;  %v801_v45 = vrot.slane %v793_v39, 4  ;;  %v733_v46 = vpop.permute.xlu1 %732 }
 0x155   : > { %v784_v47 = vperm.slane %v776_v43, %v3077_v32  ;;  %v800_v48 = vsel %vm773_vm1, %v799_v40, %v793_v39  ;;  %v758_v49 = vpack.i.b16 %v737_v35, %v733_v46  ;;  %v759_v50 = vshrl.u32 %v733_v46, 16  ;;  %v729_v51 = vpop.permute.xlu0 %728  ;;  %998 = vrot.lane.b32.xlu1 %v737_v35, %s2785_s19 }
 0x156   : > { %v785_v52 = vrot.slane %v780_v44, 4  ;;  %v802_v53 = vsel %vm773_vm1, %v798_v37, %v801_v45  ;;  %v806_v54 = vperm.slane %v800_v48, %v3077_v32  ;;  %v752_v55 = vpack.i.b16 %v729_v51, %v3060_v15  ;;  %994 = vrot.lane.b32.xlu2 %v733_v46, %s2785_s19  ;;  %990 = vrot.lane.b32.xlu0 %v729_v51, %s2785_s19 }
 0x157   : > { %v787_v56 = vrot.slane %v784_v47, 4  ;;  %v810_v57 = vperm.slane %v802_v53, %v3077_v32  ;;  %v761_v58 = vpack.i.b16 %v760_v42, %v759_v50  ;;  %v824_v59 = vperm.slane %v758_v49, %v3070_v19 }
 0x158   : > { %v811_v60 = vrot.slane %v806_v54, 4  ;;  %v754_v62 = vshrl.u32 %v729_v51, 16  ;;  %v819_v6 = vperm.slane %v752_v55, %v3070_v19  ;;  %v786_v7 = vsel %vm773_vm1, 0, %v785_v52 }
 0x159   : > { %v788_v63 = vsel %vm773_vm1, 0, %v787_v56  ;;  %v813_v4 = vrot.slane %v810_v57, 4  ;;  %v825_v5 = vrot.slane %v824_v59, 4  ;;  %v850_v9 = vperm.slane %v761_v58, %v3070_v19 }
 0x15a   : > { %v872_v8 = vrot.slane %v788_v63, 4  ;;  %v867_v11 = vsel %vm773_vm1, %v787_v56, %v780_v44  ;;  %v755_v12 = vpack.i.b16 %v754_v62, %v753_v61  ;;  %v812_v14 = vsel %vm773_vm1, 0, %v811_v60 }
 0x15b   : > { %v814_v10 = vsel %vm773_vm1, 0, %v813_v4  ;;  %v826_v13 = vsel %vm773_vm1, %v825_v5, %v819_v6  ;;  %v851_v18 = vrot.slane %v850_v9, 4  ;;  %v827_v21 = vrot.slane %v819_v6, 4 }
 0x15c   : > { %v873_v15 = vsel %vm773_vm1, %v872_v8, %v786_v7  ;;  %v891_v17 = vrot.slane %v814_v10, 4  ;;  %v832_v22 = vperm.slane %v826_v13, %v3077_v32  ;;  %v845_v23 = vperm.slane %v755_v12, %v3070_v19 }
 0x15d   : > { %v877_v20 = vperm.slane %v873_v15, %v3070_v19  ;;  %v886_v24 = vsel %vm773_vm1, %v813_v4, %v806_v54  ;;  %v871_v26 = vperm.slane %v867_v11, %v3070_v19  ;;  %v828_v29 = vsel %vm773_vm1, %v824_v59, %v827_v21 }
 0x15e   : > { %v892_v25 = vsel %vm773_vm1, %v891_v17, %v812_v14  ;;  %996 = vrot.lane.b32.xlu0 %v3068_v16, %s2785_s19  ;;  %v836_v30 = vperm.slane %v828_v29, %v3077_v32  ;;  %v837_v31 = vrot.slane %v832_v22, 4  ;;  %v852_v33 = vsel %vm773_vm1, %v851_v18, %v845_v23 }
 0x15f   : > { %v878_v27 = vrot.slane %v877_v20, 4  ;;  %v896_v28 = vperm.slane %v892_v25, %v3070_v19  ;;  %v853_v34 = vrot.slane %v845_v23, 4  ;;  %v890_v36 = vperm.slane %v886_v24, %v3070_v19 }
 0x160   : > { %v858_v16 = vperm.slane %v852_v33, %v3077_v32  ;;  %v839_v39 = vrot.slane %v836_v30, 4  ;;  %v838_v45 = vsel %vm773_vm1, 0, %v837_v31  ;;  %v987_v33 = vpop.permute.xlu1 %986 }
 0x161   : > { %v879_v35 = vsel %vm773_vm1, %v878_v27, %v871_v26  ;;  %v897_v37 = vrot.slane %v896_v28, 4  ;;  %v854_v40 = vsel %vm773_vm1, %v850_v9, %v853_v34 }
 0x162   : > { %v883_v38 = vperm.slane %v879_v35, %v3077_v32  ;;  %v862_v42 = vperm.slane %v854_v40, %v3077_v32  ;;  %v840_v46 = vsel %vm773_vm1, 0, %v839_v39  ;;  %v863_v48 = vrot.slane %v858_v16, 4 }
 0x163   : > { %v898_v41 = vsel %vm773_vm1, %v897_v37, %v890_v36  ;;  %v910_v50 = vrot.slane %v840_v46, 4  ;;  %v905_v56 = vsel %vm773_vm1, %v839_v39, %v832_v22  ;;  %v985_v36 = vpop.permute.xlu0 %984 }
 0x164   : > { %v884_v43 = vrot.slane %v883_v38, 4  ;;  %v902_v44 = vperm.slane %v898_v41, %v3077_v32  ;;  %v947_v47 = vshrl.u32 %v883_v38, 16  ;;  %v865_v49 = vrot.slane %v862_v42, 4 }
 0x165   : > { %v911_v57 = vsel %vm773_vm1, %v910_v50, %v838_v45  ;;  %v864_v5 = vsel %vm773_vm1, 0, %v863_v48  ;;  %v909_v6 = vperm.slane %v905_v56, %v3070_v19  ;;  %v1003_v46 = vshrl.u32 %v985_v36, 16 }
 0x166   : > { %v885_v51 = vsel %vm773_vm1, 0, %v884_v43  ;;  %v903_v52 = vrot.slane %v902_v44, 4  ;;  %v945_v53 = vpack.i.b16 %v902_v44, %v883_v38  ;;  %v948_v54 = vshrl.u32 %v902_v44, 16 }
 0x167   : > { %v866_v55 = vsel %vm773_vm1, 0, %v865_v49  ;;  %v915_v60 = vperm.slane %v911_v57, %v3070_v19  ;;  %v955_v62 = vshrl.u32 %v885_v51, 16  ;;  %v924_v9 = vsel %vm773_vm1, %v865_v49, %v858_v16 }
 0x168   : > { %v904_v58 = vsel %vm773_vm1, 0, %v903_v52  ;;  %v949_v59 = vpack.i.b16 %v948_v54, %v947_v47  ;;  %976 = vst.msk [vmem:[#allocation2] sm:$0xf] %vm975_vm2, %v945_v53  ;;  %v929_v4 = vrot.slane %v866_v55, 4  ;;  %v928_v14 = vperm.slane %v924_v9, %v3070_v19 }
 0x169   : > { %v953_v61 = vpack.i.b16 %v904_v58, %v885_v51  ;;  %v956_v63 = vshrl.u32 %v904_v58, 16  ;;  %v916_v7 = vrot.slane %v915_v60, 4  ;;  %v1015_v43 = vshrl.u32 %v987_v33, 16 }
 0x16a   : > { %978 = vst.msk [vmem:[#allocation2 + $0x8] sm:$0xf] %vm975_vm2, %v949_v59  ;;  %v930_v10 = vsel %vm773_vm1, %v929_v4, %v864_v5 }
 0x16b   : > { %v957_v8 = vpack.i.b16 %v956_v63, %v955_v62  ;;  %980 = vst.msk [vmem:[#allocation2 + $0x10] sm:$0xf] %vm975_vm2, %v953_v61  ;;  %v917_v11 = vsel %vm773_vm1, %v916_v7, %v909_v6  ;;  %v934_v12 = vperm.slane %v930_v10, %v3070_v19 }
 0x16c   : > { %v921_v13 = vperm.slane %v917_v11, %v3077_v32 }
 0x16d   : > { %982 = vst.msk [vmem:[#allocation2 + $0x18] sm:$0xf] %vm975_vm2, %v957_v8  ;;  %v935_v15 = vrot.slane %v934_v12, 4 }
 0x16e   : > { %v922_v17 = vrot.slane %v921_v13, 4  ;;  %v963_v21 = vshrl.u32 %v921_v13, 16 }
 0x16f   : > { %v936_v18 = vsel %vm773_vm1, %v935_v15, %v928_v14 }
 0x170   : > { %v940_v20 = vperm.slane %v936_v18, %v3077_v32  ;;  %v923_v22 = vsel %vm773_vm1, 0, %v922_v17 }
 0x171   : > { %v971_v29 = vshrl.u32 %v923_v22, 16 }
 0x172   : > { %v941_v23 = vrot.slane %v940_v20, 4  ;;  %v961_v24 = vpack.i.b16 %v940_v20, %v921_v13  ;;  %v964_v25 = vshrl.u32 %v940_v20, 16 }
 0x174   : > { %v942_v26 = vsel %vm773_vm1, 0, %v941_v23  ;;  %v965_v27 = vpack.i.b16 %v964_v25, %v963_v21  ;;  %977 = vst.msk [vmem:[#allocation2 + $0x4] sm:$0xf] %vm975_vm2, %v961_v24 }
 0x175   : > { %v969_v28 = vpack.i.b16 %v942_v26, %v923_v22  ;;  %v972_v30 = vshrl.u32 %v942_v26, 16 }
 0x176   : > { %979 = vst.msk [vmem:[#allocation2 + $0xc] sm:$0xf] %vm975_vm2, %v965_v27 }
 0x177   : > { %v973_v31 = vpack.i.b16 %v972_v30, %v971_v29  ;;  %981 = vst.msk [vmem:[#allocation2 + $0x14] sm:$0xf] %vm975_vm2, %v969_v28 }
 0x179   : > { %983 = vst.msk [vmem:[#allocation2 + $0x1c] sm:$0xf] %vm975_vm2, %v973_v31 }
 0x1a8   : > { %v989_v34 = vpop.permute.xlu2 %988 }
 0x1a9   : > { %v1004_v38 = vshrl.u32 %v989_v34, 16  ;;  %v1002_v51 = vpack.i.b16 %v989_v34, %v985_v36 }
 0x1ab   : > { %v1005_v52 = vpack.i.b16 %v1004_v38, %v1003_v46  ;;  %v1028_v62 = vperm.slane %v1002_v51, %v3070_v19 }
 0x1ad   : > { %v1054_v63 = vperm.slane %v1005_v52, %v3070_v19  ;;  %v1036_v18 = vrot.slane %v1028_v62, 4 }
 0x1af   : > { %v1062_v23 = vrot.slane %v1054_v63, 4 }
 0x1b0   : > { %v995_v37 = vpop.permute.xlu2 %994 }
 0x1b1   : > { %v1021_v39 = vshrl.u32 %v995_v37, 16 }
 0x1bf   : > { %v993_v35 = vpop.permute.xlu1 %992 }
 0x1c0   : > { %v1009_v11 = vshrl.u32 %v993_v35, 16 }
 0x1c7   : > { %v999_v16 = vpop.permute.xlu1 %998 }
 0x1c8   : > { %v1020_v40 = vpack.i.b16 %v999_v16, %v995_v37  ;;  %v1022_v41 = vshrl.u32 %v999_v16, 16  ;;  %v991_v42 = vpop.permute.xlu0 %990 }
 0x1c9   : > { %v1014_v44 = vpack.i.b16 %v991_v42, %v987_v33  ;;  %v1016_v45 = vshrl.u32 %v991_v42, 16 }
 0x1ca   : > { %v1023_v47 = vpack.i.b16 %v1022_v41, %v1021_v39  ;;  %v1085_v48 = vperm.slane %v1020_v40, %v3070_v19 }
 0x1cb   : > { %v1017_v49 = vpack.i.b16 %v1016_v45, %v1015_v43  ;;  %v1080_v50 = vperm.slane %v1014_v44, %v3070_v19 }
 0x1cc   : > { %v1086_v53 = vrot.slane %v1085_v48, 4  ;;  %v1111_v54 = vperm.slane %v1023_v47, %v3070_v19 }
 0x1cd   : > { %v1088_v55 = vrot.slane %v1080_v50, 4  ;;  %v1106_v56 = vperm.slane %v1017_v49, %v3070_v19 }
 0x1ce   : > { %v1112_v57 = vrot.slane %v1111_v54, 4  ;;  %v1087_v58 = vsel %vm773_vm1, %v1086_v53, %v1080_v50 }
 0x1cf   : > { %v1089_v59 = vsel %vm773_vm1, %v1085_v48, %v1088_v55  ;;  %v1093_v60 = vperm.slane %v1087_v58, %v3077_v32  ;;  %v1114_v61 = vrot.slane %v1106_v56, 4 }
 0x1d0   : > { %v1097_v4 = vperm.slane %v1089_v59, %v3077_v32  ;;  %v1113_v5 = vsel %vm773_vm1, %v1112_v57, %v1106_v56  ;;  %v997_v6 = vpop.permute.xlu0 %996 }
 0x1d1   : > { %v1098_v7 = vrot.slane %v1093_v60, 4  ;;  %v1115_v8 = vsel %vm773_vm1, %v1111_v54, %v1114_v61  ;;  %v1119_v9 = vperm.slane %v1113_v5, %v3077_v32  ;;  %v1008_v10 = vpack.i.b16 %v997_v6, %v993_v35 }
 0x1d2   : > { %v1100_v12 = vrot.slane %v1097_v4, 4  ;;  %v1123_v13 = vperm.slane %v1115_v8, %v3077_v32  ;;  %v1010_v14 = vshrl.u32 %v997_v6, 16 }
 0x1d3   : > { %v1124_v15 = vrot.slane %v1119_v9, 4  ;;  %v1033_v17 = vperm.slane %v1008_v10, %v3070_v19  ;;  %v1099_v24 = vsel %vm773_vm1, 0, %v1098_v7 }
 0x1d4   : > { %v1101_v20 = vsel %vm773_vm1, 0, %v1100_v12  ;;  %v1126_v21 = vrot.slane %v1123_v13, 4  ;;  %v1011_v22 = vpack.i.b16 %v1010_v14, %v1009_v11  ;;  %v1166_v28 = vsel %vm773_vm1, %v1100_v12, %v1093_v60 }
 0x1d5   : > { %v1171_v25 = vrot.slane %v1101_v20, 4  ;;  %v1034_v26 = vrot.slane %v1033_v17, 4  ;;  %v1037_v29 = vsel %vm773_vm1, %v1033_v17, %v1036_v18  ;;  %v1125_v31 = vsel %vm773_vm1, 0, %v1124_v15 }
 0x1d6   : > { %v1127_v27 = vsel %vm773_vm1, 0, %v1126_v21  ;;  %v1059_v30 = vperm.slane %v1011_v22, %v3070_v19  ;;  %v1045_v16 = vperm.slane %v1037_v29, %v3077_v32  ;;  %v1170_v39 = vperm.slane %v1166_v28, %v3070_v19 }
 0x1d7   : > { %v1172_v33 = vsel %vm773_vm1, %v1171_v25, %v1099_v24  ;;  %v1190_v34 = vrot.slane %v1127_v27, 4  ;;  %v1035_v35 = vsel %vm773_vm1, %v1034_v26, %v1028_v62  ;;  %v1185_v40 = vsel %vm773_vm1, %v1126_v21, %v1119_v9 }
 0x1d8   : > { %v1176_v36 = vperm.slane %v1172_v33, %v3070_v19  ;;  %v1041_v37 = vperm.slane %v1035_v35, %v3077_v32  ;;  %v1060_v38 = vrot.slane %v1059_v30, 4  ;;  %v1063_v42 = vsel %vm773_vm1, %v1059_v30, %v1062_v23 }
 0x1d9   : > { %v1191_v41 = vsel %vm773_vm1, %v1190_v34, %v1125_v31  ;;  %v1048_v46 = vrot.slane %v1045_v16, 4  ;;  %v1071_v48 = vperm.slane %v1063_v42, %v3077_v32  ;;  %v1189_v50 = vperm.slane %v1185_v40, %v3070_v19 }
 0x1da   : > { %v1177_v43 = vrot.slane %v1176_v36, 4  ;;  %v1195_v44 = vperm.slane %v1191_v41, %v3070_v19  ;;  %v1046_v45 = vrot.slane %v1041_v37, 4  ;;  %v1061_v47 = vsel %vm773_vm1, %v1060_v38, %v1054_v63 }
 0x1db   : > { %v1049_v52 = vsel %vm773_vm1, 0, %v1048_v46  ;;  %v1067_v55 = vperm.slane %v1061_v47, %v3077_v32  ;;  %v1074_v56 = vrot.slane %v1071_v48, 4  ;;  %v1128_v4 = vsel %vm773_vm1, %v1048_v46, %v1041_v37 }
 0x1dc   : > { %v1178_v49 = vsel %vm773_vm1, %v1177_v43, %v1170_v39  ;;  %v1196_v51 = vrot.slane %v1195_v44, 4  ;;  %v1047_v54 = vsel %vm773_vm1, 0, %v1046_v45  ;;  %v1133_v58 = vrot.slane %v1049_v52, 4 }
 0x1dd   : > { %v1182_v53 = vperm.slane %v1178_v49, %v3077_v32  ;;  %v1072_v61 = vrot.slane %v1067_v55, 4  ;;  %v1075_v63 = vsel %vm773_vm1, 0, %v1074_v56  ;;  %v1132_v14 = vperm.slane %v1128_v4, %v3070_v19 }
 0x1de   : > { %v1197_v57 = vsel %vm773_vm1, %v1196_v51, %v1189_v50  ;;  %v1134_v5 = vsel %vm773_vm1, %v1133_v58, %v1047_v54  ;;  %v1152_v15 = vrot.slane %v1075_v63, 4  ;;  %v1147_v22 = vsel %vm773_vm1, %v1074_v56, %v1067_v55 }
 0x1df   : > { %v1183_v59 = vrot.slane %v1182_v53, 4  ;;  %v1201_v60 = vperm.slane %v1197_v57, %v3077_v32  ;;  %v1224_v62 = vshrl.u32 %v1182_v53, 16  ;;  %v1073_v10 = vsel %vm773_vm1, 0, %v1072_v61 }
 0x1e0   : > { %v1138_v11 = vperm.slane %v1134_v5, %v3070_v19  ;;  %v1153_v23 = vsel %vm773_vm1, %v1152_v15, %v1073_v10  ;;  %v1151_v28 = vperm.slane %v1147_v22, %v3070_v19 }
 0x1e1   : > { %v1184_v6 = vsel %vm773_vm1, 0, %v1183_v59  ;;  %v1202_v7 = vrot.slane %v1201_v60, 4  ;;  %v1222_v8 = vpack.i.b16 %v1201_v60, %v1182_v53  ;;  %v1225_v9 = vshrl.u32 %v1201_v60, 16 }
 0x1e2   : > { %v1232_v18 = vshrl.u32 %v1184_v6, 16  ;;  %v1139_v21 = vrot.slane %v1138_v11, 4  ;;  %v1157_v26 = vperm.slane %v1153_v23, %v3070_v19 }
 0x1e3   : > { %v1203_v12 = vsel %vm773_vm1, 0, %v1202_v7  ;;  %v1226_v13 = vpack.i.b16 %v1225_v9, %v1224_v62  ;;  %1237 = vst.msk [vmem:[#allocation3 + $0x4] sm:$0xf] %vm975_vm2, %v1222_v8 }
 0x1e4   : > { %v1230_v17 = vpack.i.b16 %v1203_v12, %v1184_v6  ;;  %v1233_v20 = vshrl.u32 %v1203_v12, 16  ;;  %v1140_v25 = vsel %vm773_vm1, %v1139_v21, %v1132_v14  ;;  %v1158_v29 = vrot.slane %v1157_v26, 4 }
 0x1e5   : > { %1239 = vst.msk [vmem:[#allocation3 + $0xc] sm:$0xf] %vm975_vm2, %v1226_v13  ;;  %v1144_v27 = vperm.slane %v1140_v25, %v3077_v32 }
 0x1e6   : > { %v1234_v24 = vpack.i.b16 %v1233_v20, %v1232_v18  ;;  %1241 = vst.msk [vmem:[#allocation3 + $0x14] sm:$0xf] %vm975_vm2, %v1230_v17  ;;  %v1159_v31 = vsel %vm773_vm1, %v1158_v29, %v1151_v28 }
 0x1e7   : > { %v1145_v30 = vrot.slane %v1144_v27, 4  ;;  %v1163_v33 = vperm.slane %v1159_v31, %v3077_v32  ;;  %v1208_v34 = vshrl.u32 %v1144_v27, 16 }
 0x1e8   : > { %1243 = vst.msk [vmem:[#allocation3 + $0x1c] sm:$0xf] %vm975_vm2, %v1234_v24 }
 0x1e9   : > { %v1146_v35 = vsel %vm773_vm1, 0, %v1145_v30  ;;  %v1164_v36 = vrot.slane %v1163_v33, 4  ;;  %v1206_v37 = vpack.i.b16 %v1163_v33, %v1144_v27  ;;  %v1209_v16 = vshrl.u32 %v1163_v33, 16 }
 0x1ea   : > { %v1216_v41 = vshrl.u32 %v1146_v35, 16 }
 0x1eb   : > { %v1165_v38 = vsel %vm773_vm1, 0, %v1164_v36  ;;  %v1210_v39 = vpack.i.b16 %v1209_v16, %v1208_v34  ;;  %1236 = vst.msk [vmem:[#allocation3] sm:$0xf] %vm975_vm2, %v1206_v37 }
 0x1ec   : > { %v1214_v40 = vpack.i.b16 %v1165_v38, %v1146_v35  ;;  %v1217_v19 = vshrl.u32 %v1165_v38, 16 }
 0x1ed   : > { %1238 = vst.msk [vmem:[#allocation3 + $0x8] sm:$0xf] %vm975_vm2, %v1210_v39 }
 0x1ee   : > { %v1218_v42 = vpack.i.b16 %v1217_v19, %v1216_v41  ;;  %1240 = vst.msk [vmem:[#allocation3 + $0x10] sm:$0xf] %vm975_vm2, %v1214_v40 }
 0x1f0   : > { %1242 = vst.msk [vmem:[#allocation3 + $0x18] sm:$0xf] %vm975_vm2, %v1218_v42 }
 0x1f1 PF: > { %v2335_v32 = vld [vmem:[#allocation4 + $0x8] sm:$0xff]  ;;  %s2238_s30 = sshll.u32 %s2758_s27, 3  ;;  %v2334_v43 = vld [vmem:[#allocation4] sm:$0xff]  ;;  %vm1268_vm3 = vcmask 261120   ;;  %s3491_s3 = sld [smem:[#allocation33_spill]]  ;;  %vm1423_vm4 = vcmask 64512  }
 0x1f2   : > { %s1245_s16 = scalar_lea.vmem %s3022_s29, %s2238_s30  ;;  %1278 = vmatpush.bf16.msra.mxu0 %v2335_v32  ;;  %s2788_s0 = smov 104   ;;  %v2336_v51 = vld [vmem:[#allocation2] sm:$0xff]  ;;  %v2337_v52 = vld [vmem:[#allocation2 + $0x8] sm:$0xff]  ;;  %v2338_v53 = vld [vmem:[#allocation2 + $0x10] sm:$0xff]  ;;  %v2791_v59 = vmov 1983009808  }
 0x1f3   : > { %v3223_v44 = vld [vmem:[%s1245_s16] sm:$0xff]  ;;  %s2789_s29 = smov 120   ;;  %s2790_s1 = smov 112   ;;  %v2339_v54 = vld [vmem:[#allocation2 + $0x18] sm:$0xff]  ;;  %v1428_v55 = vsel %vm1423_vm4, %v2336_v51, 0  ;;  %v1452_v56 = vsel %vm1423_vm4, %v2337_v52, 0  ;;  %v1307_v60 = vunpack.c.l.s4 %v2791_v59 }
 0x1f4   : > { %v1247_v45 = vpack.c.bf16 %v3223_v44, %v3223_v44  ;;  %v1476_v57 = vsel %vm1423_vm4, %v2338_v53, 0  ;;  %1437 = vmatpush.bf16.xpose.msra.mxu1 %v1428_v55  ;;  %1461 = vmatpush.bf16.xpose.msra.mxu2 %v1452_v56  ;;  %v1500_v58 = vsel %vm1423_vm4, %v2339_v54, 0  ;;  %v2792_v8 = vmov 1934713408   ;;  %s2793_s21 = smov 8   ;;  %s2795_s23 = smov 24  }
 0x1f5   : > { %1485 = vmatpush.bf16.xpose.msra.mxu3 %v1476_v57  ;;  %v3235_v63 = vunpack.c.0.s8 %v1307_v60  ;;  %v1321_v9 = vunpack.c.l.s4 %v2792_v8  ;;  %vm1316_vm5 = vcmask 1047556   ;;  %vm1515_vm6 = vcmask 130048   ;;  %s3492_s19 = sld [smem:[#allocation37_spill]]  ;;  %s2327_s15 = sshll.u32 %s2762_s28, 3 }
 0x1f6   : > { %1279 = vmatpush.bf16.msra.mxu0 %v2334_v43  ;;  %vm1564_vm7 = vcmask 125952   ;;  %vm1800_vm8 = vcmask 195584   ;;  %vm1951_vm13 = vcmask 523264   ;;  %s3494_s13 = sld [smem:[#allocation38_spill]]  ;;  %s2032_s30 = sadd.s32 %s2758_s27, %s2327_s15 }
 0x1f7   : > { %v2490_v46 = vld [vmem:[%s3491_s3] ss:$0 sm:$0xff]  ;;  %v3239_v17 = vunpack.c.0.s8 %v1321_v9  ;;  %s2328_s16 = sshll.u32 %s2032_s30, 2 }
 0x1f9   : > { %2247 = vmatmul.msk.bf16.vlgmr.msra.gmra.mxu0 %vm1268_vm3, %v1247_v45 }
 0x1fa   : > { %1509 = vmatpush.bf16.xpose.msrb.mxu0 %v1500_v58 }
 0x276   : > { %v1281_v47 = vpop.f32.mrf.mxu0 }
 0x277   : > { %v1282_v48 = vadd.f32 %v2490_v46, %v1281_v47 }
 0x279   : > { %v1285_v49 = vpack.c.bf16 %v1282_v48, %v1282_v48 }
 0x27b   : > { %1291 = vrot.lane.b32.xlu1 %v1285_v49, %s2788_s0  ;;  %1287 = vrot.lane.b32.xlu0 %v1285_v49, %s2789_s29  ;;  %v1296_v5 = vshrl.u32 %v1285_v49, 16  ;;  %s3496_s0 = sld [smem:[#allocation40_spill]] }
 0x27e   : > { %v1283_v50 = vpop.f32.mrf.mxu0 }
 0x281   : > { %s2034_s29 = scalar_lea.hbm %s3496_s0, %s2328_s16 }
 0x283   : > { %1289 = vrot.lane.b32.xlu0 %v1285_v49, %s2790_s1  ;;  %s3497_s1 = smov %s3496_s0 }
 0x284   : > { %s2656_s15 = scalar_lea.hbm %s3497_s1, 64 }
 0x2ed   : > { %v1288_v61 = vpop.permute.xlu0 %1287  ;;  %v1292_v7 = vpop.permute.xlu1 %1291 }
 0x2ee   : > { %v1297_v62 = vshrl.u32 %v1288_v61, 16  ;;  %v1295_v4 = vpack.i.b16 %v1288_v61, %v1285_v49  ;;  %v1303_v12 = vshrl.u32 %v1292_v7, 16 }
 0x2f0   : > { %v1298_v6 = vpack.i.b16 %v1297_v62, %v1296_v5  ;;  %v1309_v10 = vperm.slane %v1295_v4, %v3235_v63 }
 0x2f2   : > { %v1336_v13 = vperm.slane %v1298_v6, %v3235_v63  ;;  %v1318_v18 = vrot.slane %v1309_v10, 4 }
 0x2f4   : > { %v1344_v22 = vrot.slane %v1336_v13, 4 }
 0x2f5   : > { %v1290_v11 = vpop.permute.xlu0 %1289 }
 0x2f6   : > { %v1301_v14 = vpack.i.b16 %v1292_v7, %v1290_v11  ;;  %v1302_v15 = vshrl.u32 %v1290_v11, 16  ;;  %v1408_v11 = vld [vmem:[%s3048_s17] sm:$0xf]  ;;  %s2794_s17 = smov 16  }
 0x2f8   : > { %v1304_v20 = vpack.i.b16 %v1303_v12, %v1302_v15  ;;  %v1314_v21 = vperm.slane %v1301_v14, %v3235_v63  ;;  %v1409_v12 = vunpack.c.l.bf16 %v1408_v11 }
 0x2fa   : > { %v1315_v23 = vrot.slane %v1314_v21, 4  ;;  %v1319_v24 = vsel %vm1316_vm5, %v1314_v21, %v1318_v18  ;;  %v1341_v25 = vperm.slane %v1304_v20, %v3235_v63 }
 0x2fb   : > { %v1327_v26 = vperm.slane %v1319_v24, %v3239_v17 }
 0x2fc   : > { %v1317_v27 = vsel %vm1316_vm5, %v1315_v23, %v1309_v10  ;;  %v1342_v28 = vrot.slane %v1341_v25, 4  ;;  %v1345_v29 = vsel %vm1316_vm5, %v1341_v25, %v1344_v22 }
 0x2fd   : > { %v1323_v30 = vperm.slane %v1317_v27, %v3239_v17  ;;  %v1330_v31 = vrot.slane %v1327_v26, 4  ;;  %v1353_v33 = vperm.slane %v1345_v29, %v3239_v17 }
 0x2fe   : > { %v1343_v34 = vsel %vm1316_vm5, %v1342_v28, %v1336_v13 }
 0x2ff   : > { %v1328_v35 = vrot.slane %v1323_v30, 4  ;;  %v1331_v36 = vsel %vm1316_vm5, 0, %v1330_v31  ;;  %v1349_v37 = vperm.slane %v1343_v34, %v3239_v17  ;;  %v1356_v16 = vrot.slane %v1353_v33, 4 }
 0x300   : > { %v1363_v38 = vrot.slane %v1331_v36, 4  ;;  %v1358_v19 = vsel %vm1316_vm5, %v1330_v31, %v1323_v30 }
 0x301   : > { %v1329_v39 = vsel %vm1316_vm5, 0, %v1328_v35  ;;  %v1354_v40 = vrot.slane %v1349_v37, 4  ;;  %v1357_v41 = vsel %vm1316_vm5, 0, %v1356_v16  ;;  %v1377_v46 = vsel %vm1316_vm5, %v1356_v16, %v1349_v37 }
 0x302   : > { %v1382_v42 = vrot.slane %v1357_v41, 4  ;;  %v1364_v32 = vsel %vm1316_vm5, %v1363_v38, %v1329_v39  ;;  %v1362_v48 = vperm.slane %v1358_v19, %v3235_v63  ;;  %v1381_v52 = vperm.slane %v1377_v46, %v3235_v63 }
 0x303   : > { %v1355_v43 = vsel %vm1316_vm5, 0, %v1354_v40  ;;  %v1368_v45 = vperm.slane %v1364_v32, %v3235_v63 }
 0x304   : > { %v1383_v47 = vsel %vm1316_vm5, %v1382_v42, %v1355_v43 }
 0x305   : > { %v1369_v49 = vrot.slane %v1368_v45, 4  ;;  %v1387_v50 = vperm.slane %v1383_v47, %v3235_v63 }
 0x307   : > { %v1370_v51 = vsel %vm1316_vm5, %v1369_v49, %v1362_v48  ;;  %v1388_v53 = vrot.slane %v1387_v50, 4  ;;  %v2340_v50 = vld [vmem:[#allocation3] sm:$0xff] }
 0x308   : > { %v1374_v54 = vperm.slane %v1370_v51, %v3239_v17  ;;  %1593 = vmatpush.bf16.msrb.mxu1 %v2340_v50  ;;  %v2341_v51 = vld [vmem:[#allocation3 + $0x8] sm:$0xff] }
 0x309   : > { %v1389_v55 = vsel %vm1316_vm5, %v1388_v53, %v1381_v52  ;;  %v2342_v52 = vld [vmem:[#allocation3 + $0x10] sm:$0xff]  ;;  %1615 = vmatpush.bf16.msrb.mxu2 %v2341_v51  ;;  %v2343_v53 = vld [vmem:[#allocation3 + $0x18] sm:$0xff] }
 0x30a   : > { %v1393_v56 = vperm.slane %v1389_v55, %v3239_v17  ;;  %v1375_v57 = vrot.slane %v1374_v54, 4  ;;  %v1399_v58 = vshrl.u32 %v1374_v54, 16  ;;  %1637 = vmatpush.bf16.msrb.mxu3 %v2342_v52  ;;  %1659 = vmatpush.bf16.msra.mxu0 %v2343_v53 }
 0x30c   : > { %v1398_v59 = vpack.i.b16 %v1393_v56, %v1374_v54  ;;  %v1400_v60 = vshrl.u32 %v1393_v56, 16  ;;  %v1376_v61 = vsel %vm1316_vm5, 0, %v1375_v57  ;;  %v1394_v62 = vrot.slane %v1393_v56, 4 }
 0x30d   : > { %v1405_v7 = vshrl.u32 %v1376_v61, 16 }
 0x30e   : > { %2252 = vmatmul.msk.bf16.vlgmr.msra.gmra.mxu1 %vm1423_vm4, %v1398_v59  ;;  %v1401_v4 = vpack.i.b16 %v1400_v60, %v1399_v58  ;;  %v1395_v5 = vsel %vm1316_vm5, 0, %v1394_v62 }
 0x30f   : > { %v1404_v6 = vpack.i.b16 %v1395_v5, %v1376_v61  ;;  %v1406_v8 = vshrl.u32 %v1395_v5, 16 }
 0x310   : > { %2257 = vmatmul.msk.bf16.vlgmr.msra.gmra.mxu2 %vm1423_vm4, %v1401_v4 }
 0x311   : > { %2262 = vmatmul.msk.bf16.vlgmr.msra.gmra.mxu3 %vm1423_vm4, %v1404_v6  ;;  %v1407_v9 = vpack.i.b16 %v1406_v8, %v1405_v7 }
 0x313   : > { %2267 = vmatmul.msk.bf16.vlgmr.msrb.gmra.mxu0 %vm1423_vm4, %v1407_v9 }
 0x38b   : > { %v1439_v10 = vpop.f32.mrf.mxu1 }
 0x38c   : > { %v1440_v27 = vadd.f32 %v1439_v10, %v1409_v12 }
 0x38e   : > { %v1516_v30 = vsel %vm1515_vm6, %v1440_v27, -inf }
 0x390   : > { %v1511_v13 = vpop.f32.mrf.mxu0 }
 0x391   : > { %v1512_v14 = vadd.f32 %v1511_v13, %v1409_v12 }
 0x393   : > { %v1441_v15 = vpop.f32.mrf.mxu1  ;;  %v1463_v18 = vpop.f32.mrf.mxu2  ;;  %v1525_v20 = vsel %vm1515_vm6, %v1512_v14, -inf }
 0x394   : > { %v1464_v21 = vadd.f32 %v1463_v18, %v1409_v12  ;;  %1526 = vmax.xlane.f32.xlu0 %v1525_v20  ;;  %v1487_v22 = vpop.f32.mrf.mxu3 }
 0x395   : > { %v1488_v23 = vadd.f32 %v1487_v22, %v1409_v12 }
 0x396   : > { %v1519_v24 = vsel %vm1515_vm6, %v1464_v21, -inf }
 0x397   : > { %1520 = vmax.xlane.f32.xlu1 %v1519_v24  ;;  %v1522_v25 = vsel %vm1515_vm6, %v1488_v23, -inf }
 0x398   : > { %v1513_v26 = vpop.f32.mrf.mxu0  ;;  %1523 = vmax.xlane.f32.xlu2 %v1522_v25 }
 0x39b   : > { %v1465_v28 = vpop.f32.mrf.mxu2 }
 0x39c   : > { %v1489_v29 = vpop.f32.mrf.mxu3 }
 0x3a0   : > { %1517 = vmax.xlane.f32.xlu2 %v1516_v30 }
 0x407   : > { %v1527_v19 = vpop.xlane.xlu0 %1526 }
 0x408   : > { %v1531_v32 = vsub.f32 %v1512_v14, %v1527_v19 }
 0x40a   : > { %v1521_v33 = vpop.xlane.xlu1 %1520  ;;  %v1538_v45 = vmul.f32 1.442695, %v1531_v32 }
 0x40b   : > { %v1524_v31 = vpop.xlane.xlu2 %1523  ;;  %v1529_v36 = vsub.f32 %v1464_v21, %v1521_v33 }
 0x40c   : > { %v1530_v39 = vsub.f32 %v1488_v23, %v1524_v31 }
 0x40d   : > { %v1534_v16 = vmul.f32 1.442695, %v1529_v36 }
 0x40e   : > { %v1536_v41 = vmul.f32 1.442695, %v1530_v39 }
 0x413   : > { %v1518_v34 = vpop.xlane.xlu2 %1517 }
 0x414   : > { %v1528_v35 = vsub.f32 %v1440_v27, %v1518_v34 }
 0x416   : > { %v1532_v37 = vmul.f32 1.442695, %v1528_v35 }
 0x418   : > { %2494 = vpow2.f32 %v1532_v37 }
 0x419   : > { %2496 = vpow2.f32 %v1534_v16 }
 0x41a   : > { %2498 = vpow2.f32 %v1536_v41 }
 0x41b   : > { %2500 = vpow2.f32 %v1538_v45 }
 0x41e   : > { %v2495_v38 = vpop.eup %2494 }
 0x41f   : > { %v1540_v40 = vsel %vm1515_vm6, %v2495_v38, 0.0  ;;  %v2497_v42 = vpop.eup %2496 }
 0x420   : > { %1541 = vadd.xlane.f32.xlu2 %v1540_v40  ;;  %v1543_v43 = vsel %vm1515_vm6, %v2497_v42, 0.0  ;;  %v2499_v46 = vpop.eup %2498 }
 0x421   : > { %v1546_v47 = vsel %vm1515_vm6, %v2499_v46, 0.0  ;;  %v2501_v48 = vpop.eup %2500 }
 0x422   : > { %v1549_v49 = vsel %vm1515_vm6, %v2501_v48, 0.0 }
 0x428   : > { %1544 = vadd.xlane.f32.xlu2 %v1543_v43 }
 0x430   : > { %1547 = vadd.xlane.f32.xlu2 %v1546_v47 }
 0x438   : > { %1550 = vadd.xlane.f32.xlu2 %v1549_v49 }
 0x493   : > { %v1542_v54 = vpop.xlane.xlu2 %1541 }
 0x494   : > { %2502 = vrcp.f32 %v1542_v54 }
 0x49a   : > { %v2503_v55 = vpop.eup %2502 }
 0x49b   : > { %v1556_v56 = vmul.f32 %v2503_v55, %v2495_v38  ;;  %v1545_v57 = vpop.xlane.xlu2 %1544 }
 0x49c   : > { %2504 = vrcp.f32 %v1545_v57 }
 0x49d   : > { %v1560_v58 = vpack.c.bf16 %v1556_v56, %v1556_v56 }
 0x49f   : > { %1565 = vst.msk [vmem:[%s3052_s18] sm:$0xf] %vm1564_vm7, %v1560_v58  ;;  %2272 = vmatmul.msk.bf16.vlgmr.msrb.gmra.mxu1 %vm1515_vm6, %v1560_v58 }
 0x4a2   : > { %v2505_v59 = vpop.eup %2504 }
 0x4a3   : > { %v1557_v60 = vmul.f32 %v2505_v59, %v2497_v42  ;;  %v1548_v61 = vpop.xlane.xlu2 %1547 }
 0x4a4   : > { %2506 = vrcp.f32 %v1548_v61 }
 0x4a5   : > { %v1561_v62 = vpack.c.bf16 %v1557_v60, %v1557_v60 }
 0x4a7   : > { %1566 = vst.msk [vmem:[%s3052_s18 + $0x4] sm:$0xf] %vm1564_vm7, %v1561_v62  ;;  %2277 = vmatmul.msk.bf16.vlgmr.msrb.gmra.mxu2 %vm1515_vm6, %v1561_v62 }
 0x4aa   : > { %v2507_v4 = vpop.eup %2506 }
 0x4ab   : > { %v1558_v5 = vmul.f32 %v2507_v4, %v2499_v46  ;;  %v1551_v6 = vpop.xlane.xlu2 %1550 }
 0x4ac   : > { %2508 = vrcp.f32 %v1551_v6 }
 0x4ad   : > { %v1562_v7 = vpack.c.bf16 %v1558_v5, %v1558_v5 }
 0x4af   : > { %1567 = vst.msk [vmem:[%s3052_s18 + $0x8] sm:$0xf] %vm1564_vm7, %v1562_v7  ;;  %2282 = vmatmul.msk.bf16.vlgmr.msrb.gmra.mxu3 %vm1515_vm6, %v1562_v7 }
 0x4b2   : > { %v2509_v8 = vpop.eup %2508 }
 0x4b3   : > { %v1559_v9 = vmul.f32 %v2509_v8, %v2501_v48 }
 0x4b5   : > { %v1563_v10 = vpack.c.bf16 %v1559_v9, %v1559_v9 }
 0x4b7   : > { %1568 = vst.msk [vmem:[%s3052_s18 + $0xc] sm:$0xf] %vm1564_vm7, %v1563_v10  ;;  %2287 = vmatmul.msk.bf16.vlgmr.msra.gmra.mxu0 %vm1515_vm6, %v1563_v10 }
 0x51c   : > { %v1595_v11 = vpop.f32.mrf.mxu1 }
 0x51d   : > { %v1665_v15 = vpack.c.bf16 %v1595_v11, %v1595_v11 }
 0x51f   : > { %v1672_v20 = vshrl.u32 %v1665_v15, 16 }
 0x524   : > { %v1597_v12 = vpop.f32.mrf.mxu1 }
 0x52a   : > { %v1617_v13 = vpop.f32.mrf.mxu2 }
 0x52b   : > { %v1666_v14 = vpack.c.bf16 %v1617_v13, %v1617_v13 }
 0x52d   : > { %v1673_v18 = vshrl.u32 %v1666_v14, 16  ;;  %v1671_v21 = vpack.i.b16 %v1666_v14, %v1665_v15 }
 0x52f   : > { %v1674_v24 = vpack.i.b16 %v1673_v18, %v1672_v20  ;;  %v1685_v27 = vperm.slane %v1671_v21, %v3235_v63 }
 0x531   : > { %v1711_v29 = vperm.slane %v1674_v24, %v3235_v63  ;;  %v1693_v34 = vrot.slane %v1685_v27, 4 }
 0x532   : > { %v1619_v22 = vpop.f32.mrf.mxu2  ;;  %v1639_v23 = vpop.f32.mrf.mxu3 }
 0x533   : > { %v1667_v25 = vpack.c.bf16 %v1639_v23, %v1639_v23  ;;  %v1719_v16 = vrot.slane %v1711_v29, 4 }
 0x534   : > { %v1661_v26 = vpop.f32.mrf.mxu0 }
 0x535   : > { %v1668_v28 = vpack.c.bf16 %v1661_v26, %v1661_v26  ;;  %v1678_v30 = vshrl.u32 %v1667_v25, 16 }
 0x537   : > { %v1677_v31 = vpack.i.b16 %v1668_v28, %v1667_v25  ;;  %v1679_v33 = vshrl.u32 %v1668_v28, 16 }
 0x539   : > { %v1680_v35 = vpack.i.b16 %v1679_v33, %v1678_v30  ;;  %v1690_v36 = vperm.slane %v1677_v31, %v3235_v63 }
 0x53a   : > { %v1641_v37 = vpop.f32.mrf.mxu3 }
 0x53b   : > { %v1691_v38 = vrot.slane %v1690_v36, 4  ;;  %v1694_v39 = vsel %vm1316_vm5, %v1690_v36, %v1693_v34  ;;  %v1716_v40 = vperm.slane %v1680_v35, %v3235_v63  ;;  %v2345_v34 = vld [vmem:[#allocation9 + $0x8] sm:$0xff]  ;;  %v2344_v35 = vld [vmem:[#allocation9] sm:$0xff] }
 0x53c   : > { %v1702_v41 = vperm.slane %v1694_v39, %v3239_v17  ;;  %v1663_v19 = vpop.f32.mrf.mxu0  ;;  %1831 = vmatpush.bf16.msra.mxu1 %v2345_v34 }
 0x53d   : > { %v1692_v42 = vsel %vm1316_vm5, %v1691_v38, %v1685_v27  ;;  %v1717_v32 = vrot.slane %v1716_v40, 4  ;;  %v1720_v43 = vsel %vm1316_vm5, %v1716_v40, %v1719_v16 }
 0x53e   : > { %v1698_v45 = vperm.slane %v1692_v42, %v3239_v17  ;;  %v1705_v46 = vrot.slane %v1702_v41, 4  ;;  %v1728_v47 = vperm.slane %v1720_v43, %v3239_v17  ;;  %v2491_v41 = vld [vmem:[%s3435_s7] ss:$0 sm:$0xff] }
 0x53f   : > { %v1718_v48 = vsel %vm1316_vm5, %v1717_v32, %v1711_v29 }
 0x540   : > { %v1703_v49 = vrot.slane %v1698_v45, 4  ;;  %v1706_v50 = vsel %vm1316_vm5, 0, %v1705_v46  ;;  %v1724_v51 = vperm.slane %v1718_v48, %v3239_v17  ;;  %v1731_v52 = vrot.slane %v1728_v47, 4  ;;  %1832 = vmatpush.bf16.msra.mxu1 %v2344_v35 }
 0x541   : > { %v1738_v53 = vrot.slane %v1706_v50, 4  ;;  %v1733_v57 = vsel %vm1316_vm5, %v1705_v46, %v1698_v45  ;;  %v2796_v46 = vmov 32.0  }
 0x542   : > { %v1704_v54 = vsel %vm1316_vm5, 0, %v1703_v49  ;;  %v1729_v55 = vrot.slane %v1724_v51, 4  ;;  %v1732_v56 = vsel %vm1316_vm5, 0, %v1731_v52  ;;  %v1752_v62 = vsel %vm1316_vm5, %v1731_v52, %v1724_v51 }
 0x543   : > { %v1739_v58 = vsel %vm1316_vm5, %v1738_v53, %v1704_v54  ;;  %v1757_v59 = vrot.slane %v1732_v56, 4  ;;  %v1737_v5 = vperm.slane %v1733_v57, %v3235_v63  ;;  %v1756_v9 = vperm.slane %v1752_v62, %v3235_v63  ;;  %v2347_v57 = vld [vmem:[#allocation10 + $0x8] sm:$0xff]  ;;  %v2350_v62 = vld [vmem:[%s3492_s19 + $0x10] sm:$0xff] }
 0x544   : > { %v1730_v60 = vsel %vm1316_vm5, 0, %v1729_v55  ;;  %v1743_v61 = vperm.slane %v1739_v58, %v3235_v63  ;;  %2510 = vrcp.f32 %v2796_v46  ;;  %1906 = vmatpush.bf16.msra.mxu2 %v2347_v57  ;;  %v2346_v58 = vld [vmem:[#allocation10] sm:$0xff] }
 0x545   : > { %v1758_v4 = vsel %vm1316_vm5, %v1757_v59, %v1730_v60  ;;  %v2351_v59 = vld [vmem:[%s3492_s19 + $0x18] sm:$0xff] }
 0x546   : > { %v1744_v6 = vrot.slane %v1743_v61, 4  ;;  %v1762_v7 = vperm.slane %v1758_v4, %v3235_v63  ;;  %1959 = vmatpush.bf16.msra.mxu3 %v2351_v59 }
 0x548   : > { %v1745_v8 = vsel %vm1316_vm5, %v1744_v6, %v1737_v5  ;;  %v1763_v10 = vrot.slane %v1762_v7, 4  ;;  %1907 = vmatpush.bf16.msra.mxu2 %v2346_v58  ;;  %v2349_v5 = vld [vmem:[%s3492_s19 + $0x8] sm:$0xff] }
 0x549   : > { %v1749_v11 = vperm.slane %v1745_v8, %v3239_v17 }
 0x54a   : > { %v1764_v12 = vsel %vm1316_vm5, %v1763_v10, %v1756_v9  ;;  %v2511_v47 = vpop.eup %2510  ;;  %1960 = vmatpush.bf16.msra.mxu3 %v2350_v62 }
 0x54b   : > { %v1768_v13 = vperm.slane %v1764_v12, %v3239_v17  ;;  %v1750_v14 = vrot.slane %v1749_v11, 4  ;;  %v1774_v15 = vshrl.u32 %v1749_v11, 16  ;;  %v1843_v48 = vmul.f32 32.0, %v2511_v47 }
 0x54c   : > { %vm1847_vm9 = vweird.f32 %v2511_v47  ;;  %v1869_v12 = vperm.slane %v3027_v0, 0 }
 0x54d   : > { %v1775_v18 = vshrl.u32 %v1768_v13, 16  ;;  %v1751_v20 = vsel %vm1316_vm5, 0, %v1750_v14  ;;  %v1769_v21 = vrot.slane %v1768_v13, 4  ;;  %v1773_v22 = vpack.i.b16 %v1768_v13, %v1749_v11 }
 0x54e   : > { %v1780_v26 = vshrl.u32 %v1751_v20, 16  ;;  %v1844_v49 = vsub.f32 1.0, %v1843_v48  ;;  %1961 = vmatpush.bf16.msra.mxu3 %v2349_v5  ;;  %v1873_v14 = vperm.slane %v3032_v1, 0 }
 0x54f   : > { %v1776_v23 = vpack.i.b16 %v1775_v18, %v1774_v15  ;;  %v1770_v24 = vsel %vm1316_vm5, 0, %v1769_v21 }
 0x550   : > { %v1779_v25 = vpack.i.b16 %v1770_v24, %v1751_v20  ;;  %v1781_v63 = vshrl.u32 %v1770_v24, 16  ;;  %v1845_v50 = vmul.f32 %v2511_v47, %v1844_v49 }
 0x551   : > { %v1783_v27 = vunpack.c.l.b16 %v1776_v23 }
 0x552   : > { %v1787_v28 = vunpack.c.l.b16 %v1779_v25  ;;  %v1782_v29 = vpack.i.b16 %v1781_v63, %v1780_v26  ;;  %v1846_v51 = vadd.f32 %v2511_v47, %v1845_v50  ;;  %v2493_v63 = vld [vmem:[%s3494_s13] ss:$0 sm:$0xff] }
 0x553   : > { %v1784_v30 = vpack.c.b16 %v1783_v27, %v1783_v27 }
 0x554   : > { %v1788_v31 = vpack.c.b16 %v1787_v28, %v1787_v28  ;;  %v1791_v33 = vunpack.c.l.b16 %v1782_v29  ;;  %v3332_v52 = vsel %vm1847_vm9, %v2511_v47, %v1846_v51 }
 0x555   : > { %1785 = vrot.lane.b32.xlu2 %v1784_v30, %s2793_s21  ;;  %s2035_s21 = sshll.u32 %s3052_s18, 4  ;;  %s2036_s21 = int_to_ptr.vmem [resolvable:$true] %s2035_s21 }
 0x556   : > { %1789 = vrot.lane.b32.xlu1 %v1788_v31, %s2794_s17  ;;  %v1792_v17 = vpack.c.b16 %v1791_v33, %v1791_v33  ;;  %s3493_s17 = sld [smem:[#allocation36_spill]] }
 0x558   : > { %1793 = vrot.lane.b32.xlu0 %v1792_v17, %s2795_s23  ;;  %s2006_s23 = scalar_lea.sflag [#allocation14], %s3012_s4 }
 0x55c   : > { %v2492_v23 = vld [vmem:[%s3493_s17] ss:$0 sm:$0xff]  ;;  %s2037_s17 = sshll.u32 %s2034_s29, 4  ;;  %s2038_s17 = int_to_ptr.hbm [resolvable:$true] %s2037_s17 }
 0x55d   : > { %s2650_s20 = sshra.s32 %s2038_s17, 4  ;;  %s2651_s20 = int_to_ptr.hbm [resolvable:$true] %s2650_s20 }
 0x55e   : > { %s2652_s13 = scalar_lea.hbm %s2651_s20, 16  ;;  %p2657_p9 = scmp.lt.s32.totalorder %s2651_s20, %s3497_s1 }
 0x55f   : > { %p2653_p5 = scmp.ne.s32.totalorder %s2651_s20, %s2652_s13  ;;  %p2658_p10 = scmp.lt.s32.totalorder %s2656_s15, %s2652_s13 }
 0x561   : > { %p2654_p6 = pnand %p2653_p5, %p2942_p3  ;;  %p2659_p11 = por %p2658_p10, %p2657_p9 }
 0x563   : > { %p2655_p7 = pneg %p2654_p6 }
 0x565   : > { %p2660_p12 = pnand %p2659_p11, %p2655_p7 }
 0x5af   : > { %v1786_v36 = vpop.permute.xlu2 %1785 }
 0x5b0   : > { %v1797_v37 = vsel %vm1423_vm4, %v1773_v22, %v1786_v36  ;;  %v2348_v22 = vld [vmem:[%s3492_s19] sm:$0xff] }
 0x5b1   : > { %1962 = vmatpush.bf16.msra.mxu3 %v2348_v22 }
 0x5c8   : > { %v1790_v16 = vpop.permute.xlu1 %1789 }
 0x5c9   : > { %v1799_v38 = vsel %vm1515_vm6, %v1797_v37, %v1790_v16 }
 0x5ca   : > { %v1794_v39 = vpop.permute.xlu0 %1793 }
 0x5cb   : > { %v1802_v40 = vsel %vm1800_vm8, %v1799_v38, %v1794_v39 }
 0x5cc   : > { %2296 = vmatmul.msk.bf16.vlgmr.msra.gmra.mxu1 %vm1268_vm3, %v1802_v40 }
 0x649   : > { %v1834_v19 = vpop.f32.mrf.mxu1 }
 0x64a   : > { %v1835_v42 = vadd.f32 %v2491_v41, %v1834_v19 }
 0x64c   : > { %v1838_v32 = vadd.f32 %v1835_v42, %v3223_v44 }
 0x64e   : > { %v1839_v43 = vsel %vm1268_vm3, %v1838_v32, 0.0 }
 0x64f   : > { %1840 = vadd.xlane.f32.xlu2 %v1839_v43 }
 0x651   : > { %v1836_v45 = vpop.f32.mrf.mxu1 }
 0x6c2   : > { %v1841_v53 = vpop.xlane.xlu2 %1840 }
 0x6c3   : > { %v1849_v54 = vmul.f32 %v3332_v52, %v1841_v53 }
 0x6c5   : > { %v1850_v55 = vsub.f32 %v1838_v32, %v1849_v54 }
 0x6c7   : > { %v1851_v56 = vmul.f32 %v1850_v55, %v1850_v55 }
 0x6c9   : > { %v1852_v44 = vsel %vm1268_vm3, %v1851_v56, 0.0 }
 0x6ca   : > { %1853 = vadd.xlane.f32.xlu1 %v1852_v44 }
 0x73d   : > { %v1854_v60 = vpop.xlane.xlu1 %1853 }
 0x73e   : > { %v1855_v61 = vmul.f32 %v1854_v60, %v3332_v52 }
 0x740   : > { %v1856_v4 = vadd.f32 1e-05, %v1855_v61 }
 0x742   : > { %2512 = vrsqrt.f32 %v1856_v4  ;;  %vm1863_vm11 = vweird.f32 %v1856_v4 }
 0x748   : > { %v2513_v6 = vpop.eup %2512 }
 0x749   : > { %v1858_v7 = vmul.f32 %v2513_v6, %v1856_v4  ;;  %vm1864_vm10 = vweird.f32 %v2513_v6 }
 0x74a   : > { %vm1865_vm12 = vmor %vm1863_vm11, %vm1864_vm10 }
 0x74b   : > { %v1859_v8 = vmul.f32 %v2513_v6, %v1858_v7 }
 0x74d   : > { %v1860_v9 = vmul.f32 0.5, %v1859_v8 }
 0x74f   : > { %v1861_v10 = vsub.f32 1.5, %v1860_v9 }
 0x751   : > { %v1862_v11 = vmul.f32 %v2513_v6, %v1861_v10 }
 0x753   : > { %v1866_v13 = vsel %vm1865_vm12, %v2513_v6, %v1862_v11 }
 0x754   : > { %v1867_v15 = vmul.f32 %v1866_v13, %v1850_v55 }
 0x756   : > { %v1871_v18 = vmul.f32 %v1869_v12, %v1867_v15 }
 0x758   : > { %v1875_v20 = vadd.f32 %v1873_v14, %v1871_v18 }
 0x75a   : > { %v1876_v21 = vpack.c.bf16 %v1875_v20, %v1875_v20 }
 0x75c   : > { %2305 = vmatmul.msk.bf16.vlgmr.msra.gmra.mxu2 %vm1268_vm3, %v1876_v21 }
 0x7df   : > { %v1909_v0 = vpop.f32.mrf.mxu2 }
 0x7e0   : > { %v1910_v24 = vadd.f32 %v2492_v23, %v1909_v0 }
 0x7e2   : > { %v1913_v25 = vmax.f32 %v1910_v24, 0.0 }
 0x7e4   : > { %v1914_v1 = vpack.c.bf16 %v1913_v25, %v1913_v25 }
 0x7e6   : > { %2322 = vmatmul.msk.bf16.vlgmr.msra.gmra.mxu3 %vm1951_vm13, %v1914_v1 }
 0x7e7   : > { %v1911_v26 = vpop.f32.mrf.mxu2 }
 0x869   : > { %v1964_v27 = vpop.f32.mrf.mxu3 }
 0x86a   : > { %v1965_v28 = vadd.f32 %v2493_v63, %v1964_v27 }
 0x86c   : > { %v1968_v29 = vadd.f32 %v1965_v28, %v1875_v20 }
 0x86e   : > { %v1969_v30 = vsel %vm1268_vm3, %v1968_v29, 0.0 }
 0x86f   : > { %1970 = vadd.xlane.f32.xlu0 %v1969_v30 }
 0x871   : > { %v1966_v31 = vpop.f32.mrf.mxu3 }
 0x8e2   : > { %v1971_v33 = vpop.xlane.xlu0 %1970 }
 0x8e3   : > { %v1972_v17 = vmul.f32 %v1971_v33, %v3332_v52 }
 0x8e5   : > { %v1973_v34 = vsub.f32 %v1968_v29, %v1972_v17 }
 0x8e7   : > { %v1974_v35 = vmul.f32 %v1973_v34, %v1973_v34 }
 0x8e9   : > { %v1975_v36 = vsel %vm1268_vm3, %v1974_v35, 0.0 }
 0x8ea   : > { %1976 = vadd.xlane.f32.xlu2 %v1975_v36 }
 0x8eb   : > { %2663 = shalt.err (!%p2660_p12)
}
 0x8ec   : > { %s2797_s18 = smov 64   ;;  %s2798_s16 = smov 128   ;;  %v1992_v43 = vperm.slane %v3037_v2, 0  ;;  %v1996_v47 = vperm.slane %v3042_v3, 0 }
 0x8ed   : > { %s2799_s24 = smov 4   ;;  %s2325_s2 = sshll.u32 %s2762_s28, 1 }
 0x8ee   : > { %2369 = dma.vmem_to_hbm [thread:$0]  (%p2942_p3), %s2036_s21, 256, %s2038_s17, %s2006_s23, %s2797_s18, %s2798_s16, %s2799_s24  }
 0x8ef   : > { %s2016_s3 = sadd.s32 %s2758_s27, %s2325_s2  ;;  %s3498_s29 = sld [smem:[#allocation39_spill]] }
 0x8f0   : > { %s2326_s5 = sshll.u32 %s2016_s3, 3  ;;  %s2020_s27 = sshll.u32 %s3050_s22, 4  ;;  %s2021_s27 = int_to_ptr.vmem [resolvable:$true] %s2020_s27 }
 0x8f1   : > { %s2001_s23 = scalar_lea.sflag [#allocation6], %s3012_s4 }
 0x8f5   : > { %s3499_s21 = smov %s3498_s29  ;;  %s2018_s17 = scalar_lea.hbm %s3498_s29, %s2326_s5 }
 0x8f6   : > { %s2022_s28 = sshll.u32 %s2018_s17, 4  ;;  %s2684_s18 = scalar_lea.hbm %s3499_s21, 32  ;;  %s2023_s28 = int_to_ptr.hbm [resolvable:$true] %s2022_s28 }
 0x8f7   : > { %s2678_s20 = sshra.s32 %s2023_s28, 4  ;;  %s2679_s20 = int_to_ptr.hbm [resolvable:$true] %s2678_s20 }
 0x8f8   : > { %s2680_s13 = scalar_lea.hbm %s2679_s20, 8  ;;  %p2685_p2 = scmp.lt.s32.totalorder %s2679_s20, %s3499_s21 }
 0x8f9   : > { %p2681_p13 = scmp.ne.s32.totalorder %s2679_s20, %s2680_s13  ;;  %p2686_p4 = scmp.lt.s32.totalorder %s2684_s18, %s2680_s13 }
 0x8fb   : > { %p2682_p0 = pnand %p2681_p13, %p2942_p3  ;;  %p2687_p5 = por %p2686_p4, %p2685_p2 }
 0x8fd   : > { %p2683_p1 = pneg %p2682_p0 }
 0x8ff   : > { %p2688_p6 = pnand %p2687_p5, %p2683_p1 }
 0x95d   : > { %v1977_v37 = vpop.xlane.xlu2 %1976 }
 0x95e   : > { %v1978_v16 = vmul.f32 %v1977_v37, %v3332_v52 }
 0x960   : > { %v1979_v38 = vadd.f32 1e-05, %v1978_v16 }
 0x962   : > { %2514 = vrsqrt.f32 %v1979_v38  ;;  %vm1986_vm15 = vweird.f32 %v1979_v38 }
 0x968   : > { %v2515_v39 = vpop.eup %2514 }
 0x969   : > { %v1981_v40 = vmul.f32 %v2515_v39, %v1979_v38  ;;  %vm1987_vm14 = vweird.f32 %v2515_v39 }
 0x96a   : > { %vm1988_vm0 = vmor %vm1986_vm15, %vm1987_vm14 }
 0x96b   : > { %v1982_v41 = vmul.f32 %v2515_v39, %v1981_v40 }
 0x96d   : > { %v1983_v19 = vmul.f32 0.5, %v1982_v41 }
 0x96f   : > { %v1984_v42 = vsub.f32 1.5, %v1983_v19 }
 0x971   : > { %v1985_v32 = vmul.f32 %v2515_v39, %v1984_v42 }
 0x973   : > { %v1989_v45 = vsel %vm1988_vm0, %v2515_v39, %v1985_v32 }
 0x974   : > { %v1990_v46 = vmul.f32 %v1989_v45, %v1973_v34 }
 0x976   : > { %v1994_v48 = vmul.f32 %v1992_v43, %v1990_v46 }
 0x978   : > { %v1998_v49 = vadd.f32 %v1996_v47, %v1994_v48 }
 0x97a   : > { %1999 = vst.msk [vmem:[%s3050_s22] sm:$0xff] %vm1268_vm3, %v1998_v49 }
 0x97b   : > { %2691 = shalt.err (!%p2688_p6)
}
 0x97c   : > { %2368 = dma.vmem_to_hbm [thread:$0]  (%p2942_p3), %s2021_s27, 128, %s2023_s28, %s2001_s23  }
 0x97d PF: > { %s3500_s4 = sld [smem:[#allocation24_spill]] }
 0x97e   : > { %s3501_s22 = sld [smem:[#allocation20_spill]] }
 0x983   : > { %p2400_p7 = scmp.ge.s32.totalorder %s3500_s4, 2 }
 0x984   : > { %s2052_s3 = sand.u32 1, %s3501_s22  }
 0x985   : > { %p2386_p9 = pnand %p2400_p7, %p2951_p8  ;;  %s2053_s5 = scalar_lea.sflag [#allocation6], %s2052_s3 }
 0x987   : > { %p2387_p10 = pneg %p2386_p9 }
 0x989   : > { %2737 = dma.done.wait (%p2387_p10), %s2053_s5, 128  }
 0x98a   : > { %2739 = vsyncadd (%p2387_p10), %s2053_s5, 4294967168  ;;  %s2063_s26 = scalar_lea.sflag [#allocation14], %s2052_s3 }
 0x98b   : > { %2741 = dma.done.wait (%p2387_p10), %s2063_s26, 256  }
 0x98c   : > { %2743 = vsyncadd (%p2387_p10), %s2063_s26, 4294967040  ;;  %s37_s30 = sadd.s32 1, %s3500_s4   ;;  %s3503_s14 = sld [smem:[#allocation21_spill]] }
 0x98d   : > { %p34_p11 = scmp.ge.s32.totalorder %s37_s30, 6   ;;  %s3504_s26 = sld [smem:[#allocation29_spill]] }
 0x98e   : > { %s3505_s27 = sld [smem:[#allocation22_spill]]  ;;  %s3509_s24 = smov %s2750_s25 }
 0x98f   : > { %s3506_s28 = sld [smem:[#allocation23_spill]]  ;;  %36 = sbr.rel (!%p34_p11) target bundleno = 22 (0x16), region = 161 }
 0x990   : > { %s3507_s29 = sld [smem:[#allocation25_spill]] }
 0x991   : > { %s3508_s0 = sld [smem:[#allocation27_spill]] }
 0x992   : > { %s3510_s25 = smov %s3503_s14 }
 0x994   :  { %2069 = vsyncpa [#allocation5], 1 }
 0x995   :  { %2071 = vsyncpa [#allocation5 + $0x1], 1 }
 0x996   :  { %2072 = vsyncpa [#allocation8], 1 }
 0x997   :  { %2073 = vsyncpa [#allocation11], 1 }
 0x998   :  { %2074 = vsyncpa [#allocation6], 1 }
 0x999   :  { %2076 = vsyncpa [#allocation6 + $0x1], 1 }
 0x99a   :  { %2077 = vsyncpa [#allocation14], 1 }
 0x99b   :  { %2079 = vsyncpa [#allocation14 + $0x1], 1 }

</bundles_post_ra>
